<compile_context>
chip_gen: v7x
topology: tpu7x:2x2x1
jax: 0.10.0
libtpu: 0.0.40
codegen_flags: <defaults>
</compile_context>

<pallas_src>
import jax
import jax.numpy as jnp
from jax.experimental import pallas as pl
from jax.experimental.pallas import tpu as pltpu

# ----------------------------- config (small ViT) ---------------------------
IMG = 16
PATCH = 4
IN_CH = 3
DIM = 32
HEADS = 2
HEAD_DIM = DIM // HEADS
MLP_DIM = 64
DEPTH = 2
NUM_CLASSES = 10
GP = IMG // PATCH
NUM_PATCHES = GP * GP
SEQ = NUM_PATCHES + 1            # +1 CLS token
PATCH_DIM = IN_CH * PATCH * PATCH
LN_EPS = 1e-6
ATT_SCALE = HEAD_DIM ** -0.5
HEAD_PAD = 128                   # lane-dense logits slab (last dim)
HEAD_ROWS = 8                    # sublane-dense logits slab (row 0 = CLS)


# ----------------------------- kernel helpers -------------------------------
def _layernorm(v, g, b):
    mu = jnp.mean(v, axis=-1, keepdims=True)
    var = jnp.mean((v - mu) ** 2, axis=-1, keepdims=True)
    return (v - mu) * jax.lax.rsqrt(var + LN_EPS) * g + b


def _gelu_tanh(x):
    return 0.5 * x * (1.0 + jnp.tanh(0.7978845608028654 * (x + 0.044715 * x * x * x)))


# ----------------------------- fused ViT kernel ------------------------------
def _vit_fused_kernel(patches_ref, wp_ref, add_ref,
                      ln1g_ref, ln1b_ref, wq_ref, bq_ref, wk_ref, bk_ref,
                      wv_ref, bv_ref, wo_ref, bo_ref, ln2g_ref, ln2b_ref,
                      w1_ref, b1_ref, w2_ref, b2_ref,
                      lnfg_ref, lnfb_ref, hw_ref, hb_ref, o_ref):
    f32 = jnp.float32

    # ---- patch embedding (conv k=stride=patch == matmul) + cls/pos/bias add ----
    # patches row 0 is all-zero (padded in the wrapper), so row 0 of `pe` is 0
    # and the single add below installs CLS+pos[0] there and pos[i]+conv_bias on
    # the patch rows.  No in-kernel concatenate.
    pe = jnp.dot(patches_ref[0], wp_ref[...], preferred_element_type=f32)  # (SEQ, DIM)
    x = pe + add_ref[...]                                                  # (SEQ, DIM)

    # All block parameters (tiny) loaded once; static indexing below, no lane slicing.
    ln1g = ln1g_ref[...]; ln1b = ln1b_ref[...]
    wq = wq_ref[...]; bq = bq_ref[...]
    wk = wk_ref[...]; bk = bk_ref[...]
    wv = wv_ref[...]; bv = bv_ref[...]
    wo = wo_ref[...]; bo = bo_ref[...]
    ln2g = ln2g_ref[...]; ln2b = ln2b_ref[...]
    w1 = w1_ref[...]; b1 = b1_ref[...]
    w2 = w2_ref[...]; b2 = b2_ref[...]

    for d in range(DEPTH):                       # static unroll: DEPTH = 2
        # ---- multi-head self-attention ----
        h = _layernorm(x, ln1g[d], ln1b[d])                                # (SEQ, DIM)
        attn = jnp.zeros((SEQ, DIM), f32)
        for hd in range(HEADS):                  # static unroll: HEADS = 2
            q = jnp.dot(h, wq[d, hd], preferred_element_type=f32) + bq[d, hd]
            k = jnp.dot(h, wk[d, hd], preferred_element_type=f32) + bk[d, hd]
            v = jnp.dot(h, wv[d, hd], preferred_element_type=f32) + bv[d, hd]
            # q @ k.T without an explicit transpose
            s = jax.lax.dot_general(q, k, (((1,), (1,)), ((), ())),
                                    preferred_element_type=f32) * ATT_SCALE
            s = s - jnp.max(s, axis=-1, keepdims=True)
            p = jnp.exp(s)
            inv = pl.reciprocal(jnp.sum(p, axis=-1, keepdims=True), approx=True)
            oh = jnp.dot(p, v, preferred_element_type=f32) * inv           # (SEQ, HEAD_DIM)
            # per-head output projection, accumulated (replaces concat + W_o)
            attn = attn + jnp.dot(oh, wo[d, hd], preferred_element_type=f32)
        x = x + attn + bo[d]

        # ---- MLP ----
        h = _layernorm(x, ln2g[d], ln2b[d])
        h1 = jnp.dot(h, w1[d], preferred_element_type=f32) + b1[d]
        h1 = _gelu_tanh(h1)
        x = x + jnp.dot(h1, w2[d], preferred_element_type=f32) + b2[d]

    # ---- final LN + head on an (8, 128) lane/sublane-dense slab ----
    # Only row 0 (the CLS token) is meaningful; rows 1..7 are discarded by the wrapper.
    hf = _layernorm(x[0:HEAD_ROWS, :], lnfg_ref[...], lnfb_ref[...])       # (8, DIM)
    o_ref[0] = jnp.dot(hf, hw_ref[...], preferred_element_type=f32) + hb_ref[...]


# ----------------------------- parameter init (timm-style layout) -----------
def init_params(key):
    ks = iter(jax.random.split(key, 64))
    nrm = lambda shape, s=0.02: (s * jax.random.normal(next(ks), shape)).astype(jnp.float32)
    params = {
        "patch_w": nrm((PATCH_DIM, DIM)),
        "patch_b": jnp.zeros((DIM,), jnp.float32),
        "cls": nrm((1, 1, DIM)),
        "pos": nrm((1, SEQ, DIM)),
        "blocks": [],
        "ln_f_g": jnp.ones((1, DIM), jnp.float32),
        "ln_f_b": jnp.zeros((1, DIM), jnp.float32),
        "head_w": nrm((DIM, NUM_CLASSES)),
        "head_b": jnp.zeros((NUM_CLASSES,), jnp.float32),
    }
    for _ in range(DEPTH):
        params["blocks"].append([
            jnp.ones((1, DIM), jnp.float32),          # ln1 gamma
            jnp.zeros((1, DIM), jnp.float32),         # ln1 beta
            nrm((DIM, 3 * DIM)),                      # W_qkv
            jnp.zeros((1, 3 * DIM), jnp.float32),     # b_qkv
            nrm((DIM, DIM)),                          # W_o
            jnp.zeros((1, DIM), jnp.float32),         # b_o
            jnp.ones((1, DIM), jnp.float32),          # ln2 gamma
            jnp.zeros((1, DIM), jnp.float32),         # ln2 beta
            nrm((DIM, MLP_DIM)),                      # W_1
            jnp.zeros((1, MLP_DIM), jnp.float32),     # b_1
            nrm((MLP_DIM, DIM)),                      # W_2
            jnp.zeros((1, DIM), jnp.float32),         # b_2
        ])
    return params


# ----------------------------- one-time offline re-layout -------------------
def pack_params(params):
    """Re-layout timm-style params into the kernel's per-head stacked layout."""
    def stack(fn):
        return jnp.stack([fn(blk) for blk in params["blocks"]], axis=0)

    def qkv_w(wqkv, which):     # (DIM, 3*DIM) -> (HEADS, DIM, HEAD_DIM)
        w = wqkv[:, which * DIM:(which + 1) * DIM]
        return w.reshape(DIM, HEADS, HEAD_DIM).transpose(1, 0, 2)

    def qkv_b(bqkv, which):     # (1, 3*DIM) -> (HEADS, 1, HEAD_DIM)
        b = bqkv[0, which * DIM:(which + 1) * DIM]
        return b.reshape(HEADS, HEAD_DIM)[:, None, :]

    # Fold cls token, positional embedding and conv bias into one additive tensor.
    add = params["pos"][0]
    add = add.at[0].add(params["cls"][0, 0])
    add = add.at[1:].add(params["patch_b"])

    hw = jnp.zeros((DIM, HEAD_PAD), jnp.float32).at[:, :NUM_CLASSES].set(params["head_w"])
    hb = jnp.zeros((1, HEAD_PAD), jnp.float32).at[:, :NUM_CLASSES].set(params["head_b"][None, :])

    return {
        "w_patch": params["patch_w"],                             # (48, 32)
        "tok_add": add,                                           # (SEQ, DIM)
        "ln1_g": stack(lambda b: b[0]),                           # (D, 1, DIM)
        "ln1_b": stack(lambda b: b[1]),
        "wq": stack(lambda b: qkv_w(b[2], 0)),                    # (D, H, DIM, HEAD_DIM)
        "bq": stack(lambda b: qkv_b(b[3], 0)),                    # (D, H, 1, HEAD_DIM)
        "wk": stack(lambda b: qkv_w(b[2], 1)),
        "bk": stack(lambda b: qkv_b(b[3], 1)),
        "wv": stack(lambda b: qkv_w(b[2], 2)),
        "bv": stack(lambda b: qkv_b(b[3], 2)),
        "wo": stack(lambda b: b[4].reshape(HEADS, HEAD_DIM, DIM)),  # (D, H, HEAD_DIM, DIM)
        "bo": stack(lambda b: b[5]),                              # (D, 1, DIM)
        "ln2_g": stack(lambda b: b[6]),
        "ln2_b": stack(lambda b: b[7]),
        "w1": stack(lambda b: b[8]),                              # (D, DIM, MLP)
        "b1": stack(lambda b: b[9]),                              # (D, 1, MLP)
        "w2": stack(lambda b: b[10]),                             # (D, MLP, DIM)
        "b2": stack(lambda b: b[11]),                             # (D, 1, DIM)
        "ln_f_g": params["ln_f_g"],                               # (1, DIM)
        "ln_f_b": params["ln_f_b"],
        "head_w": hw,                                             # (DIM, 128)
        "head_b": hb,                                             # (1, 128)
    }


_PACK_ORDER = ("w_patch", "tok_add", "ln1_g", "ln1_b", "wq", "bq", "wk", "bk",
               "wv", "bv", "wo", "bo", "ln2_g", "ln2_b", "w1", "b1", "w2", "b2",
               "ln_f_g", "ln_f_b", "head_w", "head_b")


# ----------------------------- forward ---------------------------------------
def vit_forward(x_nchw, packed):
    B = x_nchw.shape[0]
    # conv(k=PATCH, stride=PATCH) == patchify + matmul; patchify is pure layout glue.
    p = x_nchw.reshape(B, IN_CH, GP, PATCH, GP, PATCH)
    p = p.transpose(0, 2, 4, 1, 3, 5)                         # (B, gh, gw, C, ph, pw)
    patches = p.reshape(B, NUM_PATCHES, PATCH_DIM)
    # Leading zero row (CLS position) so the kernel needs a single add, no concat.
    patches = jnp.pad(patches, ((0, 0), (1, 0), (0, 0)))      # (B, SEQ, PATCH_DIM)

    plist = [packed[k] for k in _PACK_ORDER]
    in_specs = [pl.BlockSpec((1, SEQ, PATCH_DIM), lambda b: (b, 0, 0))]
    for arr in plist:                                          # params: same block every step
        in_specs.append(pl.BlockSpec(arr.shape, lambda b, n=arr.ndim: (0,) * n))

    out = pl.pallas_call(
        _vit_fused_kernel,
        out_shape=jax.ShapeDtypeStruct((B, HEAD_ROWS, HEAD_PAD), jnp.float32),
        grid=(B,),
        in_specs=in_specs,
        out_specs=pl.BlockSpec((1, HEAD_ROWS, HEAD_PAD), lambda b: (b, 0, 0)),
        compiler_params=pltpu.CompilerParams(dimension_semantics=("parallel",)),
    )(patches, *plist)
    return out[:, 0, :NUM_CLASSES]


# ----------------------------- main ------------------------------------------
if __name__ == "__main__":
    key = jax.random.PRNGKey(0)
    kx, kp = jax.random.split(key)
    x = jax.random.normal(kx, (2, IN_CH, IMG, IMG), dtype=jnp.float32)  # NCHW
    params = init_params(kp)
    packed = pack_params(params)

    logits = jax.jit(vit_forward)(x, packed)
    jax.block_until_ready(logits)
    assert logits.shape == (2, NUM_CLASSES)
    assert bool(jnp.all(jnp.isfinite(logits)))
    print("KERNEL_OK")
</pallas_src>

<mosaic_0001>
module attributes {stable_mosaic.version = 11 : i64} {
  func.func @_vit_fused_kernel(%arg0: i32, %arg1: memref<1x17x48xf32, #tpu.memory_space<vmem>>, %arg2: memref<48x32xf32, #tpu.memory_space<vmem>>, %arg3: memref<17x32xf32, #tpu.memory_space<vmem>>, %arg4: memref<2x1x32xf32, #tpu.memory_space<vmem>>, %arg5: memref<2x1x32xf32, #tpu.memory_space<vmem>>, %arg6: memref<2x2x32x16xf32, #tpu.memory_space<vmem>>, %arg7: memref<2x2x1x16xf32, #tpu.memory_space<vmem>>, %arg8: memref<2x2x32x16xf32, #tpu.memory_space<vmem>>, %arg9: memref<2x2x1x16xf32, #tpu.memory_space<vmem>>, %arg10: memref<2x2x32x16xf32, #tpu.memory_space<vmem>>, %arg11: memref<2x2x1x16xf32, #tpu.memory_space<vmem>>, %arg12: memref<2x2x16x32xf32, #tpu.memory_space<vmem>>, %arg13: memref<2x1x32xf32, #tpu.memory_space<vmem>>, %arg14: memref<2x1x32xf32, #tpu.memory_space<vmem>>, %arg15: memref<2x1x32xf32, #tpu.memory_space<vmem>>, %arg16: memref<2x32x64xf32, #tpu.memory_space<vmem>>, %arg17: memref<2x1x64xf32, #tpu.memory_space<vmem>>, %arg18: memref<2x64x32xf32, #tpu.memory_space<vmem>>, %arg19: memref<2x1x32xf32, #tpu.memory_space<vmem>>, %arg20: memref<1x32xf32, #tpu.memory_space<vmem>>, %arg21: memref<1x32xf32, #tpu.memory_space<vmem>>, %arg22: memref<32x128xf32, #tpu.memory_space<vmem>>, %arg23: memref<1x128xf32, #tpu.memory_space<vmem>>, %arg24: memref<1x8x128xf32, #tpu.memory_space<vmem>>) attributes {dimension_semantics = [#tpu.dimension_semantics<parallel>], iteration_bounds = array<i64: 2>, scalar_prefetch = 0 : i64, scratch_operands = 0 : i64, tpu.core_type = #tpu.core_type<tc>, window_params = [{transform_indices = @transform_0, window_bounds = array<i64: 1, 17, 48>}, {pipeline_mode = #tpu.pipeline_mode<synchronous>, transform_indices = @transform_1, window_bounds = array<i64: 48, 32>}, {pipeline_mode = #tpu.pipeline_mode<synchronous>, transform_indices = @transform_2, window_bounds = array<i64: 17, 32>}, {pipeline_mode = #tpu.pipeline_mode<synchronous>, transform_indices = @transform_3, window_bounds = array<i64: 2, 1, 32>}, {pipeline_mode = #tpu.pipeline_mode<synchronous>, transform_indices = @transform_4, window_bounds = array<i64: 2, 1, 32>}, {pipeline_mode = #tpu.pipeline_mode<synchronous>, transform_indices = @transform_5, window_bounds = array<i64: 2, 2, 32, 16>}, {pipeline_mode = #tpu.pipeline_mode<synchronous>, transform_indices = @transform_6, window_bounds = array<i64: 2, 2, 1, 16>}, {pipeline_mode = #tpu.pipeline_mode<synchronous>, transform_indices = @transform_7, window_bounds = array<i64: 2, 2, 32, 16>}, {pipeline_mode = #tpu.pipeline_mode<synchronous>, transform_indices = @transform_8, window_bounds = array<i64: 2, 2, 1, 16>}, {pipeline_mode = #tpu.pipeline_mode<synchronous>, transform_indices = @transform_9, window_bounds = array<i64: 2, 2, 32, 16>}, {pipeline_mode = #tpu.pipeline_mode<synchronous>, transform_indices = @transform_10, window_bounds = array<i64: 2, 2, 1, 16>}, {pipeline_mode = #tpu.pipeline_mode<synchronous>, transform_indices = @transform_11, window_bounds = array<i64: 2, 2, 16, 32>}, {pipeline_mode = #tpu.pipeline_mode<synchronous>, transform_indices = @transform_12, window_bounds = array<i64: 2, 1, 32>}, {pipeline_mode = #tpu.pipeline_mode<synchronous>, transform_indices = @transform_13, window_bounds = array<i64: 2, 1, 32>}, {pipeline_mode = #tpu.pipeline_mode<synchronous>, transform_indices = @transform_14, window_bounds = array<i64: 2, 1, 32>}, {pipeline_mode = #tpu.pipeline_mode<synchronous>, transform_indices = @transform_15, window_bounds = array<i64: 2, 32, 64>}, {pipeline_mode = #tpu.pipeline_mode<synchronous>, transform_indices = @transform_16, window_bounds = array<i64: 2, 1, 64>}, {pipeline_mode = #tpu.pipeline_mode<synchronous>, transform_indices = @transform_17, window_bounds = array<i64: 2, 64, 32>}, {pipeline_mode = #tpu.pipeline_mode<synchronous>, transform_indices = @transform_18, window_bounds = array<i64: 2, 1, 32>}, {pipeline_mode = #tpu.pipeline_mode<synchronous>, transform_indices = @transform_19, window_bounds = array<i64: 1, 32>}, {pipeline_mode = #tpu.pipeline_mode<synchronous>, transform_indices = @transform_20, window_bounds = array<i64: 1, 32>}, {pipeline_mode = #tpu.pipeline_mode<synchronous>, transform_indices = @transform_21, window_bounds = array<i64: 32, 128>}, {pipeline_mode = #tpu.pipeline_mode<synchronous>, transform_indices = @transform_22, window_bounds = array<i64: 1, 128>}, {transform_indices = @transform_23, window_bounds = array<i64: 1, 8, 128>}]} {
    %c0 = arith.constant 0 : index
    %c0_0 = arith.constant 0 : index
    %c0_1 = arith.constant 0 : index
    %0 = vector.load %arg1[%c0, %c0_0, %c0_1] : memref<1x17x48xf32, #tpu.memory_space<vmem>>, vector<1x17x48xf32>
    %1 = vector.shape_cast %0 : vector<1x17x48xf32> to vector<17x48xf32>
    %c0_2 = arith.constant 0 : index
    %c0_3 = arith.constant 0 : index
    %2 = vector.load %arg2[%c0_2, %c0_3] : memref<48x32xf32, #tpu.memory_space<vmem>>, vector<48x32xf32>
    %cst = arith.constant dense<0.000000e+00> : vector<17x32xf32>
    %3 = tpu.matmul %1, %2, %cst {dimension_numbers = #tpu.dot_dimension_numbers<[1], [0], [0], [1], [0, 0, 1, 1], [], []>} : vector<17x48xf32>, vector<48x32xf32>, vector<17x32xf32> -> vector<17x32xf32>
    %c0_4 = arith.constant 0 : index
    %c0_5 = arith.constant 0 : index
    %4 = vector.load %arg3[%c0_4, %c0_5] : memref<17x32xf32, #tpu.memory_space<vmem>>, vector<17x32xf32>
    %5 = arith.addf %3, %4 : vector<17x32xf32>
    %c0_6 = arith.constant 0 : index
    %c0_7 = arith.constant 0 : index
    %c0_8 = arith.constant 0 : index
    %6 = vector.load %arg4[%c0_6, %c0_7, %c0_8] : memref<2x1x32xf32, #tpu.memory_space<vmem>>, vector<2x1x32xf32>
    %c0_9 = arith.constant 0 : index
    %c0_10 = arith.constant 0 : index
    %c0_11 = arith.constant 0 : index
    %7 = vector.load %arg5[%c0_9, %c0_10, %c0_11] : memref<2x1x32xf32, #tpu.memory_space<vmem>>, vector<2x1x32xf32>
    %c0_12 = arith.constant 0 : index
    %c0_13 = arith.constant 0 : index
    %c0_14 = arith.constant 0 : index
    %c0_15 = arith.constant 0 : index
    %8 = vector.load %arg6[%c0_12, %c0_13, %c0_14, %c0_15] : memref<2x2x32x16xf32, #tpu.memory_space<vmem>>, vector<2x2x32x16xf32>
    %c0_16 = arith.constant 0 : index
    %c0_17 = arith.constant 0 : index
    %c0_18 = arith.constant 0 : index
    %c0_19 = arith.constant 0 : index
    %9 = vector.load %arg7[%c0_16, %c0_17, %c0_18, %c0_19] : memref<2x2x1x16xf32, #tpu.memory_space<vmem>>, vector<2x2x1x16xf32>
    %c0_20 = arith.constant 0 : index
    %c0_21 = arith.constant 0 : index
    %c0_22 = arith.constant 0 : index
    %c0_23 = arith.constant 0 : index
    %10 = vector.load %arg8[%c0_20, %c0_21, %c0_22, %c0_23] : memref<2x2x32x16xf32, #tpu.memory_space<vmem>>, vector<2x2x32x16xf32>
    %c0_24 = arith.constant 0 : index
    %c0_25 = arith.constant 0 : index
    %c0_26 = arith.constant 0 : index
    %c0_27 = arith.constant 0 : index
    %11 = vector.load %arg9[%c0_24, %c0_25, %c0_26, %c0_27] : memref<2x2x1x16xf32, #tpu.memory_space<vmem>>, vector<2x2x1x16xf32>
    %c0_28 = arith.constant 0 : index
    %c0_29 = arith.constant 0 : index
    %c0_30 = arith.constant 0 : index
    %c0_31 = arith.constant 0 : index
    %12 = vector.load %arg10[%c0_28, %c0_29, %c0_30, %c0_31] : memref<2x2x32x16xf32, #tpu.memory_space<vmem>>, vector<2x2x32x16xf32>
    %c0_32 = arith.constant 0 : index
    %c0_33 = arith.constant 0 : index
    %c0_34 = arith.constant 0 : index
    %c0_35 = arith.constant 0 : index
    %13 = vector.load %arg11[%c0_32, %c0_33, %c0_34, %c0_35] : memref<2x2x1x16xf32, #tpu.memory_space<vmem>>, vector<2x2x1x16xf32>
    %c0_36 = arith.constant 0 : index
    %c0_37 = arith.constant 0 : index
    %c0_38 = arith.constant 0 : index
    %c0_39 = arith.constant 0 : index
    %14 = vector.load %arg12[%c0_36, %c0_37, %c0_38, %c0_39] : memref<2x2x16x32xf32, #tpu.memory_space<vmem>>, vector<2x2x16x32xf32>
    %c0_40 = arith.constant 0 : index
    %c0_41 = arith.constant 0 : index
    %c0_42 = arith.constant 0 : index
    %15 = vector.load %arg13[%c0_40, %c0_41, %c0_42] : memref<2x1x32xf32, #tpu.memory_space<vmem>>, vector<2x1x32xf32>
    %c0_43 = arith.constant 0 : index
    %c0_44 = arith.constant 0 : index
    %c0_45 = arith.constant 0 : index
    %16 = vector.load %arg14[%c0_43, %c0_44, %c0_45] : memref<2x1x32xf32, #tpu.memory_space<vmem>>, vector<2x1x32xf32>
    %c0_46 = arith.constant 0 : index
    %c0_47 = arith.constant 0 : index
    %c0_48 = arith.constant 0 : index
    %17 = vector.load %arg15[%c0_46, %c0_47, %c0_48] : memref<2x1x32xf32, #tpu.memory_space<vmem>>, vector<2x1x32xf32>
    %c0_49 = arith.constant 0 : index
    %c0_50 = arith.constant 0 : index
    %c0_51 = arith.constant 0 : index
    %18 = vector.load %arg16[%c0_49, %c0_50, %c0_51] : memref<2x32x64xf32, #tpu.memory_space<vmem>>, vector<2x32x64xf32>
    %c0_52 = arith.constant 0 : index
    %c0_53 = arith.constant 0 : index
    %c0_54 = arith.constant 0 : index
    %19 = vector.load %arg17[%c0_52, %c0_53, %c0_54] : memref<2x1x64xf32, #tpu.memory_space<vmem>>, vector<2x1x64xf32>
    %c0_55 = arith.constant 0 : index
    %c0_56 = arith.constant 0 : index
    %c0_57 = arith.constant 0 : index
    %20 = vector.load %arg18[%c0_55, %c0_56, %c0_57] : memref<2x64x32xf32, #tpu.memory_space<vmem>>, vector<2x64x32xf32>
    %c0_58 = arith.constant 0 : index
    %c0_59 = arith.constant 0 : index
    %c0_60 = arith.constant 0 : index
    %21 = vector.load %arg19[%c0_58, %c0_59, %c0_60] : memref<2x1x32xf32, #tpu.memory_space<vmem>>, vector<2x1x32xf32>
    %22 = vector.extract_strided_slice %6 {offsets = [0, 0, 0], sizes = [1, 1, 32], strides = [1, 1, 1]} : vector<2x1x32xf32> to vector<1x1x32xf32>
    %23 = vector.shape_cast %22 : vector<1x1x32xf32> to vector<1x32xf32>
    %24 = vector.extract_strided_slice %7 {offsets = [0, 0, 0], sizes = [1, 1, 32], strides = [1, 1, 1]} : vector<2x1x32xf32> to vector<1x1x32xf32>
    %25 = vector.shape_cast %24 : vector<1x1x32xf32> to vector<1x32xf32>
    %cst_61 = arith.constant dense<0.000000e+00> : vector<17xf32>
    %26 = vector.multi_reduction <add>, %5, %cst_61 [1] : vector<17x32xf32> to vector<17xf32>
    %27 = vector.shape_cast %26 : vector<17xf32> to vector<17x1xf32>
    %cst_62 = arith.constant 3.200000e+01 : f32
    %28 = vector.broadcast %cst_62 : f32 to vector<17x1xf32>
    %29 = arith.divf %27, %28 : vector<17x1xf32>
    %30 = vector.broadcast %29 : vector<17x1xf32> to vector<17x32xf32>
    %31 = arith.subf %5, %30 : vector<17x32xf32>
    %32 = arith.mulf %31, %31 : vector<17x32xf32>
    %cst_63 = arith.constant dense<0.000000e+00> : vector<17xf32>
    %33 = vector.multi_reduction <add>, %32, %cst_63 [1] : vector<17x32xf32> to vector<17xf32>
    %34 = vector.shape_cast %33 : vector<17xf32> to vector<17x1xf32>
    %cst_64 = arith.constant 3.200000e+01 : f32
    %35 = vector.broadcast %cst_64 : f32 to vector<17x1xf32>
    %36 = arith.divf %34, %35 : vector<17x1xf32>
    %37 = vector.broadcast %29 : vector<17x1xf32> to vector<17x32xf32>
    %38 = arith.subf %5, %37 : vector<17x32xf32>
    %cst_65 = arith.constant 9.99999997E-7 : f32
    %39 = vector.broadcast %cst_65 : f32 to vector<17x1xf32>
    %40 = arith.addf %36, %39 : vector<17x1xf32>
    %41 = math.rsqrt %40 : vector<17x1xf32>
    %42 = vector.broadcast %41 : vector<17x1xf32> to vector<17x32xf32>
    %43 = arith.mulf %38, %42 : vector<17x32xf32>
    %44 = vector.broadcast %23 : vector<1x32xf32> to vector<17x32xf32>
    %45 = arith.mulf %43, %44 : vector<17x32xf32>
    %46 = vector.broadcast %25 : vector<1x32xf32> to vector<17x32xf32>
    %47 = arith.addf %45, %46 : vector<17x32xf32>
    %cst_66 = arith.constant 0.000000e+00 : f32
    %48 = vector.broadcast %cst_66 : f32 to vector<17x32xf32>
    %49 = vector.extract_strided_slice %8 {offsets = [0, 0, 0, 0], sizes = [1, 1, 32, 16], strides = [1, 1, 1, 1]} : vector<2x2x32x16xf32> to vector<1x1x32x16xf32>
    %50 = vector.shape_cast %49 : vector<1x1x32x16xf32> to vector<32x16xf32>
    %cst_67 = arith.constant dense<0.000000e+00> : vector<17x16xf32>
    %51 = tpu.matmul %47, %50, %cst_67 {dimension_numbers = #tpu.dot_dimension_numbers<[1], [0], [0], [1], [0, 0, 1, 1], [], []>} : vector<17x32xf32>, vector<32x16xf32>, vector<17x16xf32> -> vector<17x16xf32>
    %52 = vector.extract_strided_slice %9 {offsets = [0, 0, 0, 0], sizes = [1, 1, 1, 16], strides = [1, 1, 1, 1]} : vector<2x2x1x16xf32> to vector<1x1x1x16xf32>
    %53 = vector.shape_cast %52 : vector<1x1x1x16xf32> to vector<1x16xf32>
    %54 = vector.broadcast %53 : vector<1x16xf32> to vector<17x16xf32>
    %55 = arith.addf %51, %54 : vector<17x16xf32>
    %56 = vector.extract_strided_slice %10 {offsets = [0, 0, 0, 0], sizes = [1, 1, 32, 16], strides = [1, 1, 1, 1]} : vector<2x2x32x16xf32> to vector<1x1x32x16xf32>
    %57 = vector.shape_cast %56 : vector<1x1x32x16xf32> to vector<32x16xf32>
    %cst_68 = arith.constant dense<0.000000e+00> : vector<17x16xf32>
    %58 = tpu.matmul %47, %57, %cst_68 {dimension_numbers = #tpu.dot_dimension_numbers<[1], [0], [0], [1], [0, 0, 1, 1], [], []>} : vector<17x32xf32>, vector<32x16xf32>, vector<17x16xf32> -> vector<17x16xf32>
    %59 = vector.extract_strided_slice %11 {offsets = [0, 0, 0, 0], sizes = [1, 1, 1, 16], strides = [1, 1, 1, 1]} : vector<2x2x1x16xf32> to vector<1x1x1x16xf32>
    %60 = vector.shape_cast %59 : vector<1x1x1x16xf32> to vector<1x16xf32>
    %61 = vector.broadcast %60 : vector<1x16xf32> to vector<17x16xf32>
    %62 = arith.addf %58, %61 : vector<17x16xf32>
    %63 = vector.extract_strided_slice %12 {offsets = [0, 0, 0, 0], sizes = [1, 1, 32, 16], strides = [1, 1, 1, 1]} : vector<2x2x32x16xf32> to vector<1x1x32x16xf32>
    %64 = vector.shape_cast %63 : vector<1x1x32x16xf32> to vector<32x16xf32>
    %cst_69 = arith.constant dense<0.000000e+00> : vector<17x16xf32>
    %65 = tpu.matmul %47, %64, %cst_69 {dimension_numbers = #tpu.dot_dimension_numbers<[1], [0], [0], [1], [0, 0, 1, 1], [], []>} : vector<17x32xf32>, vector<32x16xf32>, vector<17x16xf32> -> vector<17x16xf32>
    %66 = vector.extract_strided_slice %13 {offsets = [0, 0, 0, 0], sizes = [1, 1, 1, 16], strides = [1, 1, 1, 1]} : vector<2x2x1x16xf32> to vector<1x1x1x16xf32>
    %67 = vector.shape_cast %66 : vector<1x1x1x16xf32> to vector<1x16xf32>
    %68 = vector.broadcast %67 : vector<1x16xf32> to vector<17x16xf32>
    %69 = arith.addf %65, %68 : vector<17x16xf32>
    %cst_70 = arith.constant dense<0.000000e+00> : vector<17x17xf32>
    %70 = tpu.matmul %55, %62, %cst_70 {dimension_numbers = #tpu.dot_dimension_numbers<[1], [1], [0], [0], [0, 0, 1, 0], [], []>} : vector<17x16xf32>, vector<17x16xf32>, vector<17x17xf32> -> vector<17x17xf32>
    %cst_71 = arith.constant 2.500000e-01 : f32
    %71 = vector.broadcast %cst_71 : f32 to vector<17x17xf32>
    %72 = arith.mulf %70, %71 : vector<17x17xf32>
    %cst_72 = arith.constant dense<0xFF800000> : vector<17xf32>
    %73 = vector.multi_reduction <maximumf>, %72, %cst_72 [1] : vector<17x17xf32> to vector<17xf32>
    %74 = vector.shape_cast %73 : vector<17xf32> to vector<17x1xf32>
    %75 = vector.broadcast %74 : vector<17x1xf32> to vector<17x17xf32>
    %76 = arith.subf %72, %75 : vector<17x17xf32>
    %77 = math.exp %76 : vector<17x17xf32>
    %cst_73 = arith.constant dense<0.000000e+00> : vector<17xf32>
    %78 = vector.multi_reduction <add>, %77, %cst_73 [1] : vector<17x17xf32> to vector<17xf32>
    %79 = vector.shape_cast %78 : vector<17xf32> to vector<17x1xf32>
    %80 = tpu.reciprocal %79 {approx = true} : vector<17x1xf32> -> vector<17x1xf32>
    %cst_74 = arith.constant dense<0.000000e+00> : vector<17x16xf32>
    %81 = tpu.matmul %77, %69, %cst_74 {dimension_numbers = #tpu.dot_dimension_numbers<[1], [0], [0], [1], [0, 0, 1, 1], [], []>} : vector<17x17xf32>, vector<17x16xf32>, vector<17x16xf32> -> vector<17x16xf32>
    %82 = vector.broadcast %80 : vector<17x1xf32> to vector<17x16xf32>
    %83 = arith.mulf %81, %82 : vector<17x16xf32>
    %84 = vector.extract_strided_slice %14 {offsets = [0, 0, 0, 0], sizes = [1, 1, 16, 32], strides = [1, 1, 1, 1]} : vector<2x2x16x32xf32> to vector<1x1x16x32xf32>
    %85 = vector.shape_cast %84 : vector<1x1x16x32xf32> to vector<16x32xf32>
    %cst_75 = arith.constant dense<0.000000e+00> : vector<17x32xf32>
    %86 = tpu.matmul %83, %85, %cst_75 {dimension_numbers = #tpu.dot_dimension_numbers<[1], [0], [0], [1], [0, 0, 1, 1], [], []>} : vector<17x16xf32>, vector<16x32xf32>, vector<17x32xf32> -> vector<17x32xf32>
    %87 = arith.addf %48, %86 : vector<17x32xf32>
    %88 = vector.extract_strided_slice %8 {offsets = [0, 1, 0, 0], sizes = [1, 1, 32, 16], strides = [1, 1, 1, 1]} : vector<2x2x32x16xf32> to vector<1x1x32x16xf32>
    %89 = vector.shape_cast %88 : vector<1x1x32x16xf32> to vector<32x16xf32>
    %cst_76 = arith.constant dense<0.000000e+00> : vector<17x16xf32>
    %90 = tpu.matmul %47, %89, %cst_76 {dimension_numbers = #tpu.dot_dimension_numbers<[1], [0], [0], [1], [0, 0, 1, 1], [], []>} : vector<17x32xf32>, vector<32x16xf32>, vector<17x16xf32> -> vector<17x16xf32>
    %91 = vector.extract_strided_slice %9 {offsets = [0, 1, 0, 0], sizes = [1, 1, 1, 16], strides = [1, 1, 1, 1]} : vector<2x2x1x16xf32> to vector<1x1x1x16xf32>
    %92 = vector.shape_cast %91 : vector<1x1x1x16xf32> to vector<1x16xf32>
    %93 = vector.broadcast %92 : vector<1x16xf32> to vector<17x16xf32>
    %94 = arith.addf %90, %93 : vector<17x16xf32>
    %95 = vector.extract_strided_slice %10 {offsets = [0, 1, 0, 0], sizes = [1, 1, 32, 16], strides = [1, 1, 1, 1]} : vector<2x2x32x16xf32> to vector<1x1x32x16xf32>
    %96 = vector.shape_cast %95 : vector<1x1x32x16xf32> to vector<32x16xf32>
    %cst_77 = arith.constant dense<0.000000e+00> : vector<17x16xf32>
    %97 = tpu.matmul %47, %96, %cst_77 {dimension_numbers = #tpu.dot_dimension_numbers<[1], [0], [0], [1], [0, 0, 1, 1], [], []>} : vector<17x32xf32>, vector<32x16xf32>, vector<17x16xf32> -> vector<17x16xf32>
    %98 = vector.extract_strided_slice %11 {offsets = [0, 1, 0, 0], sizes = [1, 1, 1, 16], strides = [1, 1, 1, 1]} : vector<2x2x1x16xf32> to vector<1x1x1x16xf32>
    %99 = vector.shape_cast %98 : vector<1x1x1x16xf32> to vector<1x16xf32>
    %100 = vector.broadcast %99 : vector<1x16xf32> to vector<17x16xf32>
    %101 = arith.addf %97, %100 : vector<17x16xf32>
    %102 = vector.extract_strided_slice %12 {offsets = [0, 1, 0, 0], sizes = [1, 1, 32, 16], strides = [1, 1, 1, 1]} : vector<2x2x32x16xf32> to vector<1x1x32x16xf32>
    %103 = vector.shape_cast %102 : vector<1x1x32x16xf32> to vector<32x16xf32>
    %cst_78 = arith.constant dense<0.000000e+00> : vector<17x16xf32>
    %104 = tpu.matmul %47, %103, %cst_78 {dimension_numbers = #tpu.dot_dimension_numbers<[1], [0], [0], [1], [0, 0, 1, 1], [], []>} : vector<17x32xf32>, vector<32x16xf32>, vector<17x16xf32> -> vector<17x16xf32>
    %105 = vector.extract_strided_slice %13 {offsets = [0, 1, 0, 0], sizes = [1, 1, 1, 16], strides = [1, 1, 1, 1]} : vector<2x2x1x16xf32> to vector<1x1x1x16xf32>
    %106 = vector.shape_cast %105 : vector<1x1x1x16xf32> to vector<1x16xf32>
    %107 = vector.broadcast %106 : vector<1x16xf32> to vector<17x16xf32>
    %108 = arith.addf %104, %107 : vector<17x16xf32>
    %cst_79 = arith.constant dense<0.000000e+00> : vector<17x17xf32>
    %109 = tpu.matmul %94, %101, %cst_79 {dimension_numbers = #tpu.dot_dimension_numbers<[1], [1], [0], [0], [0, 0, 1, 0], [], []>} : vector<17x16xf32>, vector<17x16xf32>, vector<17x17xf32> -> vector<17x17xf32>
    %cst_80 = arith.constant 2.500000e-01 : f32
    %110 = vector.broadcast %cst_80 : f32 to vector<17x17xf32>
    %111 = arith.mulf %109, %110 : vector<17x17xf32>
    %cst_81 = arith.constant dense<0xFF800000> : vector<17xf32>
    %112 = vector.multi_reduction <maximumf>, %111, %cst_81 [1] : vector<17x17xf32> to vector<17xf32>
    %113 = vector.shape_cast %112 : vector<17xf32> to vector<17x1xf32>
    %114 = vector.broadcast %113 : vector<17x1xf32> to vector<17x17xf32>
    %115 = arith.subf %111, %114 : vector<17x17xf32>
    %116 = math.exp %115 : vector<17x17xf32>
    %cst_82 = arith.constant dense<0.000000e+00> : vector<17xf32>
    %117 = vector.multi_reduction <add>, %116, %cst_82 [1] : vector<17x17xf32> to vector<17xf32>
    %118 = vector.shape_cast %117 : vector<17xf32> to vector<17x1xf32>
    %119 = tpu.reciprocal %118 {approx = true} : vector<17x1xf32> -> vector<17x1xf32>
    %cst_83 = arith.constant dense<0.000000e+00> : vector<17x16xf32>
    %120 = tpu.matmul %116, %108, %cst_83 {dimension_numbers = #tpu.dot_dimension_numbers<[1], [0], [0], [1], [0, 0, 1, 1], [], []>} : vector<17x17xf32>, vector<17x16xf32>, vector<17x16xf32> -> vector<17x16xf32>
    %121 = vector.broadcast %119 : vector<17x1xf32> to vector<17x16xf32>
    %122 = arith.mulf %120, %121 : vector<17x16xf32>
    %123 = vector.extract_strided_slice %14 {offsets = [0, 1, 0, 0], sizes = [1, 1, 16, 32], strides = [1, 1, 1, 1]} : vector<2x2x16x32xf32> to vector<1x1x16x32xf32>
    %124 = vector.shape_cast %123 : vector<1x1x16x32xf32> to vector<16x32xf32>
    %cst_84 = arith.constant dense<0.000000e+00> : vector<17x32xf32>
    %125 = tpu.matmul %122, %124, %cst_84 {dimension_numbers = #tpu.dot_dimension_numbers<[1], [0], [0], [1], [0, 0, 1, 1], [], []>} : vector<17x16xf32>, vector<16x32xf32>, vector<17x32xf32> -> vector<17x32xf32>
    %126 = arith.addf %87, %125 : vector<17x32xf32>
    %127 = arith.addf %5, %126 : vector<17x32xf32>
    %128 = vector.extract_strided_slice %15 {offsets = [0, 0, 0], sizes = [1, 1, 32], strides = [1, 1, 1]} : vector<2x1x32xf32> to vector<1x1x32xf32>
    %129 = vector.shape_cast %128 : vector<1x1x32xf32> to vector<1x32xf32>
    %130 = vector.broadcast %129 : vector<1x32xf32> to vector<17x32xf32>
    %131 = arith.addf %127, %130 : vector<17x32xf32>
    %132 = vector.extract_strided_slice %16 {offsets = [0, 0, 0], sizes = [1, 1, 32], strides = [1, 1, 1]} : vector<2x1x32xf32> to vector<1x1x32xf32>
    %133 = vector.shape_cast %132 : vector<1x1x32xf32> to vector<1x32xf32>
    %134 = vector.extract_strided_slice %17 {offsets = [0, 0, 0], sizes = [1, 1, 32], strides = [1, 1, 1]} : vector<2x1x32xf32> to vector<1x1x32xf32>
    %135 = vector.shape_cast %134 : vector<1x1x32xf32> to vector<1x32xf32>
    %cst_85 = arith.constant dense<0.000000e+00> : vector<17xf32>
    %136 = vector.multi_reduction <add>, %131, %cst_85 [1] : vector<17x32xf32> to vector<17xf32>
    %137 = vector.shape_cast %136 : vector<17xf32> to vector<17x1xf32>
    %cst_86 = arith.constant 3.200000e+01 : f32
    %138 = vector.broadcast %cst_86 : f32 to vector<17x1xf32>
    %139 = arith.divf %137, %138 : vector<17x1xf32>
    %140 = vector.broadcast %139 : vector<17x1xf32> to vector<17x32xf32>
    %141 = arith.subf %131, %140 : vector<17x32xf32>
    %142 = arith.mulf %141, %141 : vector<17x32xf32>
    %cst_87 = arith.constant dense<0.000000e+00> : vector<17xf32>
    %143 = vector.multi_reduction <add>, %142, %cst_87 [1] : vector<17x32xf32> to vector<17xf32>
    %144 = vector.shape_cast %143 : vector<17xf32> to vector<17x1xf32>
    %cst_88 = arith.constant 3.200000e+01 : f32
    %145 = vector.broadcast %cst_88 : f32 to vector<17x1xf32>
    %146 = arith.divf %144, %145 : vector<17x1xf32>
    %147 = vector.broadcast %139 : vector<17x1xf32> to vector<17x32xf32>
    %148 = arith.subf %131, %147 : vector<17x32xf32>
    %cst_89 = arith.constant 9.99999997E-7 : f32
    %149 = vector.broadcast %cst_89 : f32 to vector<17x1xf32>
    %150 = arith.addf %146, %149 : vector<17x1xf32>
    %151 = math.rsqrt %150 : vector<17x1xf32>
    %152 = vector.broadcast %151 : vector<17x1xf32> to vector<17x32xf32>
    %153 = arith.mulf %148, %152 : vector<17x32xf32>
    %154 = vector.broadcast %133 : vector<1x32xf32> to vector<17x32xf32>
    %155 = arith.mulf %153, %154 : vector<17x32xf32>
    %156 = vector.broadcast %135 : vector<1x32xf32> to vector<17x32xf32>
    %157 = arith.addf %155, %156 : vector<17x32xf32>
    %158 = vector.extract_strided_slice %18 {offsets = [0, 0, 0], sizes = [1, 32, 64], strides = [1, 1, 1]} : vector<2x32x64xf32> to vector<1x32x64xf32>
    %159 = vector.shape_cast %158 : vector<1x32x64xf32> to vector<32x64xf32>
    %cst_90 = arith.constant dense<0.000000e+00> : vector<17x64xf32>
    %160 = tpu.matmul %157, %159, %cst_90 {dimension_numbers = #tpu.dot_dimension_numbers<[1], [0], [0], [1], [0, 0, 1, 1], [], []>} : vector<17x32xf32>, vector<32x64xf32>, vector<17x64xf32> -> vector<17x64xf32>
    %161 = vector.extract_strided_slice %19 {offsets = [0, 0, 0], sizes = [1, 1, 64], strides = [1, 1, 1]} : vector<2x1x64xf32> to vector<1x1x64xf32>
    %162 = vector.shape_cast %161 : vector<1x1x64xf32> to vector<1x64xf32>
    %163 = vector.broadcast %162 : vector<1x64xf32> to vector<17x64xf32>
    %164 = arith.addf %160, %163 : vector<17x64xf32>
    %cst_91 = arith.constant 5.000000e-01 : f32
    %165 = vector.broadcast %cst_91 : f32 to vector<17x64xf32>
    %166 = arith.mulf %165, %164 : vector<17x64xf32>
    %cst_92 = arith.constant 4.471500e-02 : f32
    %167 = vector.broadcast %cst_92 : f32 to vector<17x64xf32>
    %168 = arith.mulf %167, %164 : vector<17x64xf32>
    %169 = arith.mulf %168, %164 : vector<17x64xf32>
    %170 = arith.mulf %169, %164 : vector<17x64xf32>
    %171 = arith.addf %164, %170 : vector<17x64xf32>
    %cst_93 = arith.constant 0.797884583 : f32
    %172 = vector.broadcast %cst_93 : f32 to vector<17x64xf32>
    %173 = arith.mulf %172, %171 : vector<17x64xf32>
    %174 = math.tanh %173 : vector<17x64xf32>
    %cst_94 = arith.constant 1.000000e+00 : f32
    %175 = vector.broadcast %cst_94 : f32 to vector<17x64xf32>
    %176 = arith.addf %175, %174 : vector<17x64xf32>
    %177 = arith.mulf %166, %176 : vector<17x64xf32>
    %178 = vector.extract_strided_slice %20 {offsets = [0, 0, 0], sizes = [1, 64, 32], strides = [1, 1, 1]} : vector<2x64x32xf32> to vector<1x64x32xf32>
    %179 = vector.shape_cast %178 : vector<1x64x32xf32> to vector<64x32xf32>
    %cst_95 = arith.constant dense<0.000000e+00> : vector<17x32xf32>
    %180 = tpu.matmul %177, %179, %cst_95 {dimension_numbers = #tpu.dot_dimension_numbers<[1], [0], [0], [1], [0, 0, 1, 1], [], []>} : vector<17x64xf32>, vector<64x32xf32>, vector<17x32xf32> -> vector<17x32xf32>
    %181 = arith.addf %131, %180 : vector<17x32xf32>
    %182 = vector.extract_strided_slice %21 {offsets = [0, 0, 0], sizes = [1, 1, 32], strides = [1, 1, 1]} : vector<2x1x32xf32> to vector<1x1x32xf32>
    %183 = vector.shape_cast %182 : vector<1x1x32xf32> to vector<1x32xf32>
    %184 = vector.broadcast %183 : vector<1x32xf32> to vector<17x32xf32>
    %185 = arith.addf %181, %184 : vector<17x32xf32>
    %186 = vector.extract_strided_slice %6 {offsets = [1, 0, 0], sizes = [1, 1, 32], strides = [1, 1, 1]} : vector<2x1x32xf32> to vector<1x1x32xf32>
    %187 = vector.shape_cast %186 : vector<1x1x32xf32> to vector<1x32xf32>
    %188 = vector.extract_strided_slice %7 {offsets = [1, 0, 0], sizes = [1, 1, 32], strides = [1, 1, 1]} : vector<2x1x32xf32> to vector<1x1x32xf32>
    %189 = vector.shape_cast %188 : vector<1x1x32xf32> to vector<1x32xf32>
    %cst_96 = arith.constant dense<0.000000e+00> : vector<17xf32>
    %190 = vector.multi_reduction <add>, %185, %cst_96 [1] : vector<17x32xf32> to vector<17xf32>
    %191 = vector.shape_cast %190 : vector<17xf32> to vector<17x1xf32>
    %cst_97 = arith.constant 3.200000e+01 : f32
    %192 = vector.broadcast %cst_97 : f32 to vector<17x1xf32>
    %193 = arith.divf %191, %192 : vector<17x1xf32>
    %194 = vector.broadcast %193 : vector<17x1xf32> to vector<17x32xf32>
    %195 = arith.subf %185, %194 : vector<17x32xf32>
    %196 = arith.mulf %195, %195 : vector<17x32xf32>
    %cst_98 = arith.constant dense<0.000000e+00> : vector<17xf32>
    %197 = vector.multi_reduction <add>, %196, %cst_98 [1] : vector<17x32xf32> to vector<17xf32>
    %198 = vector.shape_cast %197 : vector<17xf32> to vector<17x1xf32>
    %cst_99 = arith.constant 3.200000e+01 : f32
    %199 = vector.broadcast %cst_99 : f32 to vector<17x1xf32>
    %200 = arith.divf %198, %199 : vector<17x1xf32>
    %201 = vector.broadcast %193 : vector<17x1xf32> to vector<17x32xf32>
    %202 = arith.subf %185, %201 : vector<17x32xf32>
    %cst_100 = arith.constant 9.99999997E-7 : f32
    %203 = vector.broadcast %cst_100 : f32 to vector<17x1xf32>
    %204 = arith.addf %200, %203 : vector<17x1xf32>
    %205 = math.rsqrt %204 : vector<17x1xf32>
    %206 = vector.broadcast %205 : vector<17x1xf32> to vector<17x32xf32>
    %207 = arith.mulf %202, %206 : vector<17x32xf32>
    %208 = vector.broadcast %187 : vector<1x32xf32> to vector<17x32xf32>
    %209 = arith.mulf %207, %208 : vector<17x32xf32>
    %210 = vector.broadcast %189 : vector<1x32xf32> to vector<17x32xf32>
    %211 = arith.addf %209, %210 : vector<17x32xf32>
    %cst_101 = arith.constant 0.000000e+00 : f32
    %212 = vector.broadcast %cst_101 : f32 to vector<17x32xf32>
    %213 = vector.extract_strided_slice %8 {offsets = [1, 0, 0, 0], sizes = [1, 1, 32, 16], strides = [1, 1, 1, 1]} : vector<2x2x32x16xf32> to vector<1x1x32x16xf32>
    %214 = vector.shape_cast %213 : vector<1x1x32x16xf32> to vector<32x16xf32>
    %cst_102 = arith.constant dense<0.000000e+00> : vector<17x16xf32>
    %215 = tpu.matmul %211, %214, %cst_102 {dimension_numbers = #tpu.dot_dimension_numbers<[1], [0], [0], [1], [0, 0, 1, 1], [], []>} : vector<17x32xf32>, vector<32x16xf32>, vector<17x16xf32> -> vector<17x16xf32>
    %216 = vector.extract_strided_slice %9 {offsets = [1, 0, 0, 0], sizes = [1, 1, 1, 16], strides = [1, 1, 1, 1]} : vector<2x2x1x16xf32> to vector<1x1x1x16xf32>
    %217 = vector.shape_cast %216 : vector<1x1x1x16xf32> to vector<1x16xf32>
    %218 = vector.broadcast %217 : vector<1x16xf32> to vector<17x16xf32>
    %219 = arith.addf %215, %218 : vector<17x16xf32>
    %220 = vector.extract_strided_slice %10 {offsets = [1, 0, 0, 0], sizes = [1, 1, 32, 16], strides = [1, 1, 1, 1]} : vector<2x2x32x16xf32> to vector<1x1x32x16xf32>
    %221 = vector.shape_cast %220 : vector<1x1x32x16xf32> to vector<32x16xf32>
    %cst_103 = arith.constant dense<0.000000e+00> : vector<17x16xf32>
    %222 = tpu.matmul %211, %221, %cst_103 {dimension_numbers = #tpu.dot_dimension_numbers<[1], [0], [0], [1], [0, 0, 1, 1], [], []>} : vector<17x32xf32>, vector<32x16xf32>, vector<17x16xf32> -> vector<17x16xf32>
    %223 = vector.extract_strided_slice %11 {offsets = [1, 0, 0, 0], sizes = [1, 1, 1, 16], strides = [1, 1, 1, 1]} : vector<2x2x1x16xf32> to vector<1x1x1x16xf32>
    %224 = vector.shape_cast %223 : vector<1x1x1x16xf32> to vector<1x16xf32>
    %225 = vector.broadcast %224 : vector<1x16xf32> to vector<17x16xf32>
    %226 = arith.addf %222, %225 : vector<17x16xf32>
    %227 = vector.extract_strided_slice %12 {offsets = [1, 0, 0, 0], sizes = [1, 1, 32, 16], strides = [1, 1, 1, 1]} : vector<2x2x32x16xf32> to vector<1x1x32x16xf32>
    %228 = vector.shape_cast %227 : vector<1x1x32x16xf32> to vector<32x16xf32>
    %cst_104 = arith.constant dense<0.000000e+00> : vector<17x16xf32>
    %229 = tpu.matmul %211, %228, %cst_104 {dimension_numbers = #tpu.dot_dimension_numbers<[1], [0], [0], [1], [0, 0, 1, 1], [], []>} : vector<17x32xf32>, vector<32x16xf32>, vector<17x16xf32> -> vector<17x16xf32>
    %230 = vector.extract_strided_slice %13 {offsets = [1, 0, 0, 0], sizes = [1, 1, 1, 16], strides = [1, 1, 1, 1]} : vector<2x2x1x16xf32> to vector<1x1x1x16xf32>
    %231 = vector.shape_cast %230 : vector<1x1x1x16xf32> to vector<1x16xf32>
    %232 = vector.broadcast %231 : vector<1x16xf32> to vector<17x16xf32>
    %233 = arith.addf %229, %232 : vector<17x16xf32>
    %cst_105 = arith.constant dense<0.000000e+00> : vector<17x17xf32>
    %234 = tpu.matmul %219, %226, %cst_105 {dimension_numbers = #tpu.dot_dimension_numbers<[1], [1], [0], [0], [0, 0, 1, 0], [], []>} : vector<17x16xf32>, vector<17x16xf32>, vector<17x17xf32> -> vector<17x17xf32>
    %cst_106 = arith.constant 2.500000e-01 : f32
    %235 = vector.broadcast %cst_106 : f32 to vector<17x17xf32>
    %236 = arith.mulf %234, %235 : vector<17x17xf32>
    %cst_107 = arith.constant dense<0xFF800000> : vector<17xf32>
    %237 = vector.multi_reduction <maximumf>, %236, %cst_107 [1] : vector<17x17xf32> to vector<17xf32>
    %238 = vector.shape_cast %237 : vector<17xf32> to vector<17x1xf32>
    %239 = vector.broadcast %238 : vector<17x1xf32> to vector<17x17xf32>
    %240 = arith.subf %236, %239 : vector<17x17xf32>
    %241 = math.exp %240 : vector<17x17xf32>
    %cst_108 = arith.constant dense<0.000000e+00> : vector<17xf32>
    %242 = vector.multi_reduction <add>, %241, %cst_108 [1] : vector<17x17xf32> to vector<17xf32>
    %243 = vector.shape_cast %242 : vector<17xf32> to vector<17x1xf32>
    %244 = tpu.reciprocal %243 {approx = true} : vector<17x1xf32> -> vector<17x1xf32>
    %cst_109 = arith.constant dense<0.000000e+00> : vector<17x16xf32>
    %245 = tpu.matmul %241, %233, %cst_109 {dimension_numbers = #tpu.dot_dimension_numbers<[1], [0], [0], [1], [0, 0, 1, 1], [], []>} : vector<17x17xf32>, vector<17x16xf32>, vector<17x16xf32> -> vector<17x16xf32>
    %246 = vector.broadcast %244 : vector<17x1xf32> to vector<17x16xf32>
    %247 = arith.mulf %245, %246 : vector<17x16xf32>
    %248 = vector.extract_strided_slice %14 {offsets = [1, 0, 0, 0], sizes = [1, 1, 16, 32], strides = [1, 1, 1, 1]} : vector<2x2x16x32xf32> to vector<1x1x16x32xf32>
    %249 = vector.shape_cast %248 : vector<1x1x16x32xf32> to vector<16x32xf32>
    %cst_110 = arith.constant dense<0.000000e+00> : vector<17x32xf32>
    %250 = tpu.matmul %247, %249, %cst_110 {dimension_numbers = #tpu.dot_dimension_numbers<[1], [0], [0], [1], [0, 0, 1, 1], [], []>} : vector<17x16xf32>, vector<16x32xf32>, vector<17x32xf32> -> vector<17x32xf32>
    %251 = arith.addf %212, %250 : vector<17x32xf32>
    %252 = vector.extract_strided_slice %8 {offsets = [1, 1, 0, 0], sizes = [1, 1, 32, 16], strides = [1, 1, 1, 1]} : vector<2x2x32x16xf32> to vector<1x1x32x16xf32>
    %253 = vector.shape_cast %252 : vector<1x1x32x16xf32> to vector<32x16xf32>
    %cst_111 = arith.constant dense<0.000000e+00> : vector<17x16xf32>
    %254 = tpu.matmul %211, %253, %cst_111 {dimension_numbers = #tpu.dot_dimension_numbers<[1], [0], [0], [1], [0, 0, 1, 1], [], []>} : vector<17x32xf32>, vector<32x16xf32>, vector<17x16xf32> -> vector<17x16xf32>
    %255 = vector.extract_strided_slice %9 {offsets = [1, 1, 0, 0], sizes = [1, 1, 1, 16], strides = [1, 1, 1, 1]} : vector<2x2x1x16xf32> to vector<1x1x1x16xf32>
    %256 = vector.shape_cast %255 : vector<1x1x1x16xf32> to vector<1x16xf32>
    %257 = vector.broadcast %256 : vector<1x16xf32> to vector<17x16xf32>
    %258 = arith.addf %254, %257 : vector<17x16xf32>
    %259 = vector.extract_strided_slice %10 {offsets = [1, 1, 0, 0], sizes = [1, 1, 32, 16], strides = [1, 1, 1, 1]} : vector<2x2x32x16xf32> to vector<1x1x32x16xf32>
    %260 = vector.shape_cast %259 : vector<1x1x32x16xf32> to vector<32x16xf32>
    %cst_112 = arith.constant dense<0.000000e+00> : vector<17x16xf32>
    %261 = tpu.matmul %211, %260, %cst_112 {dimension_numbers = #tpu.dot_dimension_numbers<[1], [0], [0], [1], [0, 0, 1, 1], [], []>} : vector<17x32xf32>, vector<32x16xf32>, vector<17x16xf32> -> vector<17x16xf32>
    %262 = vector.extract_strided_slice %11 {offsets = [1, 1, 0, 0], sizes = [1, 1, 1, 16], strides = [1, 1, 1, 1]} : vector<2x2x1x16xf32> to vector<1x1x1x16xf32>
    %263 = vector.shape_cast %262 : vector<1x1x1x16xf32> to vector<1x16xf32>
    %264 = vector.broadcast %263 : vector<1x16xf32> to vector<17x16xf32>
    %265 = arith.addf %261, %264 : vector<17x16xf32>
    %266 = vector.extract_strided_slice %12 {offsets = [1, 1, 0, 0], sizes = [1, 1, 32, 16], strides = [1, 1, 1, 1]} : vector<2x2x32x16xf32> to vector<1x1x32x16xf32>
    %267 = vector.shape_cast %266 : vector<1x1x32x16xf32> to vector<32x16xf32>
    %cst_113 = arith.constant dense<0.000000e+00> : vector<17x16xf32>
    %268 = tpu.matmul %211, %267, %cst_113 {dimension_numbers = #tpu.dot_dimension_numbers<[1], [0], [0], [1], [0, 0, 1, 1], [], []>} : vector<17x32xf32>, vector<32x16xf32>, vector<17x16xf32> -> vector<17x16xf32>
    %269 = vector.extract_strided_slice %13 {offsets = [1, 1, 0, 0], sizes = [1, 1, 1, 16], strides = [1, 1, 1, 1]} : vector<2x2x1x16xf32> to vector<1x1x1x16xf32>
    %270 = vector.shape_cast %269 : vector<1x1x1x16xf32> to vector<1x16xf32>
    %271 = vector.broadcast %270 : vector<1x16xf32> to vector<17x16xf32>
    %272 = arith.addf %268, %271 : vector<17x16xf32>
    %cst_114 = arith.constant dense<0.000000e+00> : vector<17x17xf32>
    %273 = tpu.matmul %258, %265, %cst_114 {dimension_numbers = #tpu.dot_dimension_numbers<[1], [1], [0], [0], [0, 0, 1, 0], [], []>} : vector<17x16xf32>, vector<17x16xf32>, vector<17x17xf32> -> vector<17x17xf32>
    %cst_115 = arith.constant 2.500000e-01 : f32
    %274 = vector.broadcast %cst_115 : f32 to vector<17x17xf32>
    %275 = arith.mulf %273, %274 : vector<17x17xf32>
    %cst_116 = arith.constant dense<0xFF800000> : vector<17xf32>
    %276 = vector.multi_reduction <maximumf>, %275, %cst_116 [1] : vector<17x17xf32> to vector<17xf32>
    %277 = vector.shape_cast %276 : vector<17xf32> to vector<17x1xf32>
    %278 = vector.broadcast %277 : vector<17x1xf32> to vector<17x17xf32>
    %279 = arith.subf %275, %278 : vector<17x17xf32>
    %280 = math.exp %279 : vector<17x17xf32>
    %cst_117 = arith.constant dense<0.000000e+00> : vector<17xf32>
    %281 = vector.multi_reduction <add>, %280, %cst_117 [1] : vector<17x17xf32> to vector<17xf32>
    %282 = vector.shape_cast %281 : vector<17xf32> to vector<17x1xf32>
    %283 = tpu.reciprocal %282 {approx = true} : vector<17x1xf32> -> vector<17x1xf32>
    %cst_118 = arith.constant dense<0.000000e+00> : vector<17x16xf32>
    %284 = tpu.matmul %280, %272, %cst_118 {dimension_numbers = #tpu.dot_dimension_numbers<[1], [0], [0], [1], [0, 0, 1, 1], [], []>} : vector<17x17xf32>, vector<17x16xf32>, vector<17x16xf32> -> vector<17x16xf32>
    %285 = vector.broadcast %283 : vector<17x1xf32> to vector<17x16xf32>
    %286 = arith.mulf %284, %285 : vector<17x16xf32>
    %287 = vector.extract_strided_slice %14 {offsets = [1, 1, 0, 0], sizes = [1, 1, 16, 32], strides = [1, 1, 1, 1]} : vector<2x2x16x32xf32> to vector<1x1x16x32xf32>
    %288 = vector.shape_cast %287 : vector<1x1x16x32xf32> to vector<16x32xf32>
    %cst_119 = arith.constant dense<0.000000e+00> : vector<17x32xf32>
    %289 = tpu.matmul %286, %288, %cst_119 {dimension_numbers = #tpu.dot_dimension_numbers<[1], [0], [0], [1], [0, 0, 1, 1], [], []>} : vector<17x16xf32>, vector<16x32xf32>, vector<17x32xf32> -> vector<17x32xf32>
    %290 = arith.addf %251, %289 : vector<17x32xf32>
    %291 = arith.addf %185, %290 : vector<17x32xf32>
    %292 = vector.extract_strided_slice %15 {offsets = [1, 0, 0], sizes = [1, 1, 32], strides = [1, 1, 1]} : vector<2x1x32xf32> to vector<1x1x32xf32>
    %293 = vector.shape_cast %292 : vector<1x1x32xf32> to vector<1x32xf32>
    %294 = vector.broadcast %293 : vector<1x32xf32> to vector<17x32xf32>
    %295 = arith.addf %291, %294 : vector<17x32xf32>
    %296 = vector.extract_strided_slice %16 {offsets = [1, 0, 0], sizes = [1, 1, 32], strides = [1, 1, 1]} : vector<2x1x32xf32> to vector<1x1x32xf32>
    %297 = vector.shape_cast %296 : vector<1x1x32xf32> to vector<1x32xf32>
    %298 = vector.extract_strided_slice %17 {offsets = [1, 0, 0], sizes = [1, 1, 32], strides = [1, 1, 1]} : vector<2x1x32xf32> to vector<1x1x32xf32>
    %299 = vector.shape_cast %298 : vector<1x1x32xf32> to vector<1x32xf32>
    %cst_120 = arith.constant dense<0.000000e+00> : vector<17xf32>
    %300 = vector.multi_reduction <add>, %295, %cst_120 [1] : vector<17x32xf32> to vector<17xf32>
    %301 = vector.shape_cast %300 : vector<17xf32> to vector<17x1xf32>
    %cst_121 = arith.constant 3.200000e+01 : f32
    %302 = vector.broadcast %cst_121 : f32 to vector<17x1xf32>
    %303 = arith.divf %301, %302 : vector<17x1xf32>
    %304 = vector.broadcast %303 : vector<17x1xf32> to vector<17x32xf32>
    %305 = arith.subf %295, %304 : vector<17x32xf32>
    %306 = arith.mulf %305, %305 : vector<17x32xf32>
    %cst_122 = arith.constant dense<0.000000e+00> : vector<17xf32>
    %307 = vector.multi_reduction <add>, %306, %cst_122 [1] : vector<17x32xf32> to vector<17xf32>
    %308 = vector.shape_cast %307 : vector<17xf32> to vector<17x1xf32>
    %cst_123 = arith.constant 3.200000e+01 : f32
    %309 = vector.broadcast %cst_123 : f32 to vector<17x1xf32>
    %310 = arith.divf %308, %309 : vector<17x1xf32>
    %311 = vector.broadcast %303 : vector<17x1xf32> to vector<17x32xf32>
    %312 = arith.subf %295, %311 : vector<17x32xf32>
    %cst_124 = arith.constant 9.99999997E-7 : f32
    %313 = vector.broadcast %cst_124 : f32 to vector<17x1xf32>
    %314 = arith.addf %310, %313 : vector<17x1xf32>
    %315 = math.rsqrt %314 : vector<17x1xf32>
    %316 = vector.broadcast %315 : vector<17x1xf32> to vector<17x32xf32>
    %317 = arith.mulf %312, %316 : vector<17x32xf32>
    %318 = vector.broadcast %297 : vector<1x32xf32> to vector<17x32xf32>
    %319 = arith.mulf %317, %318 : vector<17x32xf32>
    %320 = vector.broadcast %299 : vector<1x32xf32> to vector<17x32xf32>
    %321 = arith.addf %319, %320 : vector<17x32xf32>
    %322 = vector.extract_strided_slice %18 {offsets = [1, 0, 0], sizes = [1, 32, 64], strides = [1, 1, 1]} : vector<2x32x64xf32> to vector<1x32x64xf32>
    %323 = vector.shape_cast %322 : vector<1x32x64xf32> to vector<32x64xf32>
    %cst_125 = arith.constant dense<0.000000e+00> : vector<17x64xf32>
    %324 = tpu.matmul %321, %323, %cst_125 {dimension_numbers = #tpu.dot_dimension_numbers<[1], [0], [0], [1], [0, 0, 1, 1], [], []>} : vector<17x32xf32>, vector<32x64xf32>, vector<17x64xf32> -> vector<17x64xf32>
    %325 = vector.extract_strided_slice %19 {offsets = [1, 0, 0], sizes = [1, 1, 64], strides = [1, 1, 1]} : vector<2x1x64xf32> to vector<1x1x64xf32>
    %326 = vector.shape_cast %325 : vector<1x1x64xf32> to vector<1x64xf32>
    %327 = vector.broadcast %326 : vector<1x64xf32> to vector<17x64xf32>
    %328 = arith.addf %324, %327 : vector<17x64xf32>
    %cst_126 = arith.constant 5.000000e-01 : f32
    %329 = vector.broadcast %cst_126 : f32 to vector<17x64xf32>
    %330 = arith.mulf %329, %328 : vector<17x64xf32>
    %cst_127 = arith.constant 4.471500e-02 : f32
    %331 = vector.broadcast %cst_127 : f32 to vector<17x64xf32>
    %332 = arith.mulf %331, %328 : vector<17x64xf32>
    %333 = arith.mulf %332, %328 : vector<17x64xf32>
    %334 = arith.mulf %333, %328 : vector<17x64xf32>
    %335 = arith.addf %328, %334 : vector<17x64xf32>
    %cst_128 = arith.constant 0.797884583 : f32
    %336 = vector.broadcast %cst_128 : f32 to vector<17x64xf32>
    %337 = arith.mulf %336, %335 : vector<17x64xf32>
    %338 = math.tanh %337 : vector<17x64xf32>
    %cst_129 = arith.constant 1.000000e+00 : f32
    %339 = vector.broadcast %cst_129 : f32 to vector<17x64xf32>
    %340 = arith.addf %339, %338 : vector<17x64xf32>
    %341 = arith.mulf %330, %340 : vector<17x64xf32>
    %342 = vector.extract_strided_slice %20 {offsets = [1, 0, 0], sizes = [1, 64, 32], strides = [1, 1, 1]} : vector<2x64x32xf32> to vector<1x64x32xf32>
    %343 = vector.shape_cast %342 : vector<1x64x32xf32> to vector<64x32xf32>
    %cst_130 = arith.constant dense<0.000000e+00> : vector<17x32xf32>
    %344 = tpu.matmul %341, %343, %cst_130 {dimension_numbers = #tpu.dot_dimension_numbers<[1], [0], [0], [1], [0, 0, 1, 1], [], []>} : vector<17x64xf32>, vector<64x32xf32>, vector<17x32xf32> -> vector<17x32xf32>
    %345 = arith.addf %295, %344 : vector<17x32xf32>
    %346 = vector.extract_strided_slice %21 {offsets = [1, 0, 0], sizes = [1, 1, 32], strides = [1, 1, 1]} : vector<2x1x32xf32> to vector<1x1x32xf32>
    %347 = vector.shape_cast %346 : vector<1x1x32xf32> to vector<1x32xf32>
    %348 = vector.broadcast %347 : vector<1x32xf32> to vector<17x32xf32>
    %349 = arith.addf %345, %348 : vector<17x32xf32>
    %350 = vector.extract_strided_slice %349 {offsets = [0, 0], sizes = [8, 32], strides = [1, 1]} : vector<17x32xf32> to vector<8x32xf32>
    %c0_131 = arith.constant 0 : index
    %c0_132 = arith.constant 0 : index
    %351 = vector.load %arg20[%c0_131, %c0_132] : memref<1x32xf32, #tpu.memory_space<vmem>>, vector<1x32xf32>
    %c0_133 = arith.constant 0 : index
    %c0_134 = arith.constant 0 : index
    %352 = vector.load %arg21[%c0_133, %c0_134] : memref<1x32xf32, #tpu.memory_space<vmem>>, vector<1x32xf32>
    %cst_135 = arith.constant dense<0.000000e+00> : vector<8xf32>
    %353 = vector.multi_reduction <add>, %350, %cst_135 [1] : vector<8x32xf32> to vector<8xf32>
    %354 = vector.shape_cast %353 : vector<8xf32> to vector<8x1xf32>
    %cst_136 = arith.constant 3.200000e+01 : f32
    %355 = vector.broadcast %cst_136 : f32 to vector<8x1xf32>
    %356 = arith.divf %354, %355 : vector<8x1xf32>
    %357 = vector.broadcast %356 : vector<8x1xf32> to vector<8x32xf32>
    %358 = arith.subf %350, %357 : vector<8x32xf32>
    %359 = arith.mulf %358, %358 : vector<8x32xf32>
    %cst_137 = arith.constant dense<0.000000e+00> : vector<8xf32>
    %360 = vector.multi_reduction <add>, %359, %cst_137 [1] : vector<8x32xf32> to vector<8xf32>
    %361 = vector.shape_cast %360 : vector<8xf32> to vector<8x1xf32>
    %cst_138 = arith.constant 3.200000e+01 : f32
    %362 = vector.broadcast %cst_138 : f32 to vector<8x1xf32>
    %363 = arith.divf %361, %362 : vector<8x1xf32>
    %364 = vector.broadcast %356 : vector<8x1xf32> to vector<8x32xf32>
    %365 = arith.subf %350, %364 : vector<8x32xf32>
    %cst_139 = arith.constant 9.99999997E-7 : f32
    %366 = vector.broadcast %cst_139 : f32 to vector<8x1xf32>
    %367 = arith.addf %363, %366 : vector<8x1xf32>
    %368 = math.rsqrt %367 : vector<8x1xf32>
    %369 = vector.broadcast %368 : vector<8x1xf32> to vector<8x32xf32>
    %370 = arith.mulf %365, %369 : vector<8x32xf32>
    %371 = vector.broadcast %351 : vector<1x32xf32> to vector<8x32xf32>
    %372 = arith.mulf %370, %371 : vector<8x32xf32>
    %373 = vector.broadcast %352 : vector<1x32xf32> to vector<8x32xf32>
    %374 = arith.addf %372, %373 : vector<8x32xf32>
    %c0_140 = arith.constant 0 : index
    %c0_141 = arith.constant 0 : index
    %375 = vector.load %arg22[%c0_140, %c0_141] : memref<32x128xf32, #tpu.memory_space<vmem>>, vector<32x128xf32>
    %cst_142 = arith.constant dense<0.000000e+00> : vector<8x128xf32>
    %376 = tpu.matmul %374, %375, %cst_142 {dimension_numbers = #tpu.dot_dimension_numbers<[1], [0], [0], [1], [0, 0, 1, 1], [], []>} : vector<8x32xf32>, vector<32x128xf32>, vector<8x128xf32> -> vector<8x128xf32>
    %c0_143 = arith.constant 0 : index
    %c0_144 = arith.constant 0 : index
    %377 = vector.load %arg23[%c0_143, %c0_144] : memref<1x128xf32, #tpu.memory_space<vmem>>, vector<1x128xf32>
    %378 = vector.broadcast %377 : vector<1x128xf32> to vector<8x128xf32>
    %379 = arith.addf %376, %378 : vector<8x128xf32>
    %c0_145 = arith.constant 0 : index
    %c0_146 = arith.constant 0 : index
    %c0_147 = arith.constant 0 : index
    %380 = vector.load %arg24[%c0_145, %c0_146, %c0_147] : memref<1x8x128xf32, #tpu.memory_space<vmem>>, vector<1x8x128xf32>
    %381 = vector.shape_cast %380 : vector<1x8x128xf32> to vector<8x128xf32>
    %382 = vector.shape_cast %379 : vector<8x128xf32> to vector<1x8x128xf32>
    tpu.vector_store %arg24[%c0_145, %c0_146, %c0_147], %382 {strides = array<i32>} : memref<1x8x128xf32, #tpu.memory_space<vmem>>, vector<1x8x128xf32>,
    return
  }
  func.func @transform_0(%arg0: i32) -> (i32, i32, i32) {
    %c0_i32 = arith.constant 0 : i32
    %c0_i32_0 = arith.constant 0 : i32
    %c0_i32_1 = arith.constant 0 : i32
    return %arg0, %c0_i32, %c0_i32_0 : i32, i32, i32
  }
  func.func @transform_1(%arg0: i32) -> (i32, i32) {
    %c0_i32 = arith.constant 0 : i32
    %c0_i32_0 = arith.constant 0 : i32
    %c0_i32_1 = arith.constant 0 : i32
    return %c0_i32, %c0_i32_0 : i32, i32
  }
  func.func @transform_2(%arg0: i32) -> (i32, i32) {
    %c0_i32 = arith.constant 0 : i32
    %c0_i32_0 = arith.constant 0 : i32
    %c0_i32_1 = arith.constant 0 : i32
    return %c0_i32, %c0_i32_0 : i32, i32
  }
  func.func @transform_3(%arg0: i32) -> (i32, i32, i32) {
    %c0_i32 = arith.constant 0 : i32
    %c0_i32_0 = arith.constant 0 : i32
    %c0_i32_1 = arith.constant 0 : i32
    %c0_i32_2 = arith.constant 0 : i32
    return %c0_i32, %c0_i32_0, %c0_i32_1 : i32, i32, i32
  }
  func.func @transform_4(%arg0: i32) -> (i32, i32, i32) {
    %c0_i32 = arith.constant 0 : i32
    %c0_i32_0 = arith.constant 0 : i32
    %c0_i32_1 = arith.constant 0 : i32
    %c0_i32_2 = arith.constant 0 : i32
    return %c0_i32, %c0_i32_0, %c0_i32_1 : i32, i32, i32
  }
  func.func @transform_5(%arg0: i32) -> (i32, i32, i32, i32) {
    %c0_i32 = arith.constant 0 : i32
    %c0_i32_0 = arith.constant 0 : i32
    %c0_i32_1 = arith.constant 0 : i32
    %c0_i32_2 = arith.constant 0 : i32
    %c0_i32_3 = arith.constant 0 : i32
    return %c0_i32, %c0_i32_0, %c0_i32_1, %c0_i32_2 : i32, i32, i32, i32
  }
  func.func @transform_6(%arg0: i32) -> (i32, i32, i32, i32) {
    %c0_i32 = arith.constant 0 : i32
    %c0_i32_0 = arith.constant 0 : i32
    %c0_i32_1 = arith.constant 0 : i32
    %c0_i32_2 = arith.constant 0 : i32
    %c0_i32_3 = arith.constant 0 : i32
    return %c0_i32, %c0_i32_0, %c0_i32_1, %c0_i32_2 : i32, i32, i32, i32
  }
  func.func @transform_7(%arg0: i32) -> (i32, i32, i32, i32) {
    %c0_i32 = arith.constant 0 : i32
    %c0_i32_0 = arith.constant 0 : i32
    %c0_i32_1 = arith.constant 0 : i32
    %c0_i32_2 = arith.constant 0 : i32
    %c0_i32_3 = arith.constant 0 : i32
    return %c0_i32, %c0_i32_0, %c0_i32_1, %c0_i32_2 : i32, i32, i32, i32
  }
  func.func @transform_8(%arg0: i32) -> (i32, i32, i32, i32) {
    %c0_i32 = arith.constant 0 : i32
    %c0_i32_0 = arith.constant 0 : i32
    %c0_i32_1 = arith.constant 0 : i32
    %c0_i32_2 = arith.constant 0 : i32
    %c0_i32_3 = arith.constant 0 : i32
    return %c0_i32, %c0_i32_0, %c0_i32_1, %c0_i32_2 : i32, i32, i32, i32
  }
  func.func @transform_9(%arg0: i32) -> (i32, i32, i32, i32) {
    %c0_i32 = arith.constant 0 : i32
    %c0_i32_0 = arith.constant 0 : i32
    %c0_i32_1 = arith.constant 0 : i32
    %c0_i32_2 = arith.constant 0 : i32
    %c0_i32_3 = arith.constant 0 : i32
    return %c0_i32, %c0_i32_0, %c0_i32_1, %c0_i32_2 : i32, i32, i32, i32
  }
  func.func @transform_10(%arg0: i32) -> (i32, i32, i32, i32) {
    %c0_i32 = arith.constant 0 : i32
    %c0_i32_0 = arith.constant 0 : i32
    %c0_i32_1 = arith.constant 0 : i32
    %c0_i32_2 = arith.constant 0 : i32
    %c0_i32_3 = arith.constant 0 : i32
    return %c0_i32, %c0_i32_0, %c0_i32_1, %c0_i32_2 : i32, i32, i32, i32
  }
  func.func @transform_11(%arg0: i32) -> (i32, i32, i32, i32) {
    %c0_i32 = arith.constant 0 : i32
    %c0_i32_0 = arith.constant 0 : i32
    %c0_i32_1 = arith.constant 0 : i32
    %c0_i32_2 = arith.constant 0 : i32
    %c0_i32_3 = arith.constant 0 : i32
    return %c0_i32, %c0_i32_0, %c0_i32_1, %c0_i32_2 : i32, i32, i32, i32
  }
  func.func @transform_12(%arg0: i32) -> (i32, i32, i32) {
    %c0_i32 = arith.constant 0 : i32
    %c0_i32_0 = arith.constant 0 : i32
    %c0_i32_1 = arith.constant 0 : i32
    %c0_i32_2 = arith.constant 0 : i32
    return %c0_i32, %c0_i32_0, %c0_i32_1 : i32, i32, i32
  }
  func.func @transform_13(%arg0: i32) -> (i32, i32, i32) {
    %c0_i32 = arith.constant 0 : i32
    %c0_i32_0 = arith.constant 0 : i32
    %c0_i32_1 = arith.constant 0 : i32
    %c0_i32_2 = arith.constant 0 : i32
    return %c0_i32, %c0_i32_0, %c0_i32_1 : i32, i32, i32
  }
  func.func @transform_14(%arg0: i32) -> (i32, i32, i32) {
    %c0_i32 = arith.constant 0 : i32
    %c0_i32_0 = arith.constant 0 : i32
    %c0_i32_1 = arith.constant 0 : i32
    %c0_i32_2 = arith.constant 0 : i32
    return %c0_i32, %c0_i32_0, %c0_i32_1 : i32, i32, i32
  }
  func.func @transform_15(%arg0: i32) -> (i32, i32, i32) {
    %c0_i32 = arith.constant 0 : i32
    %c0_i32_0 = arith.constant 0 : i32
    %c0_i32_1 = arith.constant 0 : i32
    %c0_i32_2 = arith.constant 0 : i32
    return %c0_i32, %c0_i32_0, %c0_i32_1 : i32, i32, i32
  }
  func.func @transform_16(%arg0: i32) -> (i32, i32, i32) {
    %c0_i32 = arith.constant 0 : i32
    %c0_i32_0 = arith.constant 0 : i32
    %c0_i32_1 = arith.constant 0 : i32
    %c0_i32_2 = arith.constant 0 : i32
    return %c0_i32, %c0_i32_0, %c0_i32_1 : i32, i32, i32
  }
  func.func @transform_17(%arg0: i32) -> (i32, i32, i32) {
    %c0_i32 = arith.constant 0 : i32
    %c0_i32_0 = arith.constant 0 : i32
    %c0_i32_1 = arith.constant 0 : i32
    %c0_i32_2 = arith.constant 0 : i32
    return %c0_i32, %c0_i32_0, %c0_i32_1 : i32, i32, i32
  }
  func.func @transform_18(%arg0: i32) -> (i32, i32, i32) {
    %c0_i32 = arith.constant 0 : i32
    %c0_i32_0 = arith.constant 0 : i32
    %c0_i32_1 = arith.constant 0 : i32
    %c0_i32_2 = arith.constant 0 : i32
    return %c0_i32, %c0_i32_0, %c0_i32_1 : i32, i32, i32
  }
  func.func @transform_19(%arg0: i32) -> (i32, i32) {
    %c0_i32 = arith.constant 0 : i32
    %c0_i32_0 = arith.constant 0 : i32
    %c0_i32_1 = arith.constant 0 : i32
    return %c0_i32, %c0_i32_0 : i32, i32
  }
  func.func @transform_20(%arg0: i32) -> (i32, i32) {
    %c0_i32 = arith.constant 0 : i32
    %c0_i32_0 = arith.constant 0 : i32
    %c0_i32_1 = arith.constant 0 : i32
    return %c0_i32, %c0_i32_0 : i32, i32
  }
  func.func @transform_21(%arg0: i32) -> (i32, i32) {
    %c0_i32 = arith.constant 0 : i32
    %c0_i32_0 = arith.constant 0 : i32
    %c0_i32_1 = arith.constant 0 : i32
    return %c0_i32, %c0_i32_0 : i32, i32
  }
  func.func @transform_22(%arg0: i32) -> (i32, i32) {
    %c0_i32 = arith.constant 0 : i32
    %c0_i32_0 = arith.constant 0 : i32
    %c0_i32_1 = arith.constant 0 : i32
    return %c0_i32, %c0_i32_0 : i32, i32
  }
  func.func @transform_23(%arg0: i32) -> (i32, i32, i32) {
    %c0_i32 = arith.constant 0 : i32
    %c0_i32_0 = arith.constant 0 : i32
    %c0_i32_1 = arith.constant 0 : i32
    return %arg0, %c0_i32, %c0_i32_0 : i32, i32, i32
  }
}

</mosaic_0001>

<bundles_post_ra>
// kernel: vit_forward.1
= control target key start
LH: loop header
LB: loop body
LE: loop exit
PB: predicated region body
PF: predicated region fallthrough
CT: control target
= control target key end

     0   :  { %s6286_s0 = inlined_call_operand.vmem [shape: f32[2,17,48], index: 0, kind: input, shape index: {}]   ;;  %s6287_s1 = inlined_call_operand.vmem [shape: f32[48,32], index: 1, kind: input, shape index: {}]   ;;  %s6288_s2 = inlined_call_operand.vmem [shape: f32[17,32], index: 2, kind: input, shape index: {}]   ;;  %s6289_s3 = inlined_call_operand.vmem [shape: f32[2,1,32], index: 3, kind: input, shape index: {}]   ;;  %s6290_s4 = inlined_call_operand.vmem [shape: f32[2,1,32], index: 4, kind: input, shape index: {}]   ;;  %s6291_s5 = inlined_call_operand.vmem [shape: f32[2,2,32,16], index: 5, kind: input, shape index: {}]   ;;  %s6292_s6 = inlined_call_operand.vmem [shape: f32[2,2,1,16], index: 6, kind: input, shape index: {}]   ;;  %s6293_s7 = inlined_call_operand.vmem [shape: f32[2,2,32,16], index: 7, kind: input, shape index: {}]   ;;  %s6294_s8 = inlined_call_operand.vmem [shape: f32[2,2,1,16], index: 8, kind: input, shape index: {}]   ;;  %s6295_s9 = inlined_call_operand.vmem [shape: f32[2,2,32,16], index: 9, kind: input, shape index: {}]   ;;  %s6296_s10 = inlined_call_operand.vmem [shape: f32[2,2,1,16], index: 10, kind: input, shape index: {}]   ;;  %s6297_s11 = inlined_call_operand.vmem [shape: f32[2,2,16,32], index: 11, kind: input, shape index: {}]   ;;  %s6298_s12 = inlined_call_operand.vmem [shape: f32[2,1,32], index: 12, kind: input, shape index: {}]   ;;  %s6299_s13 = inlined_call_operand.vmem [shape: f32[2,1,32], index: 13, kind: input, shape index: {}]   ;;  %s6300_s14 = inlined_call_operand.vmem [shape: f32[2,1,32], index: 14, kind: input, shape index: {}]   ;;  %s6301_s15 = inlined_call_operand.vmem [shape: f32[2,32,64], index: 15, kind: input, shape index: {}]   ;;  %s6302_s16 = inlined_call_operand.vmem [shape: f32[2,1,64], index: 16, kind: input, shape index: {}]   ;;  %s6303_s17 = inlined_call_operand.vmem [shape: f32[2,64,32], index: 17, kind: input, shape index: {}]   ;;  %s6304_s18 = inlined_call_operand.vmem [shape: f32[2,1,32], index: 18, kind: input, shape index: {}]   ;;  %s6305_s19 = inlined_call_operand.vmem [shape: f32[1,32], index: 19, kind: input, shape index: {}]   ;;  %s6306_s20 = inlined_call_operand.vmem [shape: f32[1,32], index: 20, kind: input, shape index: {}]   ;;  %s6307_s21 = inlined_call_operand.vmem [shape: f32[32,128], index: 21, kind: input, shape index: {}]   ;;  %s6308_s22 = inlined_call_operand.vmem [shape: f32[1,128], index: 22, kind: input, shape index: {}]   ;;  %s6309_s23 = inlined_call_operand.vmem [shape: f32[2,8,128], index: 23, kind: output, shape index: {}]  }
   0x1   :  { %6319 = sst [smem:[#allocation2_spill]] %s6286_s0 }
   0x2   :  { %6320 = sst [smem:[#allocation3_spill]] %s6287_s1 }
   0x3   :  { %6321 = sst [smem:[#allocation4_spill]] %s6288_s2 }
   0x4   :  { %6322 = sst [smem:[#allocation5_spill]] %s6289_s3 }
   0x5   :  { %6323 = sst [smem:[#allocation6_spill]] %s6290_s4  ;;  %s5326_s4 = smov 0  }
   0x6   :  { %6324 = sst [smem:[#allocation7_spill]] %s6291_s5 }
   0x7   :  { %6325 = sst [smem:[#allocation8_spill]] %s6292_s6 }
   0x8   :  { %6326 = sst [smem:[#allocation9_spill]] %s6293_s7 }
   0x9 LB: > { %s4094_s30 = sadd.s32 4294967295, %s5201_s4   ;;  %p4098_p0 = scmp.ge.s32.totalorder %s5201_s4, 1  ;;  %s5201_s4 = sphi %s5326_s4, %s33_s4  }
   0xa   : > { %p637_p1 = scmp.lt.s32.totalorder %s5201_s4, 3 }
   0xc   : > { %p638_p2 = pnand %p4098_p0, %p637_p1 }
   0xd   : > { %s6327_s5 = sld [smem:[#allocation3_spill]] (!%p638_p2)  ;;  %v5203_v3 = vmov (!%p638_p2), 0.0|0.0   ;;  %vm5204_vm0 = vmmov (!%p638_p2), 0   ;;  %v5205_v6 = vmov (!%p638_p2), 0.0   ;;  %p700_p3 = scmp.lt.s32.totalorder (!%p638_p2), %s4094_s30, 1  ;;  %vm721_vm1 = vcmask (!%p638_p2), 392192  }
   0xe   : > { %641 = sbr.rel (%p638_p2) target bundleno = 6258 (0x1872), region = 112  ;;  %4930 = vmatprep.subr.bf16.mxu0 (!%p638_p2), %v5203_v3  ;;  %4450 = vmatprep.mubr.msk.f32.mxu0 (!%p638_p2), %vm5204_vm0, %v5205_v6  ;;  %s6328_s26 = sld [smem:[#allocation2_spill]] (!%p638_p2)  ;;  %vm917_vm2 = vcmask (!%p638_p2), 261120   ;;  %vm924_vm3 = vcmask (!%p638_p2), 253952   ;;  %v855_v46 = vld [vmem:[%s6295_s9] sm:$0xff] (!%p638_p2)  ;;  %v856_v48 = vld [vmem:[%s6295_s9 + $0x8] sm:$0xff] (!%p638_p2) }
   0xf   : > { %4939 = vmatprep.subr.bf16.mxu1 (!%p638_p2), %v5203_v3  ;;  %4467 = vmatprep.mubr.msk.f32.mxu1 (!%p638_p2), %vm5204_vm0, %v5205_v6  ;;  %s6329_s7 = sld [smem:[#allocation4_spill]] (!%p638_p2)  ;;  %s6330_s1 = sld [smem:[#allocation7_spill]] (!%p638_p2)  ;;  %v4952_v49 = vpack.c.bf16 (!%p638_p2), %v856_v48, %v855_v46  ;;  %v857_v52 = vld [vmem:[%s6295_s9 + $0x10] sm:$0xff] (!%p638_p2)  ;;  %v858_v54 = vld [vmem:[%s6295_s9 + $0x18] sm:$0xff] (!%p638_p2)  ;;  %vm1387_vm4 = vcmask (!%p638_p2), 1040384   ;;  %vm1244_vm5 = vcmask (!%p638_p2), 130048  }
  0x10   : > { %v4955_v55 = vpack.c.bf16 (!%p638_p2), %v858_v54, %v857_v52  ;;  %s6331_s3 = sld [smem:[#allocation5_spill]] (!%p638_p2)  ;;  %s6332_s25 = sld [smem:[#allocation9_spill]] (!%p638_p2)  ;;  %vm5501_vm6 = vmpackc.low (!%p638_p2), %vm1244_vm5, %vm1244_vm5  ;;  %vm1346_vm7 = vcmask (!%p638_p2), 138240   ;;  %vm1353_vm8 = vcmask (!%p638_p2), 131072   ;;  %vm2327_vm9 = vcmask (!%p638_p2), 523264  }
  0x11   : > { %s6336_s0 = sld [smem:[#allocation8_spill]] (!%p638_p2) }
  0x13   : > { %v712_v0 = vld [vmem:[%s6327_s5] sm:$0xff] (!%p638_p2)  ;;  %v713_v1 = vld [vmem:[%s6327_s5 + $0x8] sm:$0xff] (!%p638_p2)  ;;  %v714_v2 = vld [vmem:[%s6327_s5 + $0x10] sm:$0xff] (!%p638_p2) }
  0x14   : > { %v4931_v4 = vpack.c.bf16 (!%p638_p2), %v713_v1, %v712_v0  ;;  %v715_v5 = vld [vmem:[%s6327_s5 + $0x18] sm:$0xff] (!%p638_p2)  ;;  %v716_v8 = vld [vmem:[%s6327_s5 + $0x20] sm:$0xff] (!%p638_p2)  ;;  %v717_v9 = vld [vmem:[%s6327_s5 + $0x28] sm:$0xff] (!%p638_p2)  ;;  %s6333_s5 = sld [smem:[#allocation6_spill]] (!%p638_p2) }
  0x15   : > { %v4934_v7 = vpack.c.bf16 %v715_v5, %v714_v2  ;;  %s6338_s30 = smov (!%p700_p3, %s4094_s30), 1  ;;  %v4937_v10 = vpack.c.bf16 %v717_v9, %v716_v8  ;;  %v718_v14 = vld [vmem:[%s6329_s7] sm:$0xff]  ;;  %v719_v18 = vld [vmem:[%s6329_s7 + $0x8] sm:$0xff]  ;;  %v720_v23 = vld [vmem:[%s6329_s7 + $0x10] sm:$0x1] }
  0x16   : > { %4932 = vmatpush3.bf16.msra.mxu0 %v4931_v4  ;;  %s5097_s24 = smul.u32 24, %s6338_s30  ;;  %v815_v44 = vld [vmem:[%s6330_s1] sm:$0xff]  ;;  %v816_v45 = vld [vmem:[%s6330_s1 + $0x8] sm:$0xff]  ;;  %v817_v50 = vld [vmem:[%s6330_s1 + $0x10] sm:$0xff]  ;;  %s4100_s28 = sshll.u32 %s6338_s30, 3 }
  0x17   : > { %4933 = vmatprep.subr.bf16.mxu0 %v5203_v3  ;;  %v4940_v47 = vpack.c.bf16 %v816_v45, %v815_v44  ;;  %v818_v51 = vld [vmem:[%s6330_s1 + $0x18] sm:$0xff]  ;;  %v4104_v2 = vld [vmem:[%s6331_s3] ss:$0 sm:$0xff]  ;;  %s708_s6 = scalar_lea.vmem %s6309_s23, %s4100_s28 }
  0x18   : > { %s704_s2 = scalar_lea.vmem %s6328_s26, %s5097_s24  ;;  %v4943_v53 = vpack.c.bf16 %v818_v51, %v817_v50  ;;  %v835_v5 = vld [vmem:[%s6332_s25] sm:$0xff] }
  0x19   : > { %v709_v11 = vld [vmem:[%s704_s2] sm:$0xff]  ;;  %v710_v12 = vld [vmem:[%s704_s2 + $0x8] sm:$0xff]  ;;  %v711_v13 = vld [vmem:[%s704_s2 + $0x10] sm:$0x1]  ;;  %4941 = vmatpush3.bf16.msra.mxu1 %v4940_v47 }
  0x1a   : > { %4935 = vmatpush3.bf16.msra.mxu0 %v4934_v7  ;;  %4942 = vmatprep.subr.bf16.mxu1 %v5203_v3  ;;  %v836_v7 = vld [vmem:[%s6332_s25 + $0x8] sm:$0xff]  ;;  %v4105_v8 = vld [vmem:[%s6333_s5] ss:$0 sm:$0xff] }
  0x1b   : > { %4936 = vmatprep.subr.bf16.mxu0 %v5203_v3  ;;  %v4110_v45 = vld [vmem:[%s6294_s8] ss:$0 sm:$0xff] }
  0x1c   : > { %v4106_v54 = vld [vmem:[%s6336_s0] ss:$0 sm:$0xff] }
  0x1d   : > { %4944 = vmatpush3.bf16.msra.mxu1 %v4943_v53 }
  0x1e   : > { %4938 = vmatpush3.bf16.msra.mxu0 %v4937_v10  ;;  %4945 = vmatprep.subr.bf16.mxu1 %v5203_v3 }
  0x1f   : > { %4951 = vmatprep.subr.bf16.mxu0 %v5203_v3 }
  0x21   : > { %4451 = vmatmul.mubr.msk.f32.vlgmr.msra.gmra.mrb[0].mxu0 %vm721_vm1, %v709_v11  ;;  %v4946_v11 = vpack.c.bf16 %v836_v7, %v835_v5 }
  0x22   : > { %4453 = vmatprep.mubr.msk.f32.mxu0 %vm5204_vm0, %v5205_v6  ;;  %4953 = vmatpush3.bf16.msra.mxu0 %v4952_v49 }
  0x23   : > { %4954 = vmatprep.subr.bf16.mxu0 %v5203_v3 }
  0x25   : > { %4454 = vmatmul.mubr.msk.f32.gmra.mrb[2].mxu0 %vm721_vm1, %v710_v12 }
  0x26   : > { %4456 = vmatprep.mubr.msk.f32.mxu0 %vm5204_vm0, %v5205_v6  ;;  %4956 = vmatpush3.bf16.msra.mxu0 %v4955_v55 }
  0x27   : > { %4961 = vmatprep.subr.bf16.mxu0 %v5203_v3 }
  0x29   : > { %4457 = vmatmul.mubr.msk.f32.gmra.mrb[4].mxu0 %vm721_vm1, %v711_v13 }
  0x2a   : > { %4501 = vmatprep.mubr.msk.f32.mxu0 %vm5204_vm0, %v5205_v6 }
  0xf4   : > { %v797_v15 = vpop.f32.mrb[0].mxu0 }
  0xf5   : > { %v5376_v16 = vadd.f32 %v797_v15, %v718_v14  ;;  %v4452_v17 = vpop.f32.mrb[1].mxu0  ;;  %v837_v14 = vld [vmem:[%s6332_s25 + $0x10] sm:$0xff]  ;;  %v838_v15 = vld [vmem:[%s6332_s25 + $0x18] sm:$0xff] }
  0xf7   : > { %v918_v19 = vsel %vm917_vm2, %v5376_v16, 0.0 }
  0xf8   : > { %919 = vadd.xlane.f32.xlu0 %v918_v19  ;;  %v802_v20 = vpop.f32.mrb[2].mxu0 }
  0xf9   : > { %v5383_v21 = vadd.f32 %v802_v20, %v719_v18  ;;  %v4455_v22 = vpop.f32.mrb[3].mxu0 }
  0xfa   : > { %v4949_v22 = vpack.c.bf16 %v838_v15, %v837_v14 }
  0xfb   : > { %v921_v24 = vsel %vm917_vm2, %v5383_v21, 0.0 }
  0xfc   : > { %922 = vadd.xlane.f32.xlu0 %v921_v24  ;;  %v807_v25 = vpop.f32.mrb[4].mxu0 }
  0xfd   : > { %v5390_v26 = vadd.f32 %v807_v25, %v720_v23  ;;  %v4458_v27 = vpop.f32.mrb[5].mxu0 }
  0xff   : > { %v925_v28 = vsel %vm924_vm3, %v5390_v26, 0.0 }
 0x100   : > { %926 = vadd.xlane.f32.xlu1 %v925_v28 }
 0x185   : > { %v920_v29 = vpop.xlane.xlu0 %919 }
 0x186   : > { %v929_v30 = vmul.f32 0.03125, %v920_v29 }
 0x188   : > { %v932_v31 = vsub.f32 %v5376_v16, %v929_v30  ;;  %v4114_v30 = vld [vmem:[%s6296_s10] ss:$0 sm:$0xff] }
 0x189   : > { %v923_v32 = vpop.xlane.xlu0 %922 }
 0x18a   : > { %v930_v33 = vmul.f32 0.03125, %v923_v32  ;;  %v935_v34 = vmul.f32 %v932_v31, %v932_v31 }
 0x18c   : > { %v933_v35 = vsub.f32 %v5383_v21, %v930_v33  ;;  %v938_v36 = vsel %vm917_vm2, %v935_v34, 0.0 }
 0x18d   : > { %939 = vadd.xlane.f32.xlu1 %v938_v36  ;;  %v927_v37 = vpop.xlane.xlu1 %926 }
 0x18e   : > { %v931_v38 = vmul.f32 0.03125, %v927_v37  ;;  %v936_v39 = vmul.f32 %v933_v35, %v933_v35 }
 0x190   : > { %v934_v40 = vsub.f32 %v5390_v26, %v931_v38  ;;  %v941_v41 = vsel %vm917_vm2, %v936_v39, 0.0 }
 0x191   : > { %942 = vadd.xlane.f32.xlu0 %v941_v41 }
 0x192   : > { %v937_v42 = vmul.f32 %v934_v40, %v934_v40 }
 0x194   : > { %v944_v43 = vsel %vm924_vm3, %v937_v42, 0.0 }
 0x195   : > { %945 = vadd.xlane.f32.xlu1 %v944_v43 }
 0x21a   : > { %v940_v56 = vpop.xlane.xlu1 %939 }
 0x21b   : > { %v947_v57 = vmul.f32 0.03125, %v940_v56 }
 0x21d   : > { %v950_v58 = vadd.f32 1e-06, %v947_v57 }
 0x21e   : > { %v943_v59 = vpop.xlane.xlu0 %942 }
 0x21f   : > { %5109 = vrsqrt.f32 %v950_v58  ;;  %v948_v60 = vmul.f32 0.03125, %v943_v59 }
 0x221   : > { %v951_v61 = vadd.f32 1e-06, %v948_v60 }
 0x222   : > { %v946_v62 = vpop.xlane.xlu1 %945 }
 0x223   : > { %5111 = vrsqrt.f32 %v951_v61  ;;  %v949_v63 = vmul.f32 0.03125, %v946_v62 }
 0x225   : > { %v952_v0 = vadd.f32 1e-06, %v949_v63 }
 0x227   : > { %5113 = vrsqrt.f32 %v952_v0 }
 0x229   : > { %v5110_v1 = vpop.eup %5109 }
 0x22a   : > { %v956_v4 = vmul.f32 %v5110_v1, %v932_v31 }
 0x22c   : > { %v965_v9 = vmul.f32 %v4104_v2, %v956_v4 }
 0x22d   : > { %v5112_v10 = vpop.eup %5111 }
 0x22e   : > { %v5440_v12 = vadd.f32 %v4105_v8, %v965_v9  ;;  %v957_v13 = vmul.f32 %v5112_v10, %v933_v35 }
 0x230   : > { %v966_v17 = vmul.f32 %v4104_v2, %v957_v13  ;;  %4468 = vmatmul.mubr.msk.f32.vlgmr.msra.gmra.mrb[0].mxu1 %vm917_vm2, %v5440_v12  ;;  %4502 = vmatmul.mubr.msk.f32.vlgmr.msra.gmra.mrb[6].mxu0 %vm917_vm2, %v5440_v12 }
 0x231   : > { %v5114_v18 = vpop.eup %5113  ;;  %4470 = vmatprep.mubr.msk.f32.mxu1 %vm5204_vm0, %v5205_v6  ;;  %4947 = vmatpush3.bf16.msra.mxu1 %v4946_v11 }
 0x232   : > { %v5454_v19 = vadd.f32 %v4105_v8, %v966_v17  ;;  %v958_v20 = vmul.f32 %v5114_v18, %v934_v40  ;;  %4504 = vmatprep.mubr.msk.f32.mxu0 %vm5204_vm0, %v5205_v6  ;;  %4948 = vmatprep.subr.bf16.mxu1 %v5203_v3 }
 0x234   : > { %v967_v23 = vmul.f32 %v4104_v2, %v958_v20  ;;  %4471 = vmatmul.mubr.msk.f32.gmra.mrb[2].mxu1 %vm917_vm2, %v5454_v19  ;;  %4505 = vmatmul.mubr.msk.f32.gmra.mrb[8].mxu0 %vm917_vm2, %v5454_v19  ;;  %v839_v20 = vld [vmem:[%s6332_s25 + $0x20] sm:$0xff] }
 0x235   : > { %4473 = vmatprep.mubr.msk.f32.mxu1 %vm5204_vm0, %v5205_v6  ;;  %4507 = vmatprep.mubr.msk.f32.mxu0 %vm5204_vm0, %v5205_v6 }
 0x236   : > { %v5467_v24 = vadd.f32 %v4105_v8, %v967_v23  ;;  %4950 = vmatpush3.bf16.msra.mxu1 %v4949_v22  ;;  %v840_v22 = vld [vmem:[%s6332_s25 + $0x28] sm:$0xff] }
 0x237   : > { %4957 = vmatprep.subr.bf16.mxu1 %v5203_v3 }
 0x238   : > { %4474 = vmatmul.mubr.msk.f32.gmra.mrb[4].mxu1 %vm917_vm2, %v5467_v24  ;;  %4508 = vmatmul.mubr.msk.f32.gmra.mrb[10].mxu0 %vm917_vm2, %v5467_v24 }
 0x239   : > { %4484 = vmatprep.mubr.msk.f32.mxu1 %vm5204_vm0, %v5205_v6  ;;  %4531 = vmatprep.mubr.msk.f32.mxu0 %vm5204_vm0, %v5205_v6 }
 0x23c   : > { %4485 = vmatmul.mubr.msk.f32.vlgmr.msra.gmra.mrb[6].mxu1 %vm917_vm2, %v5440_v12 }
 0x23d   : > { %4487 = vmatprep.mubr.msk.f32.mxu1 %vm5204_vm0, %v5205_v6 }
 0x240   : > { %4488 = vmatmul.mubr.msk.f32.gmra.mrb[8].mxu1 %vm917_vm2, %v5454_v19 }
 0x241   : > { %4490 = vmatprep.mubr.msk.f32.mxu1 %vm5204_vm0, %v5205_v6 }
 0x244   : > { %4491 = vmatmul.mubr.msk.f32.gmra.mrb[10].mxu1 %vm917_vm2, %v5467_v24 }
 0x245   : > { %4516 = vmatprep.mubr.msk.f32.mxu1 %vm5204_vm0, %v5205_v6 }
 0x303   : > { %v1058_v25 = vpop.f32.mrb[0].mxu1  ;;  %v1230_v27 = vpop.f32.mrb[6].mxu0 }
 0x304   : > { %v4469_v28 = vpop.f32.mrb[1].mxu1  ;;  %v4503_v29 = vpop.f32.mrb[7].mxu0  ;;  %v1231_v33 = vadd.f32 %v4114_v30, %v1230_v27  ;;  %v1059_v56 = vadd.f32 %v4106_v54, %v1058_v25  ;;  %v4971_v25 = vpack.c.bf16 %v840_v22, %v839_v20  ;;  %v841_v27 = vld [vmem:[%s6332_s25 + $0x30] sm:$0xff] }
 0x305   : > { %v842_v28 = vld [vmem:[%s6332_s25 + $0x38] sm:$0xff] }
 0x307   : > { %v1063_v31 = vpop.f32.mrb[2].mxu1  ;;  %v1235_v32 = vpop.f32.mrb[8].mxu0 }
 0x308   : > { %v1236_v34 = vadd.f32 %v4114_v30, %v1235_v32  ;;  %v4472_v35 = vpop.f32.mrb[3].mxu1  ;;  %v4506_v36 = vpop.f32.mrb[9].mxu0  ;;  %v1064_v57 = vadd.f32 %v4106_v54, %v1063_v31  ;;  %v819_v31 = vld [vmem:[%s6330_s1 + $0x20] sm:$0xff]  ;;  %v820_v32 = vld [vmem:[%s6330_s1 + $0x28] sm:$0xff] }
 0x309   : > { %v821_v35 = vld [vmem:[%s6330_s1 + $0x30] sm:$0xff]  ;;  %v822_v36 = vld [vmem:[%s6330_s1 + $0x38] sm:$0xff] }
 0x30a   : > { %v4962_v37 = vpack.c.bf16 %v1236_v34, %v1231_v33  ;;  %v4965_v34 = vpack.c.bf16 %v820_v32, %v819_v31 }
 0x30b   : > { %v1068_v38 = vpop.f32.mrb[4].mxu1  ;;  %v1240_v39 = vpop.f32.mrb[10].mxu0 }
 0x30c   : > { %v4475_v40 = vpop.f32.mrb[5].mxu1  ;;  %v4509_v41 = vpop.f32.mrb[11].mxu0  ;;  %4963 = vmatpush3.bf16.msra.mxu0 %v4962_v37  ;;  %v1241_v42 = vadd.f32 %v4114_v30, %v1240_v39  ;;  %v1069_v58 = vadd.f32 %v4106_v54, %v1068_v38  ;;  %v4974_v30 = vpack.c.bf16 %v842_v28, %v841_v27  ;;  %v4968_v38 = vpack.c.bf16 %v822_v36, %v821_v35  ;;  %v859_v39 = vld [vmem:[%s6295_s9 + $0x20] sm:$0xff] }
 0x30d   : > { %4529 = vmatprep.subr.mxu0 %v5205_v6  ;;  %v860_v40 = vld [vmem:[%s6295_s9 + $0x28] sm:$0xff] }
 0x30e   : > { %v4977_v41 = vpack.c.bf16 %v860_v40, %v859_v39 }
 0x30f   : > { %v1144_v43 = vpop.f32.mrb[6].mxu1 }
 0x310   : > { %v4486_v44 = vpop.f32.mrb[7].mxu1  ;;  %4530 = vmatpush3.msk.msra.mxu0 %vm1387_vm4, %v1241_v42  ;;  %v1145_v47 = vadd.f32 %v4110_v45, %v1144_v43  ;;  %v862_v43 = vld [vmem:[%s6295_s9 + $0x38] sm:$0xff] }
 0x311   : > { %4970 = vmatprep.subr.bf16.mxu0 %v5203_v3 }
 0x313   : > { %v1149_v46 = vpop.f32.mrb[8].mxu1 }
 0x314   : > { %v1150_v48 = vadd.f32 %v4110_v45, %v1149_v46  ;;  %v4489_v49 = vpop.f32.mrb[9].mxu1 }
 0x316   : > { %v4958_v51 = vpack.c.bf16 %v1150_v48, %v1145_v47 }
 0x317   : > { %v1154_v52 = vpop.f32.mrb[10].mxu1 }
 0x318   : > { %v4492_v53 = vpop.f32.mrb[11].mxu1  ;;  %4960 = vmatpush3.bf16.xpose.msk.msra.mxu1 %vm5501_vm6, %v4958_v51  ;;  %v1155_v55 = vadd.f32 %v4110_v45, %v1154_v52  ;;  %v4132_v52 = vld [vmem:[%s6294_s8 + $0x1] ss:$0 sm:$0xff] }
 0x319   : > { %4514 = vmatprep.subr.mxu1 %v5205_v6 }
 0x320   : > { %4515 = vmatpush3.xpose.msk.msra.mxu1 %vm1244_vm5, %v1155_v55 }
 0x321   : > { %5093 = vmatprep.subr.bf16.mxu1 %v5203_v3 }
 0x323   : > { %4517 = vmatmul.mubr.msk.f32.vlgmr.msra.gmra.mrb[12].mxu1 %vm1244_vm5, %v1059_v56 }
 0x324   : > { %5095 = vmatpush3.bf16.msra.mxu1 %v4962_v37  ;;  %4519 = vmatprep.mubr.msk.f32.mxu1 %vm5204_vm0, %v5205_v6 }
 0x325   : > { %5094 = vmatprep.subr.mxu1 %v5205_v6 }
 0x327   : > { %4520 = vmatmul.mubr.msk.f32.gmra.mrb[14].mxu1 %vm1244_vm5, %v1064_v57 }
 0x328   : > { %5096 = vmatpush3.msk.msra.mxu1 %vm1387_vm4, %v1241_v42  ;;  %4522 = vmatprep.mubr.msk.f32.mxu1 %vm5204_vm0, %v5205_v6  ;;  %v861_v42 = vld [vmem:[%s6295_s9 + $0x30] sm:$0xff] }
 0x329   : > { %4964 = vmatprep.subr.bf16.mxu1 %v5203_v3  ;;  %v4980_v44 = vpack.c.bf16 %v862_v43, %v861_v42 }
 0x32b   : > { %4523 = vmatmul.mubr.msk.f32.gmra.mrb[16].mxu1 %vm1244_vm5, %v1069_v58 }
 0x32c   : > { %4537 = vmatprep.mubr.msk.f32.mxu1 %vm5204_vm0, %v5205_v6 }
 0x3f6   : > { %v1329_v59 = vpop.f32.mrb[12].mxu1 }
 0x3f7   : > { %v1343_v60 = vmul.f32 0.25, %v1329_v59  ;;  %v4518_v61 = vpop.f32.mrb[13].mxu1 }
 0x3f9   : > { %v1347_v62 = vsel %vm1346_vm7, %v1343_v60, -inf }
 0x3fa   : > { %1348 = vmax.xlane.f32.xlu0 %v1347_v62  ;;  %v1334_v63 = vpop.f32.mrb[14].mxu1 }
 0x3fb   : > { %v1344_v0 = vmul.f32 0.25, %v1334_v63  ;;  %v4521_v1 = vpop.f32.mrb[15].mxu1  ;;  %v4128_v63 = vld [vmem:[%s6336_s0 + $0x1] ss:$0 sm:$0xff] }
 0x3fd   : > { %v1350_v2 = vsel %vm1346_vm7, %v1344_v0, -inf }
 0x3fe   : > { %1351 = vmax.xlane.f32.xlu1 %v1350_v2  ;;  %v1339_v4 = vpop.f32.mrb[16].mxu1 }
 0x3ff   : > { %v1345_v5 = vmul.f32 0.25, %v1339_v4  ;;  %v4524_v7 = vpop.f32.mrb[17].mxu1 }
 0x401   : > { %v1354_v8 = vsel %vm1353_vm8, %v1345_v5, -inf }
 0x402   : > { %1355 = vmax.xlane.f32.xlu0 %v1354_v8 }
 0x487   : > { %v1349_v9 = vpop.xlane.xlu0 %1348 }
 0x488   : > { %v1357_v10 = vsub.f32 %v1343_v60, %v1349_v9  ;;  %v4136_v9 = vld [vmem:[%s6296_s10 + $0x1] ss:$0 sm:$0xff] }
 0x48a   : > { %v1360_v11 = vmul.f32 1.442695, %v1357_v10 }
 0x48b   : > { %v1352_v13 = vpop.xlane.xlu1 %1351 }
 0x48c   : > { %5115 = vpow2.f32 %v1360_v11  ;;  %v1358_v14 = vsub.f32 %v1344_v0, %v1352_v13 }
 0x48e   : > { %v1362_v15 = vmul.f32 1.442695, %v1358_v14 }
 0x48f   : > { %v1356_v17 = vpop.xlane.xlu0 %1355 }
 0x490   : > { %5117 = vpow2.f32 %v1362_v15  ;;  %v1359_v18 = vsub.f32 %v1345_v5, %v1356_v17 }
 0x492   : > { %v1364_v23 = vmul.f32 1.442695, %v1359_v18 }
 0x494   : > { %5119 = vpow2.f32 %v1364_v23 }
 0x496   : > { %v5540_v29 = vpop.eup %5115 }
 0x497   : > { %4532 = vmatmul.mubr.msk.f32.vlgmr.msra.gmra.mrb[12].mxu0 %vm1346_vm7, %v5540_v29  ;;  %v1366_v39 = vsel %vm1346_vm7, %v5540_v29, 0.0 }
 0x498   : > { %4972 = vmatpush3.bf16.msra.mxu0 %v4971_v25  ;;  %4534 = vmatprep.mubr.msk.f32.mxu0 %vm5204_vm0, %v5205_v6 }
 0x499   : > { %4973 = vmatprep.subr.bf16.mxu0 %v5203_v3 }
 0x49a   : > { %v5553_v33 = vpop.eup %5117 }
 0x49b   : > { %4535 = vmatmul.mubr.msk.f32.gmra.mrb[14].mxu0 %vm1346_vm7, %v5553_v33 }
 0x49c   : > { %4975 = vmatpush3.bf16.msra.mxu0 %v4974_v30  ;;  %4565 = vmatprep.mubr.msk.f32.mxu0 %vm5204_vm0, %v5205_v6 }
 0x49d   : > { %4982 = vmatprep.subr.bf16.mxu0 %v5203_v3 }
 0x49e   : > { %v5566_v37 = vpop.eup %5119 }
 0x49f   : > { %4538 = vmatmul.mubr.msk.f32.vlgmr.msra.gmra.mrb[18].mxu1 %vm1346_vm7, %v5566_v37  ;;  %4566 = vmatmul.mubr.msk.f32.vlgmr.msra.gmra.mrb[16].mxu0 %vm917_vm2, %v5440_v12  ;;  %v1372_v42 = vsel %vm1353_vm8, %v5566_v37, 0.0  ;;  %v876_v37 = vld [vmem:[%s6297_s11 + $0x8] sm:$0xff] }
 0x4a0   : > { %4966 = vmatpush3.bf16.msra.mxu1 %v4965_v34  ;;  %4568 = vmatprep.mubr.msk.f32.mxu0 %vm5204_vm0, %v5205_v6 }
 0x4a1   : > { %4967 = vmatprep.subr.bf16.mxu1 %v5203_v3  ;;  %4548 = vmatprep.mubr.msk.f32.mxu1 %vm5204_vm0, %v5205_v6 }
 0x4a3   : > { %4569 = vmatmul.mubr.msk.f32.gmra.mrb[18].mxu0 %vm917_vm2, %v5454_v19 }
 0x4a4   : > { %4969 = vmatpush3.bf16.msra.mxu1 %v4968_v38  ;;  %4571 = vmatprep.mubr.msk.f32.mxu0 %vm5204_vm0, %v5205_v6 }
 0x4a5   : > { %4976 = vmatprep.subr.bf16.mxu1 %v5203_v3 }
 0x4a7   : > { %4549 = vmatmul.mubr.msk.f32.vlgmr.msra.gmra.mrb[20].mxu1 %vm917_vm2, %v5440_v12  ;;  %4572 = vmatmul.mubr.msk.f32.gmra.mrb[20].mxu0 %vm917_vm2, %v5467_v24 }
 0x4a8   : > { %4551 = vmatprep.mubr.msk.f32.mxu1 %vm5204_vm0, %v5205_v6  ;;  %4978 = vmatpush3.bf16.msra.mxu1 %v4977_v41  ;;  %v1369_v41 = vsel %vm1346_vm7, %v5553_v33, 0.0  ;;  %v875_v33 = vld [vmem:[%s6297_s11] sm:$0xff] }
 0x4a9   : > { %4979 = vmatprep.subr.bf16.mxu1 %v5203_v3  ;;  %4597 = vmatprep.mubr.msk.f32.mxu0 %vm5204_vm0, %v5205_v6 }
 0x4ab   : > { %4552 = vmatmul.mubr.msk.f32.gmra.mrb[22].mxu1 %vm917_vm2, %v5454_v19 }
 0x4ac   : > { %4554 = vmatprep.mubr.msk.f32.mxu1 %vm5204_vm0, %v5205_v6  ;;  %4981 = vmatpush3.bf16.msra.mxu1 %v4980_v44 }
 0x4ad   : > { %4986 = vmatprep.subr.bf16.mxu1 %v5203_v3 }
 0x4af   : > { %4555 = vmatmul.mubr.msk.f32.gmra.mrb[24].mxu1 %vm917_vm2, %v5467_v24 }
 0x4b0   : > { %4582 = vmatprep.mubr.msk.f32.mxu1 %vm5204_vm0, %v5205_v6 }
 0x4b3   : > { %4583 = vmatmul.mubr.msk.f32.vlgmr.msra.gmra.mrb[26].mxu1 %vm917_vm2, %v5440_v12 }
 0x4b4   : > { %4585 = vmatprep.mubr.msk.f32.mxu1 %vm5204_vm0, %v5205_v6 }
 0x4b7   : > { %4586 = vmatmul.mubr.msk.f32.gmra.mrb[28].mxu1 %vm917_vm2, %v5454_v19 }
 0x4b8   : > { %4588 = vmatprep.mubr.msk.f32.mxu1 %vm5204_vm0, %v5205_v6 }
 0x4bb   : > { %4589 = vmatmul.mubr.msk.f32.gmra.mrb[30].mxu1 %vm917_vm2, %v5467_v24 }
 0x4bc   : > { %4612 = vmatprep.mubr.msk.f32.mxu1 %vm5204_vm0, %v5205_v6 }
 0x56a   : > { %v5624_v45 = vpop.f32.mrb[12].mxu0 }
 0x56b   : > { %v4533_v46 = vpop.f32.mrb[13].mxu0 }
 0x56e   : > { %v5626_v47 = vpop.f32.mrb[14].mxu0 }
 0x56f   : > { %v4536_v12 = vpop.f32.mrb[15].mxu0 }
 0x572   : > { %v5628_v48 = vpop.f32.mrb[18].mxu1  ;;  %v1632_v49 = vpop.f32.mrb[16].mxu0 }
 0x573   : > { %v4539_v51 = vpop.f32.mrb[19].mxu1  ;;  %v4567_v19 = vpop.f32.mrb[17].mxu0  ;;  %v1633_v24 = vadd.f32 %v4132_v52, %v1632_v49 }
 0x576   : > { %v1637_v53 = vpop.f32.mrb[18].mxu0 }
 0x577   : > { %v1638_v54 = vadd.f32 %v4132_v52, %v1637_v53  ;;  %v4570_v55 = vpop.f32.mrb[19].mxu0 }
 0x579   : > { %v4983_v56 = vpack.c.bf16 %v1638_v54, %v1633_v24  ;;  %v4993_v54 = vpack.c.bf16 %v876_v37, %v875_v33 }
 0x57a   : > { %v1546_v57 = vpop.f32.mrb[20].mxu1  ;;  %v1642_v58 = vpop.f32.mrb[20].mxu0 }
 0x57b   : > { %v4550_v59 = vpop.f32.mrb[21].mxu1  ;;  %v4573_v60 = vpop.f32.mrb[21].mxu0  ;;  %4985 = vmatpush3.bf16.xpose.msk.msra.mxu0 %vm5501_vm6, %v4983_v56  ;;  %v1643_v0 = vadd.f32 %v4132_v52, %v1642_v58  ;;  %v1547_v4 = vadd.f32 %v4128_v63, %v1546_v57 }
 0x57c   : > { %4595 = vmatprep.subr.mxu0 %v5205_v6 }
 0x57e   : > { %v1551_v61 = vpop.f32.mrb[22].mxu1 }
 0x57f   : > { %v4553_v62 = vpop.f32.mrb[23].mxu1  ;;  %v1552_v8 = vadd.f32 %v4128_v63, %v1551_v61 }
 0x582   : > { %v1556_v1 = vpop.f32.mrb[24].mxu1 }
 0x583   : > { %v4556_v2 = vpop.f32.mrb[25].mxu1  ;;  %4596 = vmatpush3.xpose.msk.msra.mxu0 %vm1244_vm5, %v1643_v0  ;;  %v1557_v15 = vadd.f32 %v4128_v63, %v1556_v1 }
 0x584   : > { %4989 = vmatprep.subr.bf16.mxu0 %v5203_v3 }
 0x586   : > { %v1718_v5 = vpop.f32.mrb[26].mxu1  ;;  %4598 = vmatmul.mubr.msk.f32.vlgmr.msra.gmra.mrb[22].mxu0 %vm1244_vm5, %v1547_v4 }
 0x587   : > { %v4584_v7 = vpop.f32.mrb[27].mxu1  ;;  %4600 = vmatprep.mubr.msk.f32.mxu0 %vm5204_vm0, %v5205_v6  ;;  %v1719_v11 = vadd.f32 %v4136_v9, %v1718_v5 }
 0x58a   : > { %v1723_v10 = vpop.f32.mrb[28].mxu1  ;;  %4601 = vmatmul.mubr.msk.f32.gmra.mrb[24].mxu0 %vm1244_vm5, %v1552_v8 }
 0x58b   : > { %v1724_v13 = vadd.f32 %v4136_v9, %v1723_v10  ;;  %v4587_v14 = vpop.f32.mrb[29].mxu1  ;;  %4603 = vmatprep.mubr.msk.f32.mxu0 %vm5204_vm0, %v5205_v6 }
 0x58d   : > { %v4987_v17 = vpack.c.bf16 %v1724_v13, %v1719_v11 }
 0x58e   : > { %v1728_v18 = vpop.f32.mrb[30].mxu1  ;;  %4604 = vmatmul.mubr.msk.f32.gmra.mrb[26].mxu0 %vm1244_vm5, %v1557_v15 }
 0x58f   : > { %v4590_v20 = vpop.f32.mrb[31].mxu1  ;;  %4988 = vmatpush3.bf16.msra.mxu1 %v4987_v17  ;;  %4625 = vmatprep.mubr.msk.f32.mxu0 %vm5204_vm0, %v5205_v6  ;;  %v1729_v22 = vadd.f32 %v4136_v9, %v1728_v18 }
 0x590   : > { %4610 = vmatprep.subr.mxu1 %v5205_v6 }
 0x593   : > { %4611 = vmatpush3.msk.msra.mxu1 %vm1387_vm4, %v1729_v22 }
 0x594   : > { %4992 = vmatprep.subr.bf16.mxu1 %v5203_v3 }
 0x659   : > { %v1816_v23 = vpop.f32.mrb[22].mxu0 }
 0x65a   : > { %v1830_v25 = vmul.f32 0.25, %v1816_v23  ;;  %v4599_v27 = vpop.f32.mrb[23].mxu0 }
 0x65c   : > { %v1833_v28 = vsel %vm1346_vm7, %v1830_v25, -inf }
 0x65d   : > { %1834 = vmax.xlane.f32.xlu1 %v1833_v28  ;;  %v1821_v30 = vpop.f32.mrb[24].mxu0 }
 0x65e   : > { %v1831_v31 = vmul.f32 0.25, %v1821_v30  ;;  %v4602_v32 = vpop.f32.mrb[25].mxu0 }
 0x660   : > { %v1836_v34 = vsel %vm1346_vm7, %v1831_v31, -inf }
 0x661   : > { %1837 = vmax.xlane.f32.xlu0 %v1836_v34  ;;  %v1826_v35 = vpop.f32.mrb[26].mxu0 }
 0x662   : > { %v1832_v36 = vmul.f32 0.25, %v1826_v35  ;;  %v4605_v38 = vpop.f32.mrb[27].mxu0 }
 0x664   : > { %v1839_v40 = vsel %vm1353_vm8, %v1832_v36, -inf }
 0x665   : > { %1367 = vadd.xlane.f32.xlu0 %v1366_v39  ;;  %1840 = vmax.xlane.f32.xlu1 %v1839_v40  ;;  %v4156_v39 = vld [vmem:[%s6298_s12] ss:$0 sm:$0xff] }
 0x669   : > { %1370 = vadd.xlane.f32.xlu0 %v1369_v41 }
 0x66d   : > { %1373 = vadd.xlane.f32.xlu0 %v1372_v42 }
 0x6ea   : > { %v1835_v43 = vpop.xlane.xlu1 %1834 }
 0x6eb   : > { %v1842_v44 = vsub.f32 %v1830_v25, %v1835_v43 }
 0x6ed   : > { %v1845_v46 = vmul.f32 1.442695, %v1842_v44 }
 0x6ee   : > { %v1838_v12 = vpop.xlane.xlu0 %1837 }
 0x6ef   : > { %5121 = vpow2.f32 %v1845_v46  ;;  %v1843_v49 = vsub.f32 %v1831_v31, %v1838_v12 }
 0x6f1   : > { %v1847_v51 = vmul.f32 1.442695, %v1843_v49 }
 0x6f2   : > { %v1368_v29 = vpop.xlane.xlu0 %1367  ;;  %v1841_v19 = vpop.xlane.xlu1 %1840 }
 0x6f3   : > { %5123 = vpow2.f32 %v1847_v51  ;;  %v1844_v52 = vsub.f32 %v1832_v36, %v1841_v19 }
 0x6f4   : > { %5125 = vrcp.f32 %v1368_v29 }
 0x6f5   : > { %v1849_v53 = vmul.f32 1.442695, %v1844_v52 }
 0x6f6   : > { %v1371_v24 = vpop.xlane.xlu0 %1370 }
 0x6f7   : > { %5127 = vpow2.f32 %v1849_v53 }
 0x6f8   : > { %5129 = vrcp.f32 %v1371_v24 }
 0x6f9   : > { %v5122_v55 = vpop.eup %5121 }
 0x6fa   : > { %4613 = vmatmul.mubr.msk.f32.vlgmr.msra.gmra.mrb[32].mxu1 %vm1346_vm7, %v5122_v55  ;;  %v1851_v56 = vsel %vm1346_vm7, %v5122_v55, 0.0  ;;  %v1374_v57 = vpop.xlane.xlu0 %1373 }
 0x6fb   : > { %1852 = vadd.xlane.f32.xlu1 %v1851_v56  ;;  %4615 = vmatprep.mubr.msk.f32.mxu1 %vm5204_vm0, %v5205_v6  ;;  %5131 = vrcp.f32 %v1374_v57 }
 0x6fc   : > { %4994 = vmatpush3.bf16.msra.mxu1 %v4993_v54 }
 0x6fd   : > { %v5124_v58 = vpop.eup %5123  ;;  %5001 = vmatprep.subr.bf16.mxu1 %v5203_v3 }
 0x6fe   : > { %4616 = vmatmul.mubr.msk.f32.gmra.mrb[34].mxu1 %vm1346_vm7, %v5124_v58  ;;  %v1854_v59 = vsel %vm1346_vm7, %v5124_v58, 0.0  ;;  %v5126_v60 = vpop.eup %5125 }
 0x6ff   : > { %1855 = vadd.xlane.f32.xlu1 %v1854_v59  ;;  %4618 = vmatprep.mubr.msk.f32.mxu1 %vm5204_vm0, %v5205_v6  ;;  %v1471_v63 = vmul.f32 %v5126_v60, %v5624_v45  ;;  %v877_v45 = vld [vmem:[%s6297_s11 + $0x10] sm:$0xff] }
 0x701   : > { %v5128_v61 = vpop.eup %5127 }
 0x702   : > { %4619 = vmatmul.mubr.msk.f32.gmra.mrb[36].mxu1 %vm1346_vm7, %v5128_v61  ;;  %v1857_v62 = vsel %vm1353_vm8, %v5128_v61, 0.0  ;;  %v5130_v0 = vpop.eup %5129 }
 0x703   : > { %1858 = vadd.xlane.f32.xlu1 %v1857_v62  ;;  %4638 = vmatprep.mubr.msk.f32.mxu1 %vm5204_vm0, %v5205_v6  ;;  %v1472_v1 = vmul.f32 %v5130_v0, %v5626_v47  ;;  %v878_v47 = vld [vmem:[%s6297_s11 + $0x18] sm:$0xff] }
 0x704   : > { %v4990_v5 = vpack.c.bf16 %v878_v47, %v877_v45  ;;  %v891_v45 = vld [vmem:[%s6301_s15 + $0x10] sm:$0xff]  ;;  %v892_v47 = vld [vmem:[%s6301_s15 + $0x18] sm:$0xff] }
 0x705   : > { %v5132_v2 = vpop.eup %5131 }
 0x706   : > { %4639 = vmatmul.mubr.msk.f32.vlgmr.msra.gmra.mrb[38].mxu1 %vm1244_vm5, %v1471_v63  ;;  %v1473_v4 = vmul.f32 %v5132_v2, %v5628_v48  ;;  %4991 = vmatpush3.bf16.msra.mxu0 %v4990_v5  ;;  %v890_v2 = vld [vmem:[%s6301_s15 + $0x8] sm:$0xff]  ;;  %v4999_v5 = vpack.c.bf16 %v892_v47, %v891_v45 }
 0x707   : > { %4641 = vmatprep.mubr.msk.f32.mxu1 %vm5204_vm0, %v5205_v6  ;;  %4995 = vmatprep.subr.bf16.mxu0 %v5203_v3 }
 0x70a   : > { %4642 = vmatmul.mubr.msk.f32.gmra.mrb[40].mxu1 %vm1244_vm5, %v1472_v1  ;;  %v889_v1 = vld [vmem:[%s6301_s15] sm:$0xff] }
 0x70b   : > { %4644 = vmatprep.mubr.msk.f32.mxu1 %vm5204_vm0, %v5205_v6 }
 0x70e   : > { %4645 = vmatmul.mubr.msk.f32.gmra.mrb[42].mxu1 %vm1244_vm5, %v1473_v4  ;;  %v4996_v4 = vpack.c.bf16 %v890_v2, %v889_v1 }
 0x70f   : > { %4680 = vmatprep.mubr.msk.f32.mxu1 %vm5204_vm0, %v5205_v6 }
 0x788   : > { %v1853_v7 = vpop.xlane.xlu1 %1852 }
 0x789   : > { %5133 = vrcp.f32 %v1853_v7 }
 0x78c   : > { %v1856_v8 = vpop.xlane.xlu1 %1855 }
 0x78d   : > { %5135 = vrcp.f32 %v1856_v8 }
 0x790   : > { %v1859_v48 = vpop.xlane.xlu1 %1858 }
 0x791   : > { %5137 = vrcp.f32 %v1859_v48 }
 0x793   : > { %v5134_v9 = vpop.eup %5133 }
 0x797   : > { %v5136_v14 = vpop.eup %5135 }
 0x79b   : > { %v5138_v20 = vpop.eup %5137 }
 0x7cd   : > { %v1941_v10 = vpop.f32.mrb[32].mxu1 }
 0x7ce   : > { %v1955_v11 = vmul.f32 %v5134_v9, %v1941_v10  ;;  %v4614_v13 = vpop.f32.mrb[33].mxu1 }
 0x7d0   : > { %4626 = vmatmul.mubr.msk.f32.vlgmr.msra.gmra.mrb[28].mxu0 %vm1244_vm5, %v1955_v11 }
 0x7d1   : > { %v1946_v15 = vpop.f32.mrb[34].mxu1  ;;  %4628 = vmatprep.mubr.msk.f32.mxu0 %vm5204_vm0, %v5205_v6  ;;  %4997 = vmatpush3.bf16.msra.mxu0 %v4996_v4 }
 0x7d2   : > { %v1956_v17 = vmul.f32 %v5136_v14, %v1946_v15  ;;  %v4617_v18 = vpop.f32.mrb[35].mxu1  ;;  %4998 = vmatprep.subr.bf16.mxu0 %v5203_v3 }
 0x7d3   : > { %v4157_v18 = vld [vmem:[%s6299_s13] ss:$0 sm:$0xff] }
 0x7d4   : > { %4629 = vmatmul.mubr.msk.f32.gmra.mrb[30].mxu0 %vm1244_vm5, %v1956_v17 }
 0x7d5   : > { %v1951_v22 = vpop.f32.mrb[36].mxu1  ;;  %4631 = vmatprep.mubr.msk.f32.mxu0 %vm5204_vm0, %v5205_v6  ;;  %5000 = vmatpush3.bf16.msra.mxu0 %v4999_v5 }
 0x7d6   : > { %v1957_v23 = vmul.f32 %v5138_v20, %v1951_v22  ;;  %v4620_v25 = vpop.f32.mrb[37].mxu1  ;;  %5013 = vmatprep.subr.bf16.mxu0 %v5203_v3  ;;  %v4158_v22 = vld [vmem:[%s6300_s14] ss:$0 sm:$0xff] }
 0x7d8   : > { %4632 = vmatmul.mubr.msk.f32.gmra.mrb[32].mxu0 %vm1244_vm5, %v1957_v23 }
 0x7d9   : > { %v2122_v27 = vpop.f32.mrb[38].mxu1  ;;  %4655 = vmatprep.mubr.msk.f32.mxu0 %vm5204_vm0, %v5205_v6 }
 0x7da   : > { %v4640_v28 = vpop.f32.mrb[39].mxu1 }
 0x7dd   : > { %v2127_v30 = vpop.f32.mrb[40].mxu1 }
 0x7de   : > { %v4643_v31 = vpop.f32.mrb[41].mxu1 }
 0x7e1   : > { %v2132_v32 = vpop.f32.mrb[42].mxu1 }
 0x7e2   : > { %v4646_v34 = vpop.f32.mrb[43].mxu1 }
 0x8a3   : > { %v2033_v35 = vpop.f32.mrb[28].mxu0 }
 0x8a4   : > { %v2123_v36 = vadd.f32 %v2122_v27, %v2033_v35  ;;  %v4627_v38 = vpop.f32.mrb[29].mxu0 }
 0x8a5   : > { %v899_v38 = vld [vmem:[%s6303_s17] sm:$0xff] }
 0x8a6   : > { %v2136_v40 = vadd.f32 %v2123_v36, %v5376_v16 }
 0x8a7   : > { %v2038_v41 = vpop.f32.mrb[30].mxu0 }
 0x8a8   : > { %v5716_v42 = vadd.f32 %v4156_v39, %v2136_v40  ;;  %v2128_v43 = vadd.f32 %v2127_v30, %v2038_v41  ;;  %v4630_v44 = vpop.f32.mrb[31].mxu0  ;;  %v901_v41 = vld [vmem:[%s6303_s17 + $0x10] sm:$0xff] }
 0x8aa   : > { %v2137_v46 = vadd.f32 %v2128_v43, %v5383_v21  ;;  %v2148_v12 = vsel %vm917_vm2, %v5716_v42, 0.0  ;;  %v902_v43 = vld [vmem:[%s6303_s17 + $0x18] sm:$0xff] }
 0x8ab   : > { %2149 = vadd.xlane.f32.xlu0 %v2148_v12  ;;  %v2043_v49 = vpop.f32.mrb[32].mxu0  ;;  %v5005_v44 = vpack.c.bf16 %v902_v43, %v901_v41  ;;  %v904_v12 = vld [vmem:[%s6303_s17 + $0x28] sm:$0xff] }
 0x8ac   : > { %v5721_v51 = vadd.f32 %v4156_v39, %v2137_v46  ;;  %v2133_v29 = vadd.f32 %v2132_v32, %v2043_v49  ;;  %v4633_v19 = vpop.f32.mrb[33].mxu0  ;;  %v903_v46 = vld [vmem:[%s6303_s17 + $0x20] sm:$0xff] }
 0x8ad   : > { %v5008_v49 = vpack.c.bf16 %v904_v12, %v903_v46  ;;  %v906_v19 = vld [vmem:[%s6303_s17 + $0x38] sm:$0xff] }
 0x8ae   : > { %v2138_v52 = vadd.f32 %v2133_v29, %v5390_v26  ;;  %v2151_v16 = vsel %vm917_vm2, %v5721_v51, 0.0  ;;  %v905_v29 = vld [vmem:[%s6303_s17 + $0x30] sm:$0xff] }
 0x8af   : > { %2152 = vadd.xlane.f32.xlu1 %v2151_v16  ;;  %v4159_v16 = vld [vmem:[%s6302_s16] ss:$0 sm:$0xff] }
 0x8b0   : > { %v5726_v53 = vadd.f32 %v4156_v39, %v2138_v52  ;;  %v900_v39 = vld [vmem:[%s6303_s17 + $0x8] sm:$0xff]  ;;  %v5011_v52 = vpack.c.bf16 %v906_v19, %v905_v29 }
 0x8b1   : > { %v5002_v40 = vpack.c.bf16 %v900_v39, %v899_v38 }
 0x8b2   : > { %v2154_v21 = vsel %vm924_vm3, %v5726_v53, 0.0 }
 0x8b3   : > { %2155 = vadd.xlane.f32.xlu0 %v2154_v21  ;;  %5003 = vmatpush3.bf16.msra.mxu1 %v5002_v40 }
 0x8b4   : > { %5004 = vmatprep.subr.bf16.mxu1 %v5203_v3 }
 0x8b7   : > { %5006 = vmatpush3.bf16.msra.mxu1 %v5005_v44 }
 0x8b8   : > { %5007 = vmatprep.subr.bf16.mxu1 %v5203_v3 }
 0x8bb   : > { %5009 = vmatpush3.bf16.msra.mxu1 %v5008_v49 }
 0x8bc   : > { %5010 = vmatprep.subr.bf16.mxu1 %v5203_v3 }
 0x8bf   : > { %5012 = vmatpush3.bf16.msra.mxu1 %v5011_v52 }
 0x8c0   : > { %5025 = vmatprep.subr.bf16.mxu1 %v5203_v3 }
 0x938   : > { %v2150_v33 = vpop.xlane.xlu0 %2149 }
 0x939   : > { %v2157_v37 = vmul.f32 0.03125, %v2150_v33 }
 0x93b   : > { %v2160_v24 = vsub.f32 %v5716_v42, %v2157_v37 }
 0x93c   : > { %v2153_v54 = vpop.xlane.xlu1 %2152 }
 0x93d   : > { %v2158_v55 = vmul.f32 0.03125, %v2153_v54  ;;  %v2163_v56 = vmul.f32 %v2160_v24, %v2160_v24 }
 0x93f   : > { %v2161_v57 = vsub.f32 %v5721_v51, %v2158_v55  ;;  %v2166_v26 = vsel %vm917_vm2, %v2163_v56, 0.0 }
 0x940   : > { %2167 = vadd.xlane.f32.xlu1 %v2166_v26  ;;  %v2156_v58 = vpop.xlane.xlu0 %2155 }
 0x941   : > { %v2159_v59 = vmul.f32 0.03125, %v2156_v58  ;;  %v2164_v60 = vmul.f32 %v2161_v57, %v2161_v57 }
 0x943   : > { %v2162_v61 = vsub.f32 %v5726_v53, %v2159_v59  ;;  %v2169_v62 = vsel %vm917_vm2, %v2164_v60, 0.0 }
 0x944   : > { %2170 = vadd.xlane.f32.xlu0 %v2169_v62 }
 0x945   : > { %v2165_v63 = vmul.f32 %v2162_v61, %v2162_v61 }
 0x947   : > { %v2172_v0 = vsel %vm924_vm3, %v2165_v63, 0.0 }
 0x948   : > { %2173 = vadd.xlane.f32.xlu1 %v2172_v0 }
 0x9cd   : > { %v2168_v7 = vpop.xlane.xlu1 %2167 }
 0x9ce   : > { %v2175_v8 = vmul.f32 0.03125, %v2168_v7 }
 0x9d0   : > { %v2178_v48 = vadd.f32 1e-06, %v2175_v8 }
 0x9d1   : > { %v2171_v9 = vpop.xlane.xlu0 %2170 }
 0x9d2   : > { %5139 = vrsqrt.f32 %v2178_v48  ;;  %v2176_v10 = vmul.f32 0.03125, %v2171_v9 }
 0x9d4   : > { %v2179_v11 = vadd.f32 1e-06, %v2176_v10 }
 0x9d5   : > { %v2174_v13 = vpop.xlane.xlu1 %2173 }
 0x9d6   : > { %5141 = vrsqrt.f32 %v2179_v11  ;;  %v2177_v14 = vmul.f32 0.03125, %v2174_v13 }
 0x9d8   : > { %v2180_v15 = vadd.f32 1e-06, %v2177_v14 }
 0x9da   : > { %5143 = vrsqrt.f32 %v2180_v15 }
 0x9dc   : > { %v5140_v17 = vpop.eup %5139 }
 0x9dd   : > { %v2184_v20 = vmul.f32 %v5140_v17, %v2160_v24 }
 0x9df   : > { %v2193_v23 = vmul.f32 %v4157_v18, %v2184_v20 }
 0x9e0   : > { %v5142_v25 = vpop.eup %5141 }
 0x9e1   : > { %v2202_v27 = vadd.f32 %v4158_v22, %v2193_v23  ;;  %v2185_v28 = vmul.f32 %v5142_v25, %v2161_v57  ;;  %v4166_v25 = vld [vmem:[%s6304_s18] ss:$0 sm:$0xff] }
 0x9e3   : > { %4656 = vmatmul.mubr.msk.f32.vlgmr.msra.gmra.mrb[34].mxu0 %vm917_vm2, %v2202_v27  ;;  %v2194_v30 = vmul.f32 %v4157_v18, %v2185_v28 }
 0x9e4   : > { %v5144_v31 = vpop.eup %5143  ;;  %4658 = vmatprep.mubr.msk.f32.mxu0 %vm5204_vm0, %v5205_v6 }
 0x9e5   : > { %v2203_v32 = vadd.f32 %v4158_v22, %v2194_v30  ;;  %v2186_v34 = vmul.f32 %v5144_v31, %v2162_v61 }
 0x9e7   : > { %4659 = vmatmul.mubr.msk.f32.gmra.mrb[36].mxu0 %vm917_vm2, %v2203_v32  ;;  %v2195_v35 = vmul.f32 %v4157_v18, %v2186_v34 }
 0x9e8   : > { %4661 = vmatprep.mubr.msk.f32.mxu0 %vm5204_vm0, %v5205_v6 }
 0x9e9   : > { %v2204_v36 = vadd.f32 %v4158_v22, %v2195_v35 }
 0x9eb   : > { %4662 = vmatmul.mubr.msk.f32.gmra.mrb[38].mxu0 %vm917_vm2, %v2204_v36 }
 0x9ec   : > { %4697 = vmatprep.mubr.msk.f32.mxu0 %vm5204_vm0, %v5205_v6 }
 0xab6   : > { %v2286_v21 = vpop.f32.mrb[34].mxu0 }
 0xab7   : > { %v2287_v33 = vadd.f32 %v4159_v16, %v2286_v21  ;;  %v4657_v37 = vpop.f32.mrb[35].mxu0 }
 0xab9   : > { %v2303_v24 = vmul.f32 0.044715, %v2287_v33  ;;  %v2300_v9 = vmul.f32 0.5, %v2287_v33 }
 0xaba   : > { %v2291_v54 = vpop.f32.mrb[36].mxu0 }
 0xabb   : > { %v2306_v55 = vmul.f32 %v2303_v24, %v2287_v33  ;;  %v2292_v56 = vadd.f32 %v4159_v16, %v2291_v54  ;;  %v4660_v57 = vpop.f32.mrb[37].mxu0 }
 0xabc   : > { %v824_v57 = vld [vmem:[%s6330_s1 + $0x48] sm:$0xff] }
 0xabd   : > { %v2309_v26 = vmul.f32 %v2306_v55, %v2287_v33  ;;  %v2304_v58 = vmul.f32 0.044715, %v2292_v56  ;;  %v2301_v14 = vmul.f32 0.5, %v2292_v56 }
 0xabe   : > { %v2296_v59 = vpop.f32.mrb[38].mxu0 }
 0xabf   : > { %v2312_v60 = vadd.f32 %v2309_v26, %v2287_v33  ;;  %v2307_v61 = vmul.f32 %v2304_v58, %v2292_v56  ;;  %v2297_v62 = vadd.f32 %v4159_v16, %v2296_v59  ;;  %v4663_v63 = vpop.f32.mrb[39].mxu0  ;;  %v863_v26 = vld [vmem:[%s6295_s9 + $0x40] sm:$0xff]  ;;  %v864_v59 = vld [vmem:[%s6295_s9 + $0x48] sm:$0xff] }
 0xac0   : > { %v865_v63 = vld [vmem:[%s6295_s9 + $0x50] sm:$0xff] }
 0xac1   : > { %v2315_v0 = vmul.f32 0.7978846, %v2312_v60  ;;  %v2310_v1 = vmul.f32 %v2307_v61, %v2292_v56  ;;  %v2305_v2 = vmul.f32 0.044715, %v2297_v62  ;;  %v2302_v20 = vmul.f32 0.5, %v2297_v62  ;;  %v825_v61 = vld [vmem:[%s6330_s1 + $0x50] sm:$0xff] }
 0xac2   : > { %v5026_v60 = vpack.c.bf16 %v864_v59, %v863_v26  ;;  %v4173_v26 = vld [vmem:[%s6294_s8 + $0x2] ss:$0 sm:$0xff] }
 0xac3   : > { %5145 = vtanh.f32 %v2315_v0  ;;  %v2313_v4 = vadd.f32 %v2310_v1, %v2292_v56  ;;  %v2308_v45 = vmul.f32 %v2305_v2, %v2297_v62  ;;  %v823_v56 = vld [vmem:[%s6330_s1 + $0x40] sm:$0xff]  ;;  %v866_v1 = vld [vmem:[%s6295_s9 + $0x58] sm:$0xff] }
 0xac4   : > { %v5014_v58 = vpack.c.bf16 %v824_v57, %v823_v56  ;;  %v5029_v2 = vpack.c.bf16 %v866_v1, %v865_v63  ;;  %v827_v1 = vld [vmem:[%s6330_s1 + $0x60] sm:$0xff] }
 0xac5   : > { %v2311_v47 = vmul.f32 %v2308_v45, %v2297_v62  ;;  %v2316_v5 = vmul.f32 0.7978846, %v2313_v4 }
 0xac6   : > { %5015 = vmatpush3.bf16.msra.mxu0 %v5014_v58 }
 0xac7   : > { %v2314_v7 = vadd.f32 %v2311_v47, %v2297_v62  ;;  %5147 = vtanh.f32 %v2316_v5  ;;  %5016 = vmatprep.subr.bf16.mxu0 %v5203_v3  ;;  %v826_v62 = vld [vmem:[%s6330_s1 + $0x58] sm:$0xff] }
 0xac8   : > { %v5017_v0 = vpack.c.bf16 %v826_v62, %v825_v61 }
 0xac9   : > { %v2317_v8 = vmul.f32 0.7978846, %v2314_v7 }
 0xaca   : > { %5018 = vmatpush3.bf16.msra.mxu0 %v5017_v0 }
 0xacb   : > { %5149 = vtanh.f32 %v2317_v8  ;;  %5019 = vmatprep.subr.bf16.mxu0 %v5203_v3 }
 0xacd   : > { %v5146_v48 = vpop.eup %5145 }
 0xace   : > { %v2321_v10 = vadd.f32 1.0, %v5146_v48 }
 0xad0   : > { %v2324_v11 = vmul.f32 %v2321_v10, %v2300_v9 }
 0xad1   : > { %v5148_v13 = vpop.eup %5147 }
 0xad2   : > { %4681 = vmatmul.mubr.msk.f32.vlgmr.msra.gmra.mrb[44].mxu1 %vm2327_vm9, %v2324_v11  ;;  %v2322_v15 = vadd.f32 1.0, %v5148_v13  ;;  %v4167_v13 = vld [vmem:[%s6331_s3 + $0x1] ss:$0 sm:$0xff] }
 0xad3   : > { %4683 = vmatprep.mubr.msk.f32.mxu1 %vm5204_vm0, %v5205_v6  ;;  %5027 = vmatpush3.bf16.msra.mxu1 %v5026_v60 }
 0xad4   : > { %v2325_v17 = vmul.f32 %v2322_v15, %v2301_v14  ;;  %5028 = vmatprep.subr.bf16.mxu1 %v5203_v3  ;;  %v843_v15 = vld [vmem:[%s6332_s25 + $0x40] sm:$0xff] }
 0xad5   : > { %v5150_v18 = vpop.eup %5149 }
 0xad6   : > { %4684 = vmatmul.mubr.msk.f32.gmra.mrb[46].mxu1 %vm2327_vm9, %v2325_v17  ;;  %v2323_v22 = vadd.f32 1.0, %v5150_v18  ;;  %v844_v17 = vld [vmem:[%s6332_s25 + $0x48] sm:$0xff]  ;;  %v4168_v18 = vld [vmem:[%s6333_s5 + $0x1] ss:$0 sm:$0xff] }
 0xad7   : > { %4686 = vmatprep.mubr.msk.f32.mxu1 %vm5204_vm0, %v5205_v6  ;;  %5030 = vmatpush3.bf16.msra.mxu1 %v5029_v2  ;;  %v828_v2 = vld [vmem:[%s6330_s1 + $0x68] sm:$0xff] }
 0xad8   : > { %v2326_v23 = vmul.f32 %v2323_v22, %v2302_v20  ;;  %5035 = vmatprep.subr.bf16.mxu1 %v5203_v3 }
 0xada   : > { %4687 = vmatmul.mubr.msk.f32.gmra.mrb[48].mxu1 %vm2327_vm9, %v2326_v23  ;;  %v5020_v23 = vpack.c.bf16 %v844_v17, %v843_v15  ;;  %v869_v15 = vld [vmem:[%s6295_s9 + $0x70] sm:$0xff]  ;;  %v870_v17 = vld [vmem:[%s6295_s9 + $0x78] sm:$0xff] }
 0xadb   : > { %4731 = vmatprep.mubr.msk.f32.mxu1 %vm5204_vm0, %v5205_v6 }
 0xba5   : > { %v2403_v27 = vpop.f32.mrb[44].mxu1 }
 0xba6   : > { %v2417_v28 = vadd.f32 %v2403_v27, %v5716_v42  ;;  %v4682_v30 = vpop.f32.mrb[45].mxu1 }
 0xba7   : > { %v846_v30 = vld [vmem:[%s6332_s25 + $0x58] sm:$0xff] }
 0xba8   : > { %v5809_v31 = vadd.f32 %v4166_v25, %v2417_v28  ;;  %v845_v28 = vld [vmem:[%s6332_s25 + $0x50] sm:$0xff] }
 0xba9   : > { %v2408_v32 = vpop.f32.mrb[46].mxu1 }
 0xbaa   : > { %v2418_v34 = vadd.f32 %v2408_v32, %v5721_v51  ;;  %v4685_v35 = vpop.f32.mrb[47].mxu1  ;;  %v2429_v36 = vsel %vm917_vm2, %v5809_v31, 0.0 }
 0xbab   : > { %2430 = vadd.xlane.f32.xlu0 %v2429_v36 }
 0xbac   : > { %v5814_v38 = vadd.f32 %v4166_v25, %v2418_v34 }
 0xbad   : > { %v2413_v39 = vpop.f32.mrb[48].mxu1 }
 0xbae   : > { %v2419_v40 = vadd.f32 %v2413_v39, %v5726_v53  ;;  %v4688_v41 = vpop.f32.mrb[49].mxu1  ;;  %v2432_v42 = vsel %vm917_vm2, %v5814_v38, 0.0  ;;  %v5023_v39 = vpack.c.bf16 %v846_v30, %v845_v28 }
 0xbaf   : > { %2433 = vadd.xlane.f32.xlu1 %v2432_v42 }
 0xbb0   : > { %v5819_v43 = vadd.f32 %v4166_v25, %v2419_v40 }
 0xbb2   : > { %v2435_v51 = vsel %vm924_vm3, %v5819_v43, 0.0 }
 0xbb3   : > { %2436 = vadd.xlane.f32.xlu0 %v2435_v51 }
 0xc38   : > { %v2431_v44 = vpop.xlane.xlu0 %2430 }
 0xc39   : > { %v2438_v46 = vmul.f32 0.03125, %v2431_v44 }
 0xc3b   : > { %v2441_v12 = vsub.f32 %v5809_v31, %v2438_v46 }
 0xc3c   : > { %v2434_v49 = vpop.xlane.xlu1 %2433 }
 0xc3d   : > { %v2439_v29 = vmul.f32 0.03125, %v2434_v49  ;;  %v2444_v19 = vmul.f32 %v2441_v12, %v2441_v12 }
 0xc3f   : > { %v2442_v53 = vsub.f32 %v5814_v38, %v2439_v29  ;;  %v2447_v52 = vsel %vm917_vm2, %v2444_v19, 0.0 }
 0xc40   : > { %2448 = vadd.xlane.f32.xlu1 %v2447_v52  ;;  %v2437_v16 = vpop.xlane.xlu0 %2436 }
 0xc41   : > { %v2440_v21 = vmul.f32 0.03125, %v2437_v16  ;;  %v2445_v33 = vmul.f32 %v2442_v53, %v2442_v53 }
 0xc43   : > { %v2443_v37 = vsub.f32 %v5819_v43, %v2440_v21  ;;  %v2450_v24 = vsel %vm917_vm2, %v2445_v33, 0.0 }
 0xc44   : > { %2451 = vadd.xlane.f32.xlu0 %v2450_v24 }
 0xc45   : > { %v2446_v54 = vmul.f32 %v2443_v37, %v2443_v37 }
 0xc47   : > { %v2453_v55 = vsel %vm924_vm3, %v2446_v54, 0.0 }
 0xc48   : > { %2454 = vadd.xlane.f32.xlu1 %v2453_v55 }
 0xccd   : > { %v2449_v4 = vpop.xlane.xlu1 %2448 }
 0xcce   : > { %v2456_v45 = vmul.f32 0.03125, %v2449_v4  ;;  %v4169_v4 = vld [vmem:[%s6336_s0 + $0x2] ss:$0 sm:$0xff] }
 0xcd0   : > { %v2459_v47 = vadd.f32 1e-06, %v2456_v45 }
 0xcd1   : > { %v2452_v5 = vpop.xlane.xlu0 %2451 }
 0xcd2   : > { %5151 = vrsqrt.f32 %v2459_v47  ;;  %v2457_v7 = vmul.f32 0.03125, %v2452_v5  ;;  %v5039_v47 = vpack.c.bf16 %v828_v2, %v827_v1  ;;  %v848_v1 = vld [vmem:[%s6332_s25 + $0x68] sm:$0xff] }
 0xcd4   : > { %v2460_v8 = vadd.f32 1e-06, %v2457_v7  ;;  %v829_v7 = vld [vmem:[%s6330_s1 + $0x70] sm:$0xff] }
 0xcd5   : > { %v2455_v48 = vpop.xlane.xlu1 %2454 }
 0xcd6   : > { %5153 = vrsqrt.f32 %v2460_v8  ;;  %v2458_v9 = vmul.f32 0.03125, %v2455_v48  ;;  %v830_v8 = vld [vmem:[%s6330_s1 + $0x78] sm:$0xff] }
 0xcd7   : > { %v5042_v48 = vpack.c.bf16 %v830_v8, %v829_v7 }
 0xcd8   : > { %v2461_v10 = vadd.f32 1e-06, %v2458_v9 }
 0xcda   : > { %5155 = vrsqrt.f32 %v2461_v10 }
 0xcdc   : > { %v5152_v11 = vpop.eup %5151 }
 0xcdd   : > { %v2465_v14 = vmul.f32 %v5152_v11, %v2441_v12  ;;  %v4177_v12 = vld [vmem:[%s6296_s10 + $0x2] ss:$0 sm:$0xff] }
 0xcde   : > { %v867_v11 = vld [vmem:[%s6295_s9 + $0x60] sm:$0xff] }
 0xcdf   : > { %v2474_v20 = vmul.f32 %v4167_v13, %v2465_v14 }
 0xce0   : > { %v5154_v22 = vpop.eup %5153 }
 0xce1   : > { %v5869_v25 = vadd.f32 %v4168_v18, %v2474_v20  ;;  %v2466_v27 = vmul.f32 %v5154_v22, %v2442_v53 }
 0xce3   : > { %v2475_v32 = vmul.f32 %v4167_v13, %v2466_v27  ;;  %4698 = vmatmul.mubr.msk.f32.vlgmr.msra.gmra.mrb[40].mxu0 %vm917_vm2, %v5869_v25  ;;  %4732 = vmatmul.mubr.msk.f32.vlgmr.msra.gmra.mrb[50].mxu1 %vm917_vm2, %v5869_v25 }
 0xce4   : > { %v5156_v34 = vpop.eup %5155  ;;  %4700 = vmatprep.mubr.msk.f32.mxu0 %vm5204_vm0, %v5205_v6  ;;  %5021 = vmatpush3.bf16.msra.mxu0 %v5020_v23 }
 0xce5   : > { %v5883_v35 = vadd.f32 %v4168_v18, %v2475_v32  ;;  %v2467_v36 = vmul.f32 %v5156_v34, %v2443_v37  ;;  %4734 = vmatprep.mubr.msk.f32.mxu1 %vm5204_vm0, %v5205_v6  ;;  %5022 = vmatprep.subr.bf16.mxu0 %v5203_v3 }
 0xce7   : > { %v2476_v40 = vmul.f32 %v4167_v13, %v2467_v36  ;;  %4701 = vmatmul.mubr.msk.f32.gmra.mrb[42].mxu0 %vm917_vm2, %v5883_v35  ;;  %4735 = vmatmul.mubr.msk.f32.gmra.mrb[52].mxu1 %vm917_vm2, %v5883_v35  ;;  %v868_v13 = vld [vmem:[%s6295_s9 + $0x68] sm:$0xff] }
 0xce8   : > { %4703 = vmatprep.mubr.msk.f32.mxu0 %vm5204_vm0, %v5205_v6  ;;  %4737 = vmatprep.mubr.msk.f32.mxu1 %vm5204_vm0, %v5205_v6  ;;  %v5051_v14 = vpack.c.bf16 %v868_v13, %v867_v11 }
 0xce9   : > { %v5896_v41 = vadd.f32 %v4168_v18, %v2476_v40  ;;  %5024 = vmatpush3.bf16.msra.mxu0 %v5023_v39  ;;  %v5054_v18 = vpack.c.bf16 %v870_v17, %v869_v15  ;;  %v4195_v17 = vld [vmem:[%s6294_s8 + $0x3] ss:$0 sm:$0xff] }
 0xcea   : > { %5031 = vmatprep.subr.bf16.mxu0 %v5203_v3 }
 0xceb   : > { %4704 = vmatmul.mubr.msk.f32.gmra.mrb[44].mxu0 %vm917_vm2, %v5896_v41  ;;  %4738 = vmatmul.mubr.msk.f32.gmra.mrb[54].mxu1 %vm917_vm2, %v5896_v41 }
 0xcec   : > { %4714 = vmatprep.mubr.msk.f32.mxu0 %vm5204_vm0, %v5205_v6  ;;  %4761 = vmatprep.mubr.msk.f32.mxu1 %vm5204_vm0, %v5205_v6 }
 0xcef   : > { %4715 = vmatmul.mubr.msk.f32.vlgmr.msra.gmra.mrb[46].mxu0 %vm917_vm2, %v5869_v25 }
 0xcf0   : > { %4717 = vmatprep.mubr.msk.f32.mxu0 %vm5204_vm0, %v5205_v6 }
 0xcf3   : > { %4718 = vmatmul.mubr.msk.f32.gmra.mrb[48].mxu0 %vm917_vm2, %v5883_v35 }
 0xcf4   : > { %4720 = vmatprep.mubr.msk.f32.mxu0 %vm5204_vm0, %v5205_v6 }
 0xcf7   : > { %4721 = vmatmul.mubr.msk.f32.gmra.mrb[50].mxu0 %vm917_vm2, %v5896_v41 }
 0xcf8   : > { %4746 = vmatprep.mubr.msk.f32.mxu0 %vm5204_vm0, %v5205_v6 }
 0xdb6   : > { %v2567_v42 = vpop.f32.mrb[40].mxu0  ;;  %v2739_v51 = vpop.f32.mrb[50].mxu1 }
 0xdb7   : > { %v4699_v44 = vpop.f32.mrb[41].mxu0  ;;  %v4733_v46 = vpop.f32.mrb[51].mxu1  ;;  %v2740_v19 = vadd.f32 %v4177_v12, %v2739_v51  ;;  %v2568_v5 = vadd.f32 %v4169_v4, %v2567_v42 }
 0xdba   : > { %v2572_v49 = vpop.f32.mrb[42].mxu0  ;;  %v2744_v29 = vpop.f32.mrb[52].mxu1 }
 0xdbb   : > { %v2745_v53 = vadd.f32 %v4177_v12, %v2744_v29  ;;  %v4702_v52 = vpop.f32.mrb[43].mxu0  ;;  %v4736_v16 = vpop.f32.mrb[53].mxu1  ;;  %v2573_v9 = vadd.f32 %v4169_v4, %v2572_v49 }
 0xdbc   : > { %v4199_v52 = vld [vmem:[%s6296_s10 + $0x3] ss:$0 sm:$0xff] }
 0xdbd   : > { %v5036_v21 = vpack.c.bf16 %v2745_v53, %v2740_v19 }
 0xdbe   : > { %v2577_v33 = vpop.f32.mrb[44].mxu0  ;;  %v2749_v37 = vpop.f32.mrb[54].mxu1 }
 0xdbf   : > { %v4705_v24 = vpop.f32.mrb[45].mxu0  ;;  %v4739_v54 = vpop.f32.mrb[55].mxu1  ;;  %5037 = vmatpush3.bf16.msra.mxu1 %v5036_v21  ;;  %v2750_v55 = vadd.f32 %v4177_v12, %v2749_v37  ;;  %v2578_v10 = vadd.f32 %v4169_v4, %v2577_v33 }
 0xdc0   : > { %4759 = vmatprep.subr.mxu1 %v5205_v6 }
 0xdc2   : > { %v2653_v56 = vpop.f32.mrb[46].mxu0 }
 0xdc3   : > { %v4716_v57 = vpop.f32.mrb[47].mxu0  ;;  %4760 = vmatpush3.msk.msra.mxu1 %vm1387_vm4, %v2750_v55  ;;  %v2654_v59 = vadd.f32 %v4173_v26, %v2653_v56 }
 0xdc4   : > { %5044 = vmatprep.subr.bf16.mxu1 %v5203_v3 }
 0xdc6   : > { %v2658_v58 = vpop.f32.mrb[48].mxu0 }
 0xdc7   : > { %v2659_v60 = vadd.f32 %v4173_v26, %v2658_v58  ;;  %v4719_v61 = vpop.f32.mrb[49].mxu0 }
 0xdc9   : > { %v5032_v62 = vpack.c.bf16 %v2659_v60, %v2654_v59 }
 0xdca   : > { %v2663_v63 = vpop.f32.mrb[50].mxu0 }
 0xdcb   : > { %v4722_v0 = vpop.f32.mrb[51].mxu0  ;;  %5034 = vmatpush3.bf16.xpose.msk.msra.mxu0 %vm5501_vm6, %v5032_v62  ;;  %v2664_v45 = vadd.f32 %v4173_v26, %v2663_v63 }
 0xdcc   : > { %4744 = vmatprep.subr.mxu0 %v5205_v6  ;;  %v847_v0 = vld [vmem:[%s6332_s25 + $0x60] sm:$0xff] }
 0xdcd   : > { %v5045_v4 = vpack.c.bf16 %v848_v1, %v847_v0 }
 0xdd3   : > { %4745 = vmatpush3.xpose.msk.msra.mxu0 %vm1244_vm5, %v2664_v45  ;;  %v849_v45 = vld [vmem:[%s6332_s25 + $0x70] sm:$0xff] }
 0xdd4   : > { %5038 = vmatprep.subr.bf16.mxu0 %v5203_v3 }
 0xdd6   : > { %4747 = vmatmul.mubr.msk.f32.vlgmr.msra.gmra.mrb[52].mxu0 %vm1244_vm5, %v2568_v5 }
 0xdd7   : > { %4749 = vmatprep.mubr.msk.f32.mxu0 %vm5204_vm0, %v5205_v6  ;;  %5040 = vmatpush3.bf16.msra.mxu0 %v5039_v47  ;;  %v850_v47 = vld [vmem:[%s6332_s25 + $0x78] sm:$0xff] }
 0xdd8   : > { %5041 = vmatprep.subr.bf16.mxu0 %v5203_v3  ;;  %v5048_v7 = vpack.c.bf16 %v850_v47, %v849_v45 }
 0xdda   : > { %4750 = vmatmul.mubr.msk.f32.gmra.mrb[54].mxu0 %vm1244_vm5, %v2573_v9 }
 0xddb   : > { %4752 = vmatprep.mubr.msk.f32.mxu0 %vm5204_vm0, %v5205_v6  ;;  %5043 = vmatpush3.bf16.msra.mxu0 %v5042_v48 }
 0xddc   : > { %5050 = vmatprep.subr.bf16.mxu0 %v5203_v3 }
 0xdde   : > { %4753 = vmatmul.mubr.msk.f32.gmra.mrb[56].mxu0 %vm1244_vm5, %v2578_v10 }
 0xddf   : > { %4778 = vmatprep.mubr.msk.f32.mxu0 %vm5204_vm0, %v5205_v6 }
 0xde2   : > { %4779 = vmatmul.mubr.msk.f32.vlgmr.msra.gmra.mrb[58].mxu0 %vm917_vm2, %v5869_v25 }
 0xde3   : > { %4781 = vmatprep.mubr.msk.f32.mxu0 %vm5204_vm0, %v5205_v6  ;;  %5052 = vmatpush3.bf16.msra.mxu0 %v5051_v14 }
 0xde4   : > { %5053 = vmatprep.subr.bf16.mxu0 %v5203_v3 }
 0xde6   : > { %4782 = vmatmul.mubr.msk.f32.gmra.mrb[60].mxu0 %vm917_vm2, %v5883_v35 }
 0xde7   : > { %4784 = vmatprep.mubr.msk.f32.mxu0 %vm5204_vm0, %v5205_v6  ;;  %5055 = vmatpush3.bf16.msra.mxu0 %v5054_v18 }
 0xde8   : > { %5060 = vmatprep.subr.bf16.mxu0 %v5203_v3 }
 0xdea   : > { %4785 = vmatmul.mubr.msk.f32.gmra.mrb[62].mxu0 %vm917_vm2, %v5896_v41 }
 0xdeb   : > { %4812 = vmatprep.mubr.msk.f32.mxu0 %vm5204_vm0, %v5205_v6 }
 0xdee   : > { %4813 = vmatmul.mubr.msk.f32.vlgmr.msra.gmra.mrb[64].mxu0 %vm917_vm2, %v5869_v25 }
 0xdef   : > { %4815 = vmatprep.mubr.msk.f32.mxu0 %vm5204_vm0, %v5205_v6 }
 0xdf2   : > { %4816 = vmatmul.mubr.msk.f32.gmra.mrb[66].mxu0 %vm917_vm2, %v5883_v35 }
 0xdf3   : > { %4818 = vmatprep.mubr.msk.f32.mxu0 %vm5204_vm0, %v5205_v6 }
 0xdf6   : > { %4819 = vmatmul.mubr.msk.f32.gmra.mrb[68].mxu0 %vm917_vm2, %v5896_v41 }
 0xdf7   : > { %4842 = vmatprep.mubr.msk.f32.mxu0 %vm5204_vm0, %v5205_v6 }
 0xea9   : > { %v2837_v20 = vpop.f32.mrb[52].mxu0 }
 0xeaa   : > { %v2851_v22 = vmul.f32 0.25, %v2837_v20  ;;  %v4748_v23 = vpop.f32.mrb[53].mxu0 }
 0xeac   : > { %v2854_v27 = vsel %vm1346_vm7, %v2851_v22, -inf }
 0xead   : > { %2855 = vmax.xlane.f32.xlu0 %v2854_v27  ;;  %v2842_v28 = vpop.f32.mrb[54].mxu0 }
 0xeae   : > { %v2852_v30 = vmul.f32 0.25, %v2842_v28  ;;  %v4751_v32 = vpop.f32.mrb[55].mxu0 }
 0xeb0   : > { %v2857_v34 = vsel %vm1346_vm7, %v2852_v30, -inf }
 0xeb1   : > { %2858 = vmax.xlane.f32.xlu1 %v2857_v34  ;;  %v2847_v36 = vpop.f32.mrb[56].mxu0 }
 0xeb2   : > { %v2853_v39 = vmul.f32 0.25, %v2847_v36  ;;  %v4754_v40 = vpop.f32.mrb[57].mxu0 }
 0xeb4   : > { %v2860_v42 = vsel %vm1353_vm8, %v2853_v39, -inf }
 0xeb5   : > { %2861 = vmax.xlane.f32.xlu0 %v2860_v42  ;;  %v6000_v51 = vpop.f32.mrb[58].mxu0 }
 0xeb6   : > { %v4780_v44 = vpop.f32.mrb[59].mxu0 }
 0xeb9   : > { %v6002_v46 = vpop.f32.mrb[60].mxu0 }
 0xeba   : > { %v4783_v12 = vpop.f32.mrb[61].mxu0 }
 0xebd   : > { %v6004_v49 = vpop.f32.mrb[62].mxu0 }
 0xebe   : > { %v4786_v29 = vpop.f32.mrb[63].mxu0 }
 0xec1   : > { %v3223_v19 = vpop.f32.mrb[64].mxu0 }
 0xec2   : > { %v4814_v53 = vpop.f32.mrb[65].mxu0  ;;  %v3224_v21 = vadd.f32 %v4199_v52, %v3223_v19 }
 0xec5   : > { %v3228_v16 = vpop.f32.mrb[66].mxu0 }
 0xec6   : > { %v3229_v33 = vadd.f32 %v4199_v52, %v3228_v16  ;;  %v4817_v37 = vpop.f32.mrb[67].mxu0 }
 0xec8   : > { %v5061_v24 = vpack.c.bf16 %v3229_v33, %v3224_v21 }
 0xec9   : > { %v3233_v54 = vpop.f32.mrb[68].mxu0 }
 0xeca   : > { %v4820_v55 = vpop.f32.mrb[69].mxu0  ;;  %5062 = vmatpush3.bf16.msra.mxu0 %v5061_v24  ;;  %v3234_v56 = vadd.f32 %v4199_v52, %v3233_v54 }
 0xecb   : > { %4840 = vmatprep.subr.mxu0 %v5205_v6 }
 0xece   : > { %4841 = vmatpush3.msk.msra.mxu0 %vm1387_vm4, %v3234_v56 }
 0xecf   : > { %5066 = vmatprep.subr.bf16.mxu0 %v5203_v3 }
 0xf3a   : > { %v2856_v57 = vpop.xlane.xlu0 %2855 }
 0xf3b   : > { %v2863_v26 = vsub.f32 %v2851_v22, %v2856_v57 }
 0xf3d   : > { %v2866_v58 = vmul.f32 1.442695, %v2863_v26 }
 0xf3e   : > { %v2859_v59 = vpop.xlane.xlu1 %2858 }
 0xf3f   : > { %5157 = vpow2.f32 %v2866_v58  ;;  %v2864_v60 = vsub.f32 %v2852_v30, %v2859_v59  ;;  %v4191_v30 = vld [vmem:[%s6336_s0 + $0x3] ss:$0 sm:$0xff] }
 0xf40   : > { %v3052_v34 = vadd.f32 %v4191_v30, %v6000_v51  ;;  %v3057_v50 = vadd.f32 %v4191_v30, %v6002_v46  ;;  %v3062_v36 = vadd.f32 %v4191_v30, %v6004_v49  ;;  %v879_v59 = vld [vmem:[%s6297_s11 + $0x20] sm:$0xff] }
 0xf41   : > { %v2868_v61 = vmul.f32 1.442695, %v2864_v60  ;;  %v880_v60 = vld [vmem:[%s6297_s11 + $0x28] sm:$0xff] }
 0xf42   : > { %v2862_v62 = vpop.xlane.xlu0 %2861 }
 0xf43   : > { %5159 = vpow2.f32 %v2868_v61  ;;  %v2865_v63 = vsub.f32 %v2853_v39, %v2862_v62  ;;  %v5067_v61 = vpack.c.bf16 %v880_v60, %v879_v59  ;;  %v895_v59 = vld [vmem:[%s6301_s15 + $0x30] sm:$0xff]  ;;  %v896_v60 = vld [vmem:[%s6301_s15 + $0x38] sm:$0xff] }
 0xf45   : > { %v2870_v2 = vmul.f32 1.442695, %v2865_v63 }
 0xf47   : > { %5161 = vpow2.f32 %v2870_v2 }
 0xf49   : > { %v6024_v5 = vpop.eup %5157 }
 0xf4a   : > { %4762 = vmatmul.mubr.msk.f32.vlgmr.msra.gmra.mrb[56].mxu1 %vm1346_vm7, %v6024_v5  ;;  %v2872_v52 = vsel %vm1346_vm7, %v6024_v5, 0.0 }
 0xf4b   : > { %4764 = vmatprep.mubr.msk.f32.mxu1 %vm5204_vm0, %v5205_v6  ;;  %5046 = vmatpush3.bf16.msra.mxu1 %v5045_v4 }
 0xf4c   : > { %5047 = vmatprep.subr.bf16.mxu1 %v5203_v3 }
 0xf4d   : > { %v6031_v8 = vpop.eup %5159 }
 0xf4e   : > { %4765 = vmatmul.mubr.msk.f32.gmra.mrb[58].mxu1 %vm1346_vm7, %v6031_v8  ;;  %v2875_v45 = vsel %vm1346_vm7, %v6031_v8, 0.0  ;;  %v882_v8 = vld [vmem:[%s6297_s11 + $0x38] sm:$0xff] }
 0xf4f   : > { %4767 = vmatprep.mubr.msk.f32.mxu1 %vm5204_vm0, %v5205_v6  ;;  %5049 = vmatpush3.bf16.msra.mxu1 %v5048_v7  ;;  %v881_v7 = vld [vmem:[%s6297_s11 + $0x30] sm:$0xff] }
 0xf50   : > { %5056 = vmatprep.subr.bf16.mxu1 %v5203_v3 }
 0xf51   : > { %v6038_v48 = vpop.eup %5161 }
 0xf52   : > { %4768 = vmatmul.mubr.msk.f32.gmra.mrb[60].mxu1 %vm1346_vm7, %v6038_v48  ;;  %v2878_v5 = vsel %vm1353_vm8, %v6038_v48, 0.0 }
 0xf53   : > { %4795 = vmatprep.mubr.msk.f32.mxu1 %vm5204_vm0, %v5205_v6 }
 0xf56   : > { %4796 = vmatmul.mubr.msk.f32.vlgmr.msra.gmra.mrb[62].mxu1 %vm917_vm2, %v5869_v25 }
 0xf57   : > { %4798 = vmatprep.mubr.msk.f32.mxu1 %vm5204_vm0, %v5205_v6 }
 0xf5a   : > { %4799 = vmatmul.mubr.msk.f32.gmra.mrb[64].mxu1 %vm917_vm2, %v5883_v35 }
 0xf5b   : > { %4801 = vmatprep.mubr.msk.f32.mxu1 %vm5204_vm0, %v5205_v6 }
 0xf5e   : > { %4802 = vmatmul.mubr.msk.f32.gmra.mrb[66].mxu1 %vm917_vm2, %v5896_v41 }
 0xf5f   : > { %4827 = vmatprep.mubr.msk.f32.mxu1 %vm5204_vm0, %v5205_v6 }
0x101d   : > { %v6056_v9 = vpop.f32.mrb[56].mxu1 }
0x101e   : > { %v4763_v10 = vpop.f32.mrb[57].mxu1 }
0x101f   : > { %v5064_v10 = vpack.c.bf16 %v882_v8, %v881_v7  ;;  %v6177_v7 = vld [vmem:[%s6299_s13 + $0x1] ss:$0 sm:$0xff] }
0x1021   : > { %v6058_v11 = vpop.f32.mrb[58].mxu1 }
0x1022   : > { %v4766_v25 = vpop.f32.mrb[59].mxu1 }
0x1025   : > { %v6060_v13 = vpop.f32.mrb[60].mxu1 }
0x1026   : > { %v4769_v14 = vpop.f32.mrb[61].mxu1 }
0x1029   : > { %v3137_v15 = vpop.f32.mrb[62].mxu1 }
0x102a   : > { %v4797_v35 = vpop.f32.mrb[63].mxu1  ;;  %v3138_v41 = vadd.f32 %v4195_v17, %v3137_v15 }
0x102d   : > { %v3142_v18 = vpop.f32.mrb[64].mxu1 }
0x102e   : > { %v3143_v20 = vadd.f32 %v4195_v17, %v3142_v18  ;;  %v4800_v22 = vpop.f32.mrb[65].mxu1 }
0x1030   : > { %v5057_v23 = vpack.c.bf16 %v3143_v20, %v3138_v41 }
0x1031   : > { %v3147_v27 = vpop.f32.mrb[66].mxu1 }
0x1032   : > { %v4803_v28 = vpop.f32.mrb[67].mxu1  ;;  %5059 = vmatpush3.bf16.xpose.msk.msra.mxu1 %vm5501_vm6, %v5057_v23  ;;  %v3148_v32 = vadd.f32 %v4195_v17, %v3147_v27 }
0x1033   : > { %4825 = vmatprep.subr.mxu1 %v5205_v6 }
0x103a   : > { %4826 = vmatpush3.xpose.msk.msra.mxu1 %vm1244_vm5, %v3148_v32 }
0x103b   : > { %5063 = vmatprep.subr.bf16.mxu1 %v5203_v3 }
0x103d   : > { %4828 = vmatmul.mubr.msk.f32.vlgmr.msra.gmra.mrb[68].mxu1 %vm1244_vm5, %v3052_v34 }
0x103e   : > { %4830 = vmatprep.mubr.msk.f32.mxu1 %vm5204_vm0, %v5205_v6  ;;  %5065 = vmatpush3.bf16.msra.mxu1 %v5064_v10 }
0x103f   : > { %5069 = vmatprep.subr.bf16.mxu1 %v5203_v3 }
0x1041   : > { %4831 = vmatmul.mubr.msk.f32.gmra.mrb[70].mxu1 %vm1244_vm5, %v3057_v50 }
0x1042   : > { %4833 = vmatprep.mubr.msk.f32.mxu1 %vm5204_vm0, %v5205_v6 }
0x1045   : > { %4834 = vmatmul.mubr.msk.f32.gmra.mrb[72].mxu1 %vm1244_vm5, %v3062_v36 }
0x1046   : > { %4855 = vmatprep.mubr.msk.f32.mxu1 %vm5204_vm0, %v5205_v6 }
0x1110   : > { %v3321_v39 = vpop.f32.mrb[68].mxu1 }
0x1111   : > { %v3335_v40 = vmul.f32 0.25, %v3321_v39  ;;  %v4829_v42 = vpop.f32.mrb[69].mxu1 }
0x1113   : > { %v3338_v51 = vsel %vm1346_vm7, %v3335_v40, -inf }
0x1114   : > { %3339 = vmax.xlane.f32.xlu1 %v3338_v51  ;;  %v3326_v44 = vpop.f32.mrb[70].mxu1 }
0x1115   : > { %v3336_v46 = vmul.f32 0.25, %v3326_v44  ;;  %v4832_v12 = vpop.f32.mrb[71].mxu1 }
0x1116   : > { %v6145_v12 = vld [vmem:[%s6298_s12 + $0x1] ss:$0 sm:$0xff] }
0x1117   : > { %v3341_v29 = vsel %vm1346_vm7, %v3336_v46, -inf }
0x1118   : > { %3342 = vmax.xlane.f32.xlu0 %v3341_v29  ;;  %v3331_v19 = vpop.f32.mrb[72].mxu1 }
0x1119   : > { %v3337_v53 = vmul.f32 0.25, %v3331_v19  ;;  %v4835_v49 = vpop.f32.mrb[73].mxu1 }
0x111b   : > { %v3344_v16 = vsel %vm1353_vm8, %v3337_v53, -inf }
0x111c   : > { %2873 = vadd.xlane.f32.xlu0 %v2872_v52  ;;  %3345 = vmax.xlane.f32.xlu1 %v3344_v16 }
0x11a1   : > { %v3340_v21 = vpop.xlane.xlu1 %3339 }
0x11a2   : > { %v3347_v33 = vsub.f32 %v3335_v40, %v3340_v21 }
0x11a4   : > { %v3350_v37 = vmul.f32 1.442695, %v3347_v33 }
0x11a5   : > { %v3343_v24 = vpop.xlane.xlu0 %3342 }
0x11a6   : > { %5163 = vpow2.f32 %v3350_v37  ;;  %v3348_v54 = vsub.f32 %v3336_v46, %v3343_v24 }
0x11a8   : > { %v3352_v55 = vmul.f32 1.442695, %v3348_v54 }
0x11a9   : > { %v3346_v56 = vpop.xlane.xlu1 %3345  ;;  %v2874_v57 = vpop.xlane.xlu0 %2873 }
0x11aa   : > { %5165 = vpow2.f32 %v3352_v55  ;;  %v3349_v26 = vsub.f32 %v3337_v53, %v3346_v56 }
0x11ab   : > { %5167 = vrcp.f32 %v2874_v57 }
0x11ac   : > { %v3354_v58 = vmul.f32 1.442695, %v3349_v26  ;;  %v893_v26 = vld [vmem:[%s6301_s15 + $0x20] sm:$0xff] }
0x11ae   : > { %5169 = vpow2.f32 %v3354_v58 }
0x11b0   : > { %v5164_v62 = vpop.eup %5163 }
0x11b1   : > { %4843 = vmatmul.mubr.msk.f32.vlgmr.msra.gmra.mrb[70].mxu0 %vm1346_vm7, %v5164_v62  ;;  %v3356_v63 = vsel %vm1346_vm7, %v5164_v62, 0.0 }
0x11b2   : > { %3357 = vadd.xlane.f32.xlu1 %v3356_v63  ;;  %4845 = vmatprep.mubr.msk.f32.mxu0 %vm5204_vm0, %v5205_v6 }
0x11b3   : > { %5068 = vmatpush3.bf16.msra.mxu0 %v5067_v61  ;;  %v5073_v61 = vpack.c.bf16 %v896_v60, %v895_v59 }
0x11b4   : > { %v5166_v0 = vpop.eup %5165  ;;  %5075 = vmatprep.subr.bf16.mxu0 %v5203_v3 }
0x11b5   : > { %4846 = vmatmul.mubr.msk.f32.gmra.mrb[72].mxu0 %vm1346_vm7, %v5166_v0  ;;  %v3359_v1 = vsel %vm1346_vm7, %v5166_v0, 0.0  ;;  %v5168_v2 = vpop.eup %5167 }
0x11b6   : > { %3360 = vadd.xlane.f32.xlu1 %v3359_v1  ;;  %4848 = vmatprep.mubr.msk.f32.mxu0 %vm5204_vm0, %v5205_v6  ;;  %v2976_v47 = vmul.f32 %v5168_v2, %v6056_v9 }
0x11b8   : > { %v6105_v4 = vpop.eup %5169 }
0x11b9   : > { %4849 = vmatmul.mubr.msk.f32.gmra.mrb[74].mxu0 %vm1346_vm7, %v6105_v4 }
0x11ba   : > { %2876 = vadd.xlane.f32.xlu1 %v2875_v45  ;;  %4868 = vmatprep.mubr.msk.f32.mxu0 %vm5204_vm0, %v5205_v6 }
0x11bd   : > { %4869 = vmatmul.mubr.msk.f32.vlgmr.msra.gmra.mrb[76].mxu0 %vm1244_vm5, %v2976_v47 }
0x11be   : > { %2879 = vadd.xlane.f32.xlu1 %v2878_v5  ;;  %4871 = vmatprep.mubr.msk.f32.mxu0 %vm5204_vm0, %v5205_v6 }
0x123f   : > { %v3358_v9 = vpop.xlane.xlu1 %3357 }
0x1243   : > { %v3361_v25 = vpop.xlane.xlu1 %3360 }
0x1247   : > { %v2877_v14 = vpop.xlane.xlu1 %2876 }
0x1248   : > { %5171 = vrcp.f32 %v2877_v14 }
0x124b   : > { %v2880_v48 = vpop.xlane.xlu1 %2879 }
0x124c   : > { %5173 = vrcp.f32 %v2880_v48 }
0x124d   : > { %5175 = vrcp.f32 %v3358_v9 }
0x124e   : > { %5177 = vrcp.f32 %v3361_v25  ;;  %v6183_v25 = vld [vmem:[%s6300_s14 + $0x1] ss:$0 sm:$0xff] }
0x1252   : > { %v5172_v15 = vpop.eup %5171 }
0x1253   : > { %v2977_v35 = vmul.f32 %v5172_v15, %v6058_v11 }
0x1255   : > { %4872 = vmatmul.mubr.msk.f32.gmra.mrb[78].mxu0 %vm1244_vm5, %v2977_v35  ;;  %v907_v35 = vld [vmem:[%s6303_s17 + $0x40] sm:$0xff] }
0x1256   : > { %v5174_v17 = vpop.eup %5173  ;;  %4874 = vmatprep.mubr.msk.f32.mxu0 %vm5204_vm0, %v5205_v6 }
0x1257   : > { %v2978_v18 = vmul.f32 %v5174_v17, %v6060_v13  ;;  %v5176_v41 = vpop.eup %5175  ;;  %v908_v17 = vld [vmem:[%s6303_s17 + $0x48] sm:$0xff] }
0x1258   : > { %v5178_v11 = vpop.eup %5177 }
0x1259   : > { %4875 = vmatmul.mubr.msk.f32.gmra.mrb[80].mxu0 %vm1244_vm5, %v2978_v18  ;;  %v5076_v18 = vpack.c.bf16 %v908_v17, %v907_v35 }
0x125a   : > { %4910 = vmatprep.mubr.msk.f32.mxu0 %vm5204_vm0, %v5205_v6 }
0x125b   : > { %5077 = vmatpush3.bf16.msra.mxu0 %v5076_v18 }
0x125c   : > { %5078 = vmatprep.subr.bf16.mxu0 %v5203_v3 }
0x1284   : > { %v3446_v20 = vpop.f32.mrb[70].mxu0 }
0x1285   : > { %v3460_v22 = vmul.f32 %v5176_v41, %v3446_v20  ;;  %v4844_v23 = vpop.f32.mrb[71].mxu0  ;;  %v909_v41 = vld [vmem:[%s6303_s17 + $0x50] sm:$0xff]  ;;  %v910_v20 = vld [vmem:[%s6303_s17 + $0x58] sm:$0xff] }
0x1286   : > { %v911_v23 = vld [vmem:[%s6303_s17 + $0x60] sm:$0xff] }
0x1287   : > { %4856 = vmatmul.mubr.msk.f32.vlgmr.msra.gmra.mrb[74].mxu1 %vm1244_vm5, %v3460_v22  ;;  %v5079_v22 = vpack.c.bf16 %v910_v20, %v909_v41 }
0x1288   : > { %v3451_v27 = vpop.f32.mrb[72].mxu0  ;;  %4858 = vmatprep.mubr.msk.f32.mxu1 %vm5204_vm0, %v5205_v6 }
0x1289   : > { %v3461_v28 = vmul.f32 %v5178_v11, %v3451_v27  ;;  %v4847_v13 = vpop.f32.mrb[73].mxu0  ;;  %5080 = vmatpush3.bf16.msra.mxu0 %v5079_v22  ;;  %v912_v11 = vld [vmem:[%s6303_s17 + $0x68] sm:$0xff] }
0x128a   : > { %5081 = vmatprep.subr.bf16.mxu0 %v5203_v3  ;;  %v5082_v27 = vpack.c.bf16 %v912_v11, %v911_v23  ;;  %v914_v13 = vld [vmem:[%s6303_s17 + $0x78] sm:$0xff] }
0x128b   : > { %4859 = vmatmul.mubr.msk.f32.gmra.mrb[76].mxu1 %vm1244_vm5, %v3461_v28  ;;  %v913_v28 = vld [vmem:[%s6303_s17 + $0x70] sm:$0xff] }
0x128c   : > { %v3456_v30 = vpop.f32.mrb[74].mxu0  ;;  %4861 = vmatprep.mubr.msk.f32.mxu1 %vm5204_vm0, %v5205_v6 }
0x128d   : > { %v4850_v32 = vpop.f32.mrb[75].mxu0  ;;  %5083 = vmatpush3.bf16.msra.mxu0 %v5082_v27 }
0x128e   : > { %5084 = vmatprep.subr.bf16.mxu0 %v5203_v3 }
0x1290   : > { %v3627_v34 = vpop.f32.mrb[76].mxu0 }
0x1291   : > { %v4870_v50 = vpop.f32.mrb[77].mxu0 }
0x1328   : > { %v3632_v36 = vpop.f32.mrb[78].mxu0 }
0x1329   : > { %v4873_v39 = vpop.f32.mrb[79].mxu0 }
0x132c   : > { %v6140_v40 = vpop.f32.mrb[80].mxu0 }
0x132d   : > { %v4876_v42 = vpop.f32.mrb[81].mxu0 }
0x135a   : > { %v3538_v51 = vpop.f32.mrb[74].mxu1 }
0x135b   : > { %v3628_v44 = vadd.f32 %v3627_v34, %v3538_v51  ;;  %v4857_v46 = vpop.f32.mrb[75].mxu1 }
0x135d   : > { %v3641_v29 = vadd.f32 %v3628_v44, %v5809_v31  ;;  %v3362_v31 = vsel %vm1353_vm8, %v6105_v4, 0.0 }
0x135e   : > { %v3543_v19 = vpop.f32.mrb[76].mxu1 }
0x135f   : > { %v6149_v53 = vadd.f32 %v6145_v12, %v3641_v29  ;;  %v3633_v49 = vadd.f32 %v3632_v36, %v3543_v19  ;;  %v4860_v52 = vpop.f32.mrb[77].mxu1  ;;  %v6229_v19 = vld [vmem:[%s6302_s16 + $0x1] ss:$0 sm:$0xff] }
0x1361   : > { %v3653_v16 = vsel %vm917_vm2, %v6149_v53, 0.0  ;;  %v3642_v54 = vadd.f32 %v3633_v49, %v5814_v38  ;;  %v894_v38 = vld [vmem:[%s6301_s15 + $0x28] sm:$0xff] }
0x1362   : > { %3654 = vadd.xlane.f32.xlu0 %v3653_v16  ;;  %v5070_v58 = vpack.c.bf16 %v894_v38, %v893_v26 }
0x1363   : > { %v3651_v56 = vadd.f32 %v6145_v12, %v3642_v54 }
0x1364   : > { %5071 = vmatpush3.bf16.msra.mxu1 %v5070_v58 }
0x1365   : > { %v3656_v57 = vsel %vm917_vm2, %v3651_v56, 0.0  ;;  %5072 = vmatprep.subr.bf16.mxu1 %v5203_v3 }
0x1368   : > { %5074 = vmatpush3.bf16.msra.mxu1 %v5073_v61 }
0x1369   : > { %5087 = vmatprep.subr.bf16.mxu1 %v5203_v3 }
0x13ef   : > { %v3655_v21 = vpop.xlane.xlu0 %3654 }
0x13f0   : > { %v3662_v33 = vmul.f32 0.03125, %v3655_v21 }
0x13f2   : > { %v3665_v37 = vsub.f32 %v6149_v53, %v3662_v33 }
0x13f4   : > { %v3668_v24 = vmul.f32 %v3665_v37, %v3665_v37 }
0x13f6   : > { %v3671_v55 = vsel %vm917_vm2, %v3668_v24, 0.0 }
0x13f7   : > { %3672 = vadd.xlane.f32.xlu0 %v3671_v55 }
0x13fb   : > { %3363 = vadd.xlane.f32.xlu0 %v3362_v31 }
0x13ff   : > { %3657 = vadd.xlane.f32.xlu0 %v3656_v57 }
0x1484   : > { %v3673_v62 = vpop.xlane.xlu0 %3672 }
0x1485   : > { %v3680_v63 = vmul.f32 0.03125, %v3673_v62 }
0x1487   : > { %v3683_v0 = vadd.f32 1e-06, %v3680_v63 }
0x1488   : > { %v3364_v1 = vpop.xlane.xlu0 %3363 }
0x1489   : > { %5179 = vrsqrt.f32 %v3683_v0 }
0x148a   : > { %5181 = vrcp.f32 %v3364_v1 }
0x148c   : > { %v3658_v2 = vpop.xlane.xlu0 %3657 }
0x148d   : > { %v3663_v4 = vmul.f32 0.03125, %v3658_v2 }
0x148f   : > { %v3666_v45 = vsub.f32 %v3651_v56, %v3663_v4 }
0x1491   : > { %v3669_v47 = vmul.f32 %v3666_v45, %v3666_v45 }
0x1493   : > { %v5180_v5 = vpop.eup %5179  ;;  %v3674_v8 = vsel %vm917_vm2, %v3669_v47, 0.0 }
0x1494   : > { %v5182_v10 = vpop.eup %5181  ;;  %v3689_v9 = vmul.f32 %v5180_v5, %v3665_v37  ;;  %3675 = vadd.xlane.f32.xlu0 %v3674_v8 }
0x1495   : > { %v3462_v14 = vmul.f32 %v5182_v10, %v3456_v30  ;;  %v5085_v30 = vpack.c.bf16 %v914_v13, %v913_v28 }
0x1496   : > { %v3698_v48 = vmul.f32 %v6177_v7, %v3689_v9 }
0x1497   : > { %4862 = vmatmul.mubr.msk.f32.gmra.mrb[78].mxu1 %vm1244_vm5, %v3462_v14  ;;  %5086 = vmatpush3.bf16.msra.mxu0 %v5085_v30  ;;  %v4229_v14 = vld [vmem:[%s6304_s18 + $0x1] ss:$0 sm:$0xff] }
0x1498   : > { %v3707_v15 = vadd.f32 %v6183_v25, %v3698_v48  ;;  %4885 = vmatprep.mubr.msk.f32.mxu1 %vm5204_vm0, %v5205_v6 }
0x149b   : > { %4886 = vmatmul.mubr.msk.f32.vlgmr.msra.gmra.mrb[80].mxu1 %vm917_vm2, %v3707_v15 }
0x149c   : > { %4888 = vmatprep.mubr.msk.f32.mxu1 %vm5204_vm0, %v5205_v6 }
0x1521   : > { %v3676_v32 = vpop.xlane.xlu0 %3675 }
0x1522   : > { %v3681_v34 = vmul.f32 0.03125, %v3676_v32 }
0x1524   : > { %v3684_v50 = vadd.f32 1e-06, %v3681_v34 }
0x1526   : > { %5183 = vrsqrt.f32 %v3684_v50 }
0x1530   : > { %v5184_v36 = vpop.eup %5183 }
0x1531   : > { %v3690_v39 = vmul.f32 %v5184_v36, %v3666_v45 }
0x1533   : > { %v3699_v42 = vmul.f32 %v6177_v7, %v3690_v39  ;;  %v3959_v39 = vld [vmem:[%s6307_s21 + $0x18] sm:$0xff] }
0x1535   : > { %v3708_v51 = vadd.f32 %v6183_v25, %v3699_v42 }
0x1537   : > { %4889 = vmatmul.mubr.msk.f32.gmra.mrb[82].mxu1 %vm917_vm2, %v3708_v51 }
0x1538   : > { %4891 = vmatprep.mubr.msk.f32.mxu1 %vm5204_vm0, %v5205_v6 }
0x156a   : > { %v3548_v44 = vpop.f32.mrb[78].mxu1 }
0x156b   : > { %v3638_v46 = vadd.f32 %v6140_v40, %v3548_v44  ;;  %v4863_v29 = vpop.f32.mrb[79].mxu1 }
0x156d   : > { %v3643_v49 = vadd.f32 %v3638_v46, %v5819_v43 }
0x156e   : > { %v3791_v52 = vpop.f32.mrb[80].mxu1 }
0x156f   : > { %v3792_v16 = vadd.f32 %v6229_v19, %v3791_v52  ;;  %v4887_v21 = vpop.f32.mrb[81].mxu1  ;;  %v3652_v33 = vadd.f32 %v6145_v12, %v3643_v49 }
0x1571   : > { %v3808_v37 = vmul.f32 0.044715, %v3792_v16  ;;  %v3659_v24 = vsel %vm924_vm3, %v3652_v33, 0.0  ;;  %v3805_v57 = vmul.f32 0.5, %v3792_v16 }
0x1572   : > { %3660 = vadd.xlane.f32.xlu1 %v3659_v24 }
0x1573   : > { %v3811_v54 = vmul.f32 %v3808_v37, %v3792_v16 }
0x1575   : > { %v3814_v40 = vmul.f32 %v3811_v54, %v3792_v16  ;;  %v4230_v54 = vld [vmem:[%s6305_s19] ss:$0 sm:$0xff] }
0x1577   : > { %v3817_v55 = vadd.f32 %v3814_v40, %v3792_v16 }
0x1579   : > { %v3820_v31 = vmul.f32 0.7978846, %v3817_v55 }
0x157b   : > { %5185 = vtanh.f32 %v3820_v31 }
0x1585   : > { %v5186_v56 = vpop.eup %5185 }
0x1586   : > { %v3826_v26 = vadd.f32 1.0, %v5186_v56 }
0x1588   : > { %v3829_v38 = vmul.f32 %v3826_v26, %v3805_v57 }
0x158a   : > { %4911 = vmatmul.mubr.msk.f32.vlgmr.msra.gmra.mrb[82].mxu0 %vm2327_vm9, %v3829_v38 }
0x158b   : > { %4913 = vmatprep.mubr.msk.f32.mxu0 %vm5204_vm0, %v5205_v6 }
0x15ff   : > { %v3661_v43 = vpop.xlane.xlu1 %3660 }
0x1600   : > { %v3664_v12 = vmul.f32 0.03125, %v3661_v43  ;;  %v4232_v43 = vld [vmem:[%s6308_s22] ss:$0 sm:$0xff] }
0x1602   : > { %v3667_v58 = vsub.f32 %v3652_v33, %v3664_v12 }
0x1604   : > { %v3670_v59 = vmul.f32 %v3667_v58, %v3667_v58 }
0x1606   : > { %v3677_v60 = vsel %vm924_vm3, %v3670_v59, 0.0 }
0x1607   : > { %3678 = vadd.xlane.f32.xlu1 %v3677_v60 }
0x160a   : > { %v3796_v61 = vpop.f32.mrb[82].mxu1 }
0x160b   : > { %v3797_v62 = vadd.f32 %v6229_v19, %v3796_v61  ;;  %v4890_v63 = vpop.f32.mrb[83].mxu1 }
0x160d   : > { %v3809_v0 = vmul.f32 0.044715, %v3797_v62  ;;  %v3806_v5 = vmul.f32 0.5, %v3797_v62 }
0x160f   : > { %v3812_v1 = vmul.f32 %v3809_v0, %v3797_v62 }
0x1611   : > { %v3815_v2 = vmul.f32 %v3812_v1, %v3797_v62 }
0x1613   : > { %v3818_v4 = vadd.f32 %v3815_v2, %v3797_v62 }
0x1615   : > { %v3821_v45 = vmul.f32 0.7978846, %v3818_v4 }
0x1617   : > { %5187 = vtanh.f32 %v3821_v45 }
0x1621   : > { %v5188_v47 = vpop.eup %5187 }
0x1622   : > { %v3827_v8 = vadd.f32 1.0, %v5188_v47 }
0x1624   : > { %v3830_v10 = vmul.f32 %v3827_v8, %v3806_v5 }
0x1626   : > { %4914 = vmatmul.mubr.msk.f32.gmra.mrb[84].mxu0 %vm2327_vm9, %v3830_v10 }
0x1627   : > { %4916 = vmatprep.mubr.msk.f32.mxu0 %vm5204_vm0, %v5205_v6 }
0x165d   : > { %v3907_v9 = vpop.f32.mrb[82].mxu0 }
0x165e   : > { %v3919_v48 = vadd.f32 %v3907_v9, %v6149_v53  ;;  %v4912_v15 = vpop.f32.mrb[83].mxu0 }
0x1660   : > { %v3926_v35 = vadd.f32 %v4229_v14, %v3919_v48 }
0x1662   : > { %v3929_v17 = vsel %vm917_vm2, %v3926_v35, 0.0 }
0x1663   : > { %3930 = vadd.xlane.f32.xlu0 %v3929_v17 }
0x1694   : > { %v3679_v18 = vpop.xlane.xlu1 %3678 }
0x1695   : > { %v3682_v41 = vmul.f32 0.03125, %v3679_v18 }
0x1697   : > { %v3685_v20 = vadd.f32 1e-06, %v3682_v41 }
0x1699   : > { %5189 = vrsqrt.f32 %v3685_v20 }
0x16a3   : > { %v5190_v22 = vpop.eup %5189 }
0x16a4   : > { %v3691_v23 = vmul.f32 %v5190_v22, %v3667_v58 }
0x16a6   : > { %v3700_v11 = vmul.f32 %v6177_v7, %v3691_v23  ;;  %v3956_v7 = vld [vmem:[%s6307_s21] sm:$0xff] }
0x16a8   : > { %v3709_v27 = vadd.f32 %v6183_v25, %v3700_v11  ;;  %v3957_v25 = vld [vmem:[%s6307_s21 + $0x8] sm:$0xff] }
0x16a9   : > { %v5088_v36 = vpack.c.bf16 %v3957_v25, %v3956_v7 }
0x16aa   : > { %4892 = vmatmul.mubr.msk.f32.gmra.mrb[84].mxu1 %vm917_vm2, %v3709_v27 }
0x16ab   : > { %4927 = vmatprep.mubr.msk.f32.mxu1 %vm5204_vm0, %v5205_v6  ;;  %5089 = vmatpush3.bf16.msra.mxu1 %v5088_v36  ;;  %v3958_v6 = vld [vmem:[%s6307_s21 + $0x10] sm:$0xff] }
0x16ac   : > { %5090 = vmatprep.subr.bf16.mxu1 %v5203_v3  ;;  %v5091_v42 = vpack.c.bf16 %v3959_v39, %v3958_v6 }
0x16af   : > { %5092 = vmatpush3.bf16.msra.mxu1 %v5091_v42 }
0x16f0   : > { %v3931_v53 = vpop.xlane.xlu0 %3930 }
0x16f1   : > { %v3932_v28 = vmul.f32 0.03125, %v3931_v53 }
0x16f3   : > { %v3933_v13 = vsub.f32 %v3926_v35, %v3932_v28 }
0x16f5   : > { %v3934_v30 = vmul.f32 %v3933_v13, %v3933_v13 }
0x16f7   : > { %v3935_v32 = vsel %vm917_vm2, %v3934_v30, 0.0 }
0x16f8   : > { %3936 = vadd.xlane.f32.xlu1 %v3935_v32 }
0x16f9   : > { %v3912_v34 = vpop.f32.mrb[84].mxu0 }
0x16fa   : > { %v4915_v50 = vpop.f32.mrb[85].mxu0 }
0x177d   : > { %v3801_v51 = vpop.f32.mrb[84].mxu1 }
0x177e   : > { %v3802_v44 = vadd.f32 %v6229_v19, %v3801_v51  ;;  %v4893_v46 = vpop.f32.mrb[85].mxu1  ;;  %v4231_v19 = vld [vmem:[%s6306_s20] ss:$0 sm:$0xff] }
0x1780   : > { %v3810_v29 = vmul.f32 0.044715, %v3802_v44  ;;  %v3807_v31 = vmul.f32 0.5, %v3802_v44 }
0x1782   : > { %v3813_v49 = vmul.f32 %v3810_v29, %v3802_v44 }
0x1784   : > { %v3816_v52 = vmul.f32 %v3813_v49, %v3802_v44 }
0x1785   : > { %v3937_v16 = vpop.xlane.xlu1 %3936 }
0x1786   : > { %v3819_v21 = vadd.f32 %v3816_v52, %v3802_v44  ;;  %v3938_v3 = vmul.f32 0.03125, %v3937_v16 }
0x1788   : > { %v3939_v33 = vadd.f32 1e-06, %v3938_v3  ;;  %v3822_v37 = vmul.f32 0.7978846, %v3819_v21 }
0x178a   : > { %5191 = vrsqrt.f32 %v3939_v33 }
0x178b   : > { %5193 = vtanh.f32 %v3822_v37 }
0x1794   : > { %v5192_v24 = vpop.eup %5191 }
0x1795   : > { %v5194_v40 = vpop.eup %5193  ;;  %v3941_v55 = vmul.f32 %v5192_v24, %v3933_v13 }
0x1796   : > { %v3828_v56 = vadd.f32 1.0, %v5194_v40 }
0x1797   : > { %v3948_v57 = vmul.f32 %v4230_v54, %v3941_v55 }
0x1798   : > { %v3831_v26 = vmul.f32 %v3828_v56, %v3807_v31 }
0x1799   : > { %v3955_v38 = vadd.f32 %v4231_v19, %v3948_v57 }
0x179a   : > { %4917 = vmatmul.mubr.msk.f32.gmra.mrb[86].mxu0 %vm2327_vm9, %v3831_v26 }
0x179b   : > { %4928 = vmatmul.mubr.msk.f32.vlgmr.msra.gmra.mrb[86].mxu1 %vm917_vm2, %v3955_v38 }
0x186d   : > { %v3916_v12 = vpop.f32.mrb[86].mxu0 }
0x186e   : > { %v4918_v58 = vpop.f32.mrb[87].mxu0  ;;  %v4036_v59 = vpop.f32.mrb[86].mxu1 }
0x186f   : > { %v4037_v60 = vadd.f32 %v4232_v43, %v4036_v59  ;;  %v4929_v61 = vpop.f32.mrb[87].mxu1 }
0x1871   : > { %4040 = vst [vmem:[%s708_s6] sm:$0xff] %v4037_v60 }
0x1872 PF: > { %s33_s4 = sadd.s32 1, %s5201_s4  }
0x1873   : > { %p30_p4 = scmp.ge.s32.totalorder %s33_s4, 4  }
0x1875   :  { %32 = sbr.rel (!%p30_p4) target bundleno = 9 (0x9), region = 142 }

</bundles_post_ra>
